<compile_context>
chip_gen: v5e
topology: v5e:2x2
jax: 0.10.0
libtpu: 0.0.40
codegen_flags: <defaults>
</compile_context>

<pallas_src>
import jax
import jax.numpy as jnp
from jax.experimental import pallas as pl
from jax.experimental.pallas import tpu as pltpu


# ----------------------------------------------------------------------------
# Fused Pallas kernel: conv1x1+bn+relu -> conv3x3+bn+relu -> conv1x1+bn+res+relu
# ----------------------------------------------------------------------------

def _bottleneck_kernel(x_ref, w1_ref, w2_ref, w3_ref,
                       s1_ref, b1_ref, s2_ref, b2_ref, s3_ref, b3_ref,
                       o_ref, h1p_ref, p_ref):
    _, H, W, cin = x_ref.shape
    cmid = w1_ref.shape[1]
    cout = w3_ref.shape[1]
    M = H * W

    # ---- stage 1: 1x1 conv (channel matmul) + folded BN affine + ReLU ------
    x2d = x_ref[...].reshape(M, cin)                                  # bf16
    y1 = jnp.dot(x2d, w1_ref[...], preferred_element_type=jnp.float32)
    y1 = jnp.maximum(y1 * s1_ref[...] + b1_ref[...], 0.0)            # f32 (M, Cmid)

    # write h1 into the interior of a zero-padded VMEM scratch (pad=1, stride=1)
    h1p_ref[...] = jnp.zeros_like(h1p_ref)
    h1p_ref[1:H + 1, 1:W + 1, :] = y1.reshape(H, W, cmid)

    # ---- stage 2: 3x3 conv as ONE matmul with K = 9*Cmid --------------------
    # Pack the 9 shifted windows of padded h1 along the channel (lane) axis.
    for t in range(9):                       # static unroll over kernel taps
        dh, dw = t // 3, t % 3
        tap = h1p_ref[dh:dh + H, dw:dw + W, :]                        # f32 (H,W,Cmid)
        p_ref[:, :, t * cmid:(t + 1) * cmid] = tap.astype(p_ref.dtype)
    p2d = p_ref[...].reshape(M, 9 * cmid)                             # bf16 (M, 9*Cmid)
    y2 = jnp.dot(p2d, w2_ref[...], preferred_element_type=jnp.float32)
    y2 = jnp.maximum(y2 * s2_ref[...] + b2_ref[...], 0.0)            # f32 (M, Cmid)
    h2 = y2.astype(jnp.bfloat16)

    # ---- stage 3: 1x1 conv + folded BN affine + identity residual + ReLU ---
    y3 = jnp.dot(h2, w3_ref[...], preferred_element_type=jnp.float32)
    y3 = y3 * s3_ref[...] + b3_ref[...] + x2d.astype(jnp.float32)
    o_ref[...] = jnp.maximum(y3, 0.0).reshape(1, H, W, cout).astype(o_ref.dtype)


# ----------------------------------------------------------------------------
# Wrapper: layout plumbing (NCHW <-> NHWC), bf16 casts, pallas_call
# ----------------------------------------------------------------------------

def bottleneck_forward(x_nchw, params):
    N, cin, H, W = x_nchw.shape
    cmid = params["w1"].shape[1]
    cout = params["w3"].shape[1]
    assert cout == cin, "identity residual requires input_size == output_size * 4"

    x_nhwc = jnp.transpose(x_nchw, (0, 2, 3, 1)).astype(jnp.bfloat16)
    w1 = params["w1"].astype(jnp.bfloat16)                              # (Cin, Cmid)
    w2 = params["w2"].reshape(9 * cmid, cmid).astype(jnp.bfloat16)      # tap-major K
    w3 = params["w3"].astype(jnp.bfloat16)                              # (Cmid, Cout)
    s1, b1 = params["s1"], params["b1"]
    s2, b2 = params["s2"], params["b2"]
    s3, b3 = params["s3"], params["b3"]

    M = H * W
    flops = 2 * N * M * (cin * cmid + 9 * cmid * cmid + cmid * cout)
    bytes_accessed = (x_nhwc.size * 2 + N * M * cout * 4
                      + (w1.size + w2.size + w3.size) * 2
                      + sum(a.size for a in (s1, b1, s2, b2, s3, b3)) * 4)

    grid_spec = pltpu.PrefetchScalarGridSpec(
        num_scalar_prefetch=0,
        grid=(N,),
        in_specs=[
            pl.BlockSpec((1, H, W, cin), lambda n: (n, 0, 0, 0)),   # x (one image)
            pl.BlockSpec((cin, cmid), lambda n: (0, 0)),            # w1
            pl.BlockSpec((9 * cmid, cmid), lambda n: (0, 0)),       # w2 (taps folded)
            pl.BlockSpec((cmid, cout), lambda n: (0, 0)),           # w3
            pl.BlockSpec((1, cmid), lambda n: (0, 0)),              # s1
            pl.BlockSpec((1, cmid), lambda n: (0, 0)),              # b1
            pl.BlockSpec((1, cmid), lambda n: (0, 0)),              # s2
            pl.BlockSpec((1, cmid), lambda n: (0, 0)),              # b2
            pl.BlockSpec((1, cout), lambda n: (0, 0)),              # s3
            pl.BlockSpec((1, cout), lambda n: (0, 0)),              # b3
        ],
        out_specs=pl.BlockSpec((1, H, W, cout), lambda n: (n, 0, 0, 0)),
        scratch_shapes=[
            pltpu.VMEM((H + 2, W + 2, cmid), jnp.float32),   # zero-padded h1
            pltpu.VMEM((H, W, 9 * cmid), jnp.bfloat16),      # im2col patches (VMEM only)
        ],
    )

    out_nhwc = pl.pallas_call(
        _bottleneck_kernel,
        grid_spec=grid_spec,
        out_shape=jax.ShapeDtypeStruct((N, H, W, cout), jnp.float32),
        compiler_params=pltpu.CompilerParams(
            dimension_semantics=("parallel",),          # shard images over TCs (v7x)
            vmem_limit_bytes=64 * 1024 * 1024),         # sized against v7x VMEM
        cost_estimate=pl.CostEstimate(flops=flops, transcendentals=0,
                                      bytes_accessed=bytes_accessed),
    )(x_nhwc, w1, w2, w3, s1, b1, s2, b2, s3, b3)

    return out_nhwc.transpose(0, 3, 1, 2)                # NHWC -> NCHW


bottleneck_forward_jit = jax.jit(bottleneck_forward)


# ----------------------------------------------------------------------------
# Pure-JAX reference (f32) for correctness check
# ----------------------------------------------------------------------------

def ref_forward(x_nchw, params, eps=1e-5):
    def bn(y, g, b, m, v):
        return (y - m[None, :, None, None]) / jnp.sqrt(v[None, :, None, None] + eps) \
            * g[None, :, None, None] + b[None, :, None, None]

    dn = ("NCHW", "OIHW", "NCHW")
    w1 = params["w1"].T[:, :, None, None]
    w2 = params["w2"].reshape(3, 3, *params["w2"].shape[1:]).transpose(3, 2, 0, 1)
    w3 = params["w3"].T[:, :, None, None]

    out = jax.lax.conv_general_dilated(x_nchw, w1, (1, 1), "VALID", dimension_numbers=dn)
    out = jax.nn.relu(bn(out, *params["bn1"]))
    out = jax.lax.conv_general_dilated(out, w2, (1, 1), ((1, 1), (1, 1)), dimension_numbers=dn)
    out = jax.nn.relu(bn(out, *params["bn2"]))
    out = jax.lax.conv_general_dilated(out, w3, (1, 1), "VALID", dimension_numbers=dn)
    out = bn(out, *params["bn3"])
    out = out + x_nchw
    return jax.nn.relu(out)


# ----------------------------------------------------------------------------
# Deterministic parameters + run
# ----------------------------------------------------------------------------

def fold_bn(gamma, beta, mean, var, eps=1e-5):
    scale = gamma / jnp.sqrt(var + eps)
    bias = beta - mean * scale
    return scale[None, :], bias[None, :]          # (1, C) for row broadcast


def make_params(key, cin, cmid):
    cout = cmid * 4                               # Bottleneck.expansion == 4
    assert cout == cin, "identity residual requires input_size == output_size * 4"
    ks = jax.random.split(key, 6)

    def bn_params(k, c):
        k1, k2, k3, k4 = jax.random.split(k, 4)
        gamma = jax.random.uniform(k1, (c,), jnp.float32, 0.5, 1.5)
        beta = 0.1 * jax.random.normal(k2, (c,), jnp.float32)
        mean = 0.1 * jax.random.normal(k3, (c,), jnp.float32)
        var = jax.random.uniform(k4, (c,), jnp.float32, 0.5, 1.5)
        return gamma, beta, mean, var

    w1 = 0.1 * jax.random.normal(ks[0], (cin, cmid), jnp.float32)
    w2 = 0.1 * jax.random.normal(ks[1], (9, cmid, cmid), jnp.float32)   # tap, Cin, Cout
    w3 = 0.1 * jax.random.normal(ks[2], (cmid, cout), jnp.float32)
    bn1, bn2, bn3 = bn_params(ks[3], cmid), bn_params(ks[4], cmid), bn_params(ks[5], cout)

    s1, b1 = fold_bn(*bn1)
    s2, b2 = fold_bn(*bn2)
    s3, b3 = fold_bn(*bn3)
    return dict(w1=w1, w2=w2, w3=w3,
                s1=s1, b1=b1, s2=s2, b2=b2, s3=s3, b3=b3,
                bn1=bn1, bn2=bn2, bn3=bn3)


if __name__ == "__main__":
    key = jax.random.PRNGKey(0)
    k_x, k_p = jax.random.split(key)

    N, Cin, H, W = 2, 16, 16, 16          # input_size=16, output_size=4, expansion=4
    Cmid = 4

    x = jax.random.normal(k_x, (N, Cin, H, W), jnp.float32)
    params = make_params(k_p, Cin, Cmid)

    out = jax.block_until_ready(bottleneck_forward_jit(x, params))
    ref = jax.block_until_ready(ref_forward(x, params))

    assert out.shape == (N, Cin, H, W)
    max_err = float(jnp.max(jnp.abs(out - ref)))
    # bf16 matmul inputs + bf16 residual vs f32 reference -> loosened tolerance
    assert jnp.allclose(out, ref, atol=5e-2, rtol=5e-2), \
        f"mismatch vs reference (max abs err {max_err})"
    print("KERNEL_OK")
</pallas_src>

<mosaic_0001>
module attributes {stable_mosaic.version = 11 : i64} {
  func.func @_bottleneck_kernel(%arg0: i32, %arg1: memref<1x16x16x16xbf16, #tpu.memory_space<vmem>>, %arg2: memref<16x4xbf16, #tpu.memory_space<vmem>>, %arg3: memref<36x4xbf16, #tpu.memory_space<vmem>>, %arg4: memref<4x16xbf16, #tpu.memory_space<vmem>>, %arg5: memref<1x4xf32, #tpu.memory_space<vmem>>, %arg6: memref<1x4xf32, #tpu.memory_space<vmem>>, %arg7: memref<1x4xf32, #tpu.memory_space<vmem>>, %arg8: memref<1x4xf32, #tpu.memory_space<vmem>>, %arg9: memref<1x16xf32, #tpu.memory_space<vmem>>, %arg10: memref<1x16xf32, #tpu.memory_space<vmem>>, %arg11: memref<1x16x16x16xf32, #tpu.memory_space<vmem>>, %arg12: memref<18x18x4xf32, #tpu.memory_space<vmem>>, %arg13: memref<16x16x36xbf16, #tpu.memory_space<vmem>>) attributes {dimension_semantics = [#tpu.dimension_semantics<parallel>], iteration_bounds = array<i64: 2>, scalar_prefetch = 0 : i64, scratch_operands = 2 : i64, tpu.core_type = #tpu.core_type<tc>, window_params = [{transform_indices = @transform_0, window_bounds = array<i64: 1, 16, 16, 16>}, {pipeline_mode = #tpu.pipeline_mode<synchronous>, transform_indices = @transform_1, window_bounds = array<i64: 16, 4>}, {pipeline_mode = #tpu.pipeline_mode<synchronous>, transform_indices = @transform_2, window_bounds = array<i64: 36, 4>}, {pipeline_mode = #tpu.pipeline_mode<synchronous>, transform_indices = @transform_3, window_bounds = array<i64: 4, 16>}, {pipeline_mode = #tpu.pipeline_mode<synchronous>, transform_indices = @transform_4, window_bounds = array<i64: 1, 4>}, {pipeline_mode = #tpu.pipeline_mode<synchronous>, transform_indices = @transform_5, window_bounds = array<i64: 1, 4>}, {pipeline_mode = #tpu.pipeline_mode<synchronous>, transform_indices = @transform_6, window_bounds = array<i64: 1, 4>}, {pipeline_mode = #tpu.pipeline_mode<synchronous>, transform_indices = @transform_7, window_bounds = array<i64: 1, 4>}, {pipeline_mode = #tpu.pipeline_mode<synchronous>, transform_indices = @transform_8, window_bounds = array<i64: 1, 16>}, {pipeline_mode = #tpu.pipeline_mode<synchronous>, transform_indices = @transform_9, window_bounds = array<i64: 1, 16>}, {transform_indices = @transform_10, window_bounds = array<i64: 1, 16, 16, 16>}]} {
    %c0 = arith.constant 0 : index
    %c0_0 = arith.constant 0 : index
    %c0_1 = arith.constant 0 : index
    %c0_2 = arith.constant 0 : index
    %0 = vector.load %arg1[%c0, %c0_0, %c0_1, %c0_2] : memref<1x16x16x16xbf16, #tpu.memory_space<vmem>>, vector<1x16x16x16xbf16>
    %1 = vector.shape_cast %0 : vector<1x16x16x16xbf16> to vector<256x16xbf16>
    %c0_3 = arith.constant 0 : index
    %c0_4 = arith.constant 0 : index
    %2 = vector.load %arg2[%c0_3, %c0_4] : memref<16x4xbf16, #tpu.memory_space<vmem>>, vector<16x4xbf16>
    %cst = arith.constant dense<0.000000e+00> : vector<256x4xf32>
    %3 = tpu.matmul %1, %2, %cst {dimension_numbers = #tpu.dot_dimension_numbers<[1], [0], [0], [1], [0, 0, 1, 1], [], []>} : vector<256x16xbf16>, vector<16x4xbf16>, vector<256x4xf32> -> vector<256x4xf32>
    %c0_5 = arith.constant 0 : index
    %c0_6 = arith.constant 0 : index
    %4 = vector.load %arg5[%c0_5, %c0_6] : memref<1x4xf32, #tpu.memory_space<vmem>>, vector<1x4xf32>
    %5 = vector.broadcast %4 : vector<1x4xf32> to vector<256x4xf32>
    %6 = arith.mulf %3, %5 : vector<256x4xf32>
    %c0_7 = arith.constant 0 : index
    %c0_8 = arith.constant 0 : index
    %7 = vector.load %arg6[%c0_7, %c0_8] : memref<1x4xf32, #tpu.memory_space<vmem>>, vector<1x4xf32>
    %8 = vector.broadcast %7 : vector<1x4xf32> to vector<256x4xf32>
    %9 = arith.addf %6, %8 : vector<256x4xf32>
    %cst_9 = arith.constant 0.000000e+00 : f32
    %10 = vector.broadcast %cst_9 : f32 to vector<256x4xf32>
    %11 = arith.maximumf %9, %10 : vector<256x4xf32>
    %cst_10 = arith.constant 0.000000e+00 : f32
    %12 = vector.broadcast %cst_10 : f32 to vector<18x18x4xf32>
    %c0_11 = arith.constant 0 : index
    %c0_12 = arith.constant 0 : index
    %c0_13 = arith.constant 0 : index
    %13 = vector.load %arg12[%c0_11, %c0_12, %c0_13] : memref<18x18x4xf32, #tpu.memory_space<vmem>>, vector<18x18x4xf32>
    tpu.vector_store %arg12[%c0_11, %c0_12, %c0_13], %12 {strides = array<i32>} : memref<18x18x4xf32, #tpu.memory_space<vmem>>, vector<18x18x4xf32>,
    %14 = vector.shape_cast %11 : vector<256x4xf32> to vector<16x16x4xf32>
    %c1 = arith.constant 1 : index
    %c1_14 = arith.constant 1 : index
    %c0_15 = arith.constant 0 : index
    %15 = vector.load %arg12[%c1, %c1_14, %c0_15] : memref<18x18x4xf32, #tpu.memory_space<vmem>>, vector<16x16x4xf32>
    tpu.vector_store %arg12[%c1, %c1_14, %c0_15], %14 {strides = array<i32>} : memref<18x18x4xf32, #tpu.memory_space<vmem>>, vector<16x16x4xf32>,
    %c0_16 = arith.constant 0 : index
    %c0_17 = arith.constant 0 : index
    %c0_18 = arith.constant 0 : index
    %16 = vector.load %arg12[%c0_16, %c0_17, %c0_18] : memref<18x18x4xf32, #tpu.memory_space<vmem>>, vector<16x16x4xf32>
    %17 = arith.truncf %16 : vector<16x16x4xf32> to vector<16x16x4xbf16>
    %c0_19 = arith.constant 0 : index
    %c0_20 = arith.constant 0 : index
    %c0_21 = arith.constant 0 : index
    %18 = vector.load %arg13[%c0_19, %c0_20, %c0_21] : memref<16x16x36xbf16, #tpu.memory_space<vmem>>, vector<16x16x4xbf16>
    tpu.vector_store %arg13[%c0_19, %c0_20, %c0_21], %17 {strides = array<i32>} : memref<16x16x36xbf16, #tpu.memory_space<vmem>>, vector<16x16x4xbf16>,
    %c0_22 = arith.constant 0 : index
    %c1_23 = arith.constant 1 : index
    %c0_24 = arith.constant 0 : index
    %19 = vector.load %arg12[%c0_22, %c1_23, %c0_24] : memref<18x18x4xf32, #tpu.memory_space<vmem>>, vector<16x16x4xf32>
    %20 = arith.truncf %19 : vector<16x16x4xf32> to vector<16x16x4xbf16>
    %c0_25 = arith.constant 0 : index
    %c0_26 = arith.constant 0 : index
    %c4 = arith.constant 4 : index
    %21 = vector.load %arg13[%c0_25, %c0_26, %c4] : memref<16x16x36xbf16, #tpu.memory_space<vmem>>, vector<16x16x4xbf16>
    tpu.vector_store %arg13[%c0_25, %c0_26, %c4], %20 {strides = array<i32>} : memref<16x16x36xbf16, #tpu.memory_space<vmem>>, vector<16x16x4xbf16>,
    %c0_27 = arith.constant 0 : index
    %c2 = arith.constant 2 : index
    %c0_28 = arith.constant 0 : index
    %22 = vector.load %arg12[%c0_27, %c2, %c0_28] : memref<18x18x4xf32, #tpu.memory_space<vmem>>, vector<16x16x4xf32>
    %23 = arith.truncf %22 : vector<16x16x4xf32> to vector<16x16x4xbf16>
    %c0_29 = arith.constant 0 : index
    %c0_30 = arith.constant 0 : index
    %c8 = arith.constant 8 : index
    %24 = vector.load %arg13[%c0_29, %c0_30, %c8] : memref<16x16x36xbf16, #tpu.memory_space<vmem>>, vector<16x16x4xbf16>
    tpu.vector_store %arg13[%c0_29, %c0_30, %c8], %23 {strides = array<i32>} : memref<16x16x36xbf16, #tpu.memory_space<vmem>>, vector<16x16x4xbf16>,
    %c1_31 = arith.constant 1 : index
    %c0_32 = arith.constant 0 : index
    %c0_33 = arith.constant 0 : index
    %25 = vector.load %arg12[%c1_31, %c0_32, %c0_33] : memref<18x18x4xf32, #tpu.memory_space<vmem>>, vector<16x16x4xf32>
    %26 = arith.truncf %25 : vector<16x16x4xf32> to vector<16x16x4xbf16>
    %c0_34 = arith.constant 0 : index
    %c0_35 = arith.constant 0 : index
    %c12 = arith.constant 12 : index
    %27 = vector.load %arg13[%c0_34, %c0_35, %c12] : memref<16x16x36xbf16, #tpu.memory_space<vmem>>, vector<16x16x4xbf16>
    tpu.vector_store %arg13[%c0_34, %c0_35, %c12], %26 {strides = array<i32>} : memref<16x16x36xbf16, #tpu.memory_space<vmem>>, vector<16x16x4xbf16>,
    %c1_36 = arith.constant 1 : index
    %c1_37 = arith.constant 1 : index
    %c0_38 = arith.constant 0 : index
    %28 = vector.load %arg12[%c1_36, %c1_37, %c0_38] : memref<18x18x4xf32, #tpu.memory_space<vmem>>, vector<16x16x4xf32>
    %29 = arith.truncf %28 : vector<16x16x4xf32> to vector<16x16x4xbf16>
    %c0_39 = arith.constant 0 : index
    %c0_40 = arith.constant 0 : index
    %c16 = arith.constant 16 : index
    %30 = vector.load %arg13[%c0_39, %c0_40, %c16] : memref<16x16x36xbf16, #tpu.memory_space<vmem>>, vector<16x16x4xbf16>
    tpu.vector_store %arg13[%c0_39, %c0_40, %c16], %29 {strides = array<i32>} : memref<16x16x36xbf16, #tpu.memory_space<vmem>>, vector<16x16x4xbf16>,
    %c1_41 = arith.constant 1 : index
    %c2_42 = arith.constant 2 : index
    %c0_43 = arith.constant 0 : index
    %31 = vector.load %arg12[%c1_41, %c2_42, %c0_43] : memref<18x18x4xf32, #tpu.memory_space<vmem>>, vector<16x16x4xf32>
    %32 = arith.truncf %31 : vector<16x16x4xf32> to vector<16x16x4xbf16>
    %c0_44 = arith.constant 0 : index
    %c0_45 = arith.constant 0 : index
    %c20 = arith.constant 20 : index
    %33 = vector.load %arg13[%c0_44, %c0_45, %c20] : memref<16x16x36xbf16, #tpu.memory_space<vmem>>, vector<16x16x4xbf16>
    tpu.vector_store %arg13[%c0_44, %c0_45, %c20], %32 {strides = array<i32>} : memref<16x16x36xbf16, #tpu.memory_space<vmem>>, vector<16x16x4xbf16>,
    %c2_46 = arith.constant 2 : index
    %c0_47 = arith.constant 0 : index
    %c0_48 = arith.constant 0 : index
    %34 = vector.load %arg12[%c2_46, %c0_47, %c0_48] : memref<18x18x4xf32, #tpu.memory_space<vmem>>, vector<16x16x4xf32>
    %35 = arith.truncf %34 : vector<16x16x4xf32> to vector<16x16x4xbf16>
    %c0_49 = arith.constant 0 : index
    %c0_50 = arith.constant 0 : index
    %c24 = arith.constant 24 : index
    %36 = vector.load %arg13[%c0_49, %c0_50, %c24] : memref<16x16x36xbf16, #tpu.memory_space<vmem>>, vector<16x16x4xbf16>
    tpu.vector_store %arg13[%c0_49, %c0_50, %c24], %35 {strides = array<i32>} : memref<16x16x36xbf16, #tpu.memory_space<vmem>>, vector<16x16x4xbf16>,
    %c2_51 = arith.constant 2 : index
    %c1_52 = arith.constant 1 : index
    %c0_53 = arith.constant 0 : index
    %37 = vector.load %arg12[%c2_51, %c1_52, %c0_53] : memref<18x18x4xf32, #tpu.memory_space<vmem>>, vector<16x16x4xf32>
    %38 = arith.truncf %37 : vector<16x16x4xf32> to vector<16x16x4xbf16>
    %c0_54 = arith.constant 0 : index
    %c0_55 = arith.constant 0 : index
    %c28 = arith.constant 28 : index
    %39 = vector.load %arg13[%c0_54, %c0_55, %c28] : memref<16x16x36xbf16, #tpu.memory_space<vmem>>, vector<16x16x4xbf16>
    tpu.vector_store %arg13[%c0_54, %c0_55, %c28], %38 {strides = array<i32>} : memref<16x16x36xbf16, #tpu.memory_space<vmem>>, vector<16x16x4xbf16>,
    %c2_56 = arith.constant 2 : index
    %c2_57 = arith.constant 2 : index
    %c0_58 = arith.constant 0 : index
    %40 = vector.load %arg12[%c2_56, %c2_57, %c0_58] : memref<18x18x4xf32, #tpu.memory_space<vmem>>, vector<16x16x4xf32>
    %41 = arith.truncf %40 : vector<16x16x4xf32> to vector<16x16x4xbf16>
    %c0_59 = arith.constant 0 : index
    %c0_60 = arith.constant 0 : index
    %c32 = arith.constant 32 : index
    %42 = vector.load %arg13[%c0_59, %c0_60, %c32] : memref<16x16x36xbf16, #tpu.memory_space<vmem>>, vector<16x16x4xbf16>
    tpu.vector_store %arg13[%c0_59, %c0_60, %c32], %41 {strides = array<i32>} : memref<16x16x36xbf16, #tpu.memory_space<vmem>>, vector<16x16x4xbf16>,
    %c0_61 = arith.constant 0 : index
    %c0_62 = arith.constant 0 : index
    %c0_63 = arith.constant 0 : index
    %43 = vector.load %arg13[%c0_61, %c0_62, %c0_63] : memref<16x16x36xbf16, #tpu.memory_space<vmem>>, vector<16x16x36xbf16>
    %44 = vector.shape_cast %43 : vector<16x16x36xbf16> to vector<256x36xbf16>
    %c0_64 = arith.constant 0 : index
    %c0_65 = arith.constant 0 : index
    %45 = vector.load %arg3[%c0_64, %c0_65] : memref<36x4xbf16, #tpu.memory_space<vmem>>, vector<36x4xbf16>
    %cst_66 = arith.constant dense<0.000000e+00> : vector<256x4xf32>
    %46 = tpu.matmul %44, %45, %cst_66 {dimension_numbers = #tpu.dot_dimension_numbers<[1], [0], [0], [1], [0, 0, 1, 1], [], []>} : vector<256x36xbf16>, vector<36x4xbf16>, vector<256x4xf32> -> vector<256x4xf32>
    %c0_67 = arith.constant 0 : index
    %c0_68 = arith.constant 0 : index
    %47 = vector.load %arg7[%c0_67, %c0_68] : memref<1x4xf32, #tpu.memory_space<vmem>>, vector<1x4xf32>
    %48 = vector.broadcast %47 : vector<1x4xf32> to vector<256x4xf32>
    %49 = arith.mulf %46, %48 : vector<256x4xf32>
    %c0_69 = arith.constant 0 : index
    %c0_70 = arith.constant 0 : index
    %50 = vector.load %arg8[%c0_69, %c0_70] : memref<1x4xf32, #tpu.memory_space<vmem>>, vector<1x4xf32>
    %51 = vector.broadcast %50 : vector<1x4xf32> to vector<256x4xf32>
    %52 = arith.addf %49, %51 : vector<256x4xf32>
    %cst_71 = arith.constant 0.000000e+00 : f32
    %53 = vector.broadcast %cst_71 : f32 to vector<256x4xf32>
    %54 = arith.maximumf %52, %53 : vector<256x4xf32>
    %55 = arith.truncf %54 : vector<256x4xf32> to vector<256x4xbf16>
    %c0_72 = arith.constant 0 : index
    %c0_73 = arith.constant 0 : index
    %56 = vector.load %arg4[%c0_72, %c0_73] : memref<4x16xbf16, #tpu.memory_space<vmem>>, vector<4x16xbf16>
    %cst_74 = arith.constant dense<0.000000e+00> : vector<256x16xf32>
    %57 = tpu.matmul %55, %56, %cst_74 {dimension_numbers = #tpu.dot_dimension_numbers<[1], [0], [0], [1], [0, 0, 1, 1], [], []>} : vector<256x4xbf16>, vector<4x16xbf16>, vector<256x16xf32> -> vector<256x16xf32>
    %c0_75 = arith.constant 0 : index
    %c0_76 = arith.constant 0 : index
    %58 = vector.load %arg9[%c0_75, %c0_76] : memref<1x16xf32, #tpu.memory_space<vmem>>, vector<1x16xf32>
    %59 = vector.broadcast %58 : vector<1x16xf32> to vector<256x16xf32>
    %60 = arith.mulf %57, %59 : vector<256x16xf32>
    %c0_77 = arith.constant 0 : index
    %c0_78 = arith.constant 0 : index
    %61 = vector.load %arg10[%c0_77, %c0_78] : memref<1x16xf32, #tpu.memory_space<vmem>>, vector<1x16xf32>
    %62 = vector.broadcast %61 : vector<1x16xf32> to vector<256x16xf32>
    %63 = arith.addf %60, %62 : vector<256x16xf32>
    %64 = arith.extf %1 : vector<256x16xbf16> to vector<256x16xf32>
    %65 = arith.addf %63, %64 : vector<256x16xf32>
    %cst_79 = arith.constant 0.000000e+00 : f32
    %66 = vector.broadcast %cst_79 : f32 to vector<256x16xf32>
    %67 = arith.maximumf %65, %66 : vector<256x16xf32>
    %68 = vector.shape_cast %67 : vector<256x16xf32> to vector<1x16x16x16xf32>
    %c0_80 = arith.constant 0 : index
    %c0_81 = arith.constant 0 : index
    %c0_82 = arith.constant 0 : index
    %c0_83 = arith.constant 0 : index
    %69 = vector.load %arg11[%c0_80, %c0_81, %c0_82, %c0_83] : memref<1x16x16x16xf32, #tpu.memory_space<vmem>>, vector<1x16x16x16xf32>
    tpu.vector_store %arg11[%c0_80, %c0_81, %c0_82, %c0_83], %68 {strides = array<i32>} : memref<1x16x16x16xf32, #tpu.memory_space<vmem>>, vector<1x16x16x16xf32>,
    return
  }
  func.func @transform_0(%arg0: i32) -> (i32, i32, i32, i32) {
    %c0_i32 = arith.constant 0 : i32
    %c0_i32_0 = arith.constant 0 : i32
    %c0_i32_1 = arith.constant 0 : i32
    %c0_i32_2 = arith.constant 0 : i32
    return %arg0, %c0_i32, %c0_i32_0, %c0_i32_1 : i32, i32, i32, i32
  }
  func.func @transform_1(%arg0: i32) -> (i32, i32) {
    %c0_i32 = arith.constant 0 : i32
    %c0_i32_0 = arith.constant 0 : i32
    %c0_i32_1 = arith.constant 0 : i32
    return %c0_i32, %c0_i32_0 : i32, i32
  }
  func.func @transform_2(%arg0: i32) -> (i32, i32) {
    %c0_i32 = arith.constant 0 : i32
    %c0_i32_0 = arith.constant 0 : i32
    %c0_i32_1 = arith.constant 0 : i32
    return %c0_i32, %c0_i32_0 : i32, i32
  }
  func.func @transform_3(%arg0: i32) -> (i32, i32) {
    %c0_i32 = arith.constant 0 : i32
    %c0_i32_0 = arith.constant 0 : i32
    %c0_i32_1 = arith.constant 0 : i32
    return %c0_i32, %c0_i32_0 : i32, i32
  }
  func.func @transform_4(%arg0: i32) -> (i32, i32) {
    %c0_i32 = arith.constant 0 : i32
    %c0_i32_0 = arith.constant 0 : i32
    %c0_i32_1 = arith.constant 0 : i32
    return %c0_i32, %c0_i32_0 : i32, i32
  }
  func.func @transform_5(%arg0: i32) -> (i32, i32) {
    %c0_i32 = arith.constant 0 : i32
    %c0_i32_0 = arith.constant 0 : i32
    %c0_i32_1 = arith.constant 0 : i32
    return %c0_i32, %c0_i32_0 : i32, i32
  }
  func.func @transform_6(%arg0: i32) -> (i32, i32) {
    %c0_i32 = arith.constant 0 : i32
    %c0_i32_0 = arith.constant 0 : i32
    %c0_i32_1 = arith.constant 0 : i32
    return %c0_i32, %c0_i32_0 : i32, i32
  }
  func.func @transform_7(%arg0: i32) -> (i32, i32) {
    %c0_i32 = arith.constant 0 : i32
    %c0_i32_0 = arith.constant 0 : i32
    %c0_i32_1 = arith.constant 0 : i32
    return %c0_i32, %c0_i32_0 : i32, i32
  }
  func.func @transform_8(%arg0: i32) -> (i32, i32) {
    %c0_i32 = arith.constant 0 : i32
    %c0_i32_0 = arith.constant 0 : i32
    %c0_i32_1 = arith.constant 0 : i32
    return %c0_i32, %c0_i32_0 : i32, i32
  }
  func.func @transform_9(%arg0: i32) -> (i32, i32) {
    %c0_i32 = arith.constant 0 : i32
    %c0_i32_0 = arith.constant 0 : i32
    %c0_i32_1 = arith.constant 0 : i32
    return %c0_i32, %c0_i32_0 : i32, i32
  }
  func.func @transform_10(%arg0: i32) -> (i32, i32, i32, i32) {
    %c0_i32 = arith.constant 0 : i32
    %c0_i32_0 = arith.constant 0 : i32
    %c0_i32_1 = arith.constant 0 : i32
    %c0_i32_2 = arith.constant 0 : i32
    return %arg0, %c0_i32, %c0_i32_0, %c0_i32_1 : i32, i32, i32, i32
  }
}

</mosaic_0001>

<bundles_post_ra>
// kernel: bottleneck_forward.1
= control target key start
LH: loop header
LB: loop body
LE: loop exit
PB: predicated region body
PF: predicated region fallthrough
CT: control target
= control target key end

     0   :  { %s3844_s13 = smov 0   ;;  %s5351_s0 = inlined_call_operand.vmem [shape: bf16[2,16,16,16], index: 0, kind: input, shape index: {}]   ;;  %s5352_s1 = inlined_call_operand.vmem [shape: bf16[16,4], index: 1, kind: input, shape index: {}]   ;;  %s5353_s2 = inlined_call_operand.vmem [shape: bf16[36,4], index: 2, kind: input, shape index: {}]   ;;  %s5354_s3 = inlined_call_operand.vmem [shape: bf16[4,16], index: 3, kind: input, shape index: {}]   ;;  %s5355_s4 = inlined_call_operand.vmem [shape: f32[1,4], index: 4, kind: input, shape index: {}]   ;;  %s5356_s5 = inlined_call_operand.vmem [shape: f32[1,4], index: 5, kind: input, shape index: {}]   ;;  %s5357_s6 = inlined_call_operand.vmem [shape: f32[1,4], index: 6, kind: input, shape index: {}]   ;;  %s5358_s7 = inlined_call_operand.vmem [shape: f32[1,4], index: 7, kind: input, shape index: {}]   ;;  %s5359_s8 = inlined_call_operand.vmem [shape: f32[1,16], index: 8, kind: input, shape index: {}]   ;;  %s5360_s9 = inlined_call_operand.vmem [shape: f32[1,16], index: 9, kind: input, shape index: {}]   ;;  %s5361_s10 = inlined_call_operand.vmem [shape: f32[2,16,16,16], index: 10, kind: output, shape index: {}]  }
   0x1 LB: > { %s3500_s14 = sadd.s32 4294967295, %s3778_s13   ;;  %p3504_p0 = scmp.ge.s32.totalorder %s3778_s13, 1  ;;  %s3778_s13 = sphi %s3844_s13, %s20_s13  }
   0x2   : > { %p312_p1 = scmp.lt.s32.totalorder %s3778_s13, 3 }
   0x4   : > { %p313_p2 = pnand %p3504_p0, %p312_p1 }
   0x5   : > { %p350_p3 = scmp.lt.s32.totalorder (!%p313_p2), %s3500_s14, 1  ;;  %s3781_s21 = smov (!%p313_p2), 4  }
   0x6   : > { %316 = sbr.rel (%p313_p2) target bundleno = 1250 (0x4e2), region = 60  ;;  %s3782_s22 = smov (!%p313_p2), 8  }
   0x7   : > { %s3783_s27 = smov (!%p313_p2), 16   ;;  %s3784_s28 = smov (!%p313_p2), 12  }
   0x8   : > { %s3785_s29 = smov (!%p313_p2), 20   ;;  %s3786_s30 = smov (!%p313_p2), 28  }
   0x9   : > { %s3787_s11 = smov (!%p313_p2), 24   ;;  %s3788_s12 = smov (!%p313_p2), 32  }
   0xb   : > { %v3717_v0 = vld [vmem:[%s5352_s1] sm:$0xff]  ;;  %s5363_s14 = smov (!%p350_p3, %s3500_s14), 1  ;;  %vm481_vm0 = vcmask 130048   ;;  %vm723_vm1 = vcmask 31744   ;;  %v3780_v3 = vmov 0.0   ;;  %vm726_vm2 = vcmask 25600  }
   0xc   : > { %537 = vmatpush.bf16.msra.mxu0 %v3717_v0  ;;  %3736 = vmatpush.bf16.msra.mxu3 %v3717_v0  ;;  %s3699_s17 = sshll.u32 %s5363_s14, 7  ;;  %724 = vst.msk [vmem:[#allocation2] sm:$0xff] %vm723_vm1, %v3780_v3  ;;  %v3990_v16 = vld [vmem:[%s5355_s4] ss:$0 sm:$0xff]  ;;  %vm876_vm3 = vcmask 27648   ;;  %vm1101_vm4 = vcmask 60448  }
   0xd   : > { %s3861_s20 = scalar_lea.vmem %s5351_s0, %s3699_s17  ;;  %725 = vst.msk [vmem:[#allocation2 + $0x8] sm:$0xff] %vm723_vm1, %v3780_v3  ;;  %v3995_v17 = vld [vmem:[%s5356_s5] ss:$0 sm:$0xff]  ;;  %vm1326_vm5 = vcmask 93248   ;;  %vm1551_vm6 = vcmask 126048   ;;  %vm1776_vm7 = vcmask 158848  }
   0xe   : > { %v3701_v1 = vld [vmem:[%s3861_s20] sm:$0xff]  ;;  %v3714_v2 = vld [vmem:[%s3861_s20 + $0x68] sm:$0xff]  ;;  %728 = vst.msk [vmem:[#allocation2 + $0x18] sm:$0xff] %vm723_vm1, %v3780_v3  ;;  %v3715_v7 = vld [vmem:[%s3861_s20 + $0x70] sm:$0xff]  ;;  %vm2001_vm8 = vcmask 191648   ;;  %vm2227_vm9 = vcmask 224448  }
   0xf   : > { %3577 = vmatmul.msk.bf16.vlgmr.msra.gmra.mxu0 %vm481_vm0, %v3701_v1  ;;  %3590 = vmatmul.msk.bf16.vlgmr.msra.gmra.mxu3 %vm481_vm0, %v3714_v2  ;;  %729 = vst.msk [vmem:[#allocation2 + $0x20] sm:$0xff] %vm723_vm1, %v3780_v3  ;;  %v3702_v6 = vld [vmem:[%s3861_s20 + $0x8] sm:$0xff]  ;;  %v3703_v8 = vld [vmem:[%s3861_s20 + $0x10] sm:$0xff]  ;;  %v3704_v11 = vld [vmem:[%s3861_s20 + $0x18] sm:$0xff]  ;;  %vm2452_vm10 = vcmask 257248   ;;  %vm2677_vm11 = vcmask 290048  }
  0x10   : > { %731 = vst.msk [vmem:[#allocation2 + $0x30] sm:$0xff] %vm723_vm1, %v3780_v3  ;;  %v3705_v27 = vld [vmem:[%s3861_s20 + $0x20] sm:$0xff]  ;;  %vm2891_vm12 = vcmask 1041408   ;;  %vm2842_vm13 = vcmask 293888   ;;  %s3700_s15 = sshll.u32 %s5363_s14, 8 }
  0x11   : > { %732 = vst.msk [vmem:[#allocation2 + $0x38] sm:$0xff] %vm723_vm1, %v3780_v3  ;;  %s4839_s18 = scalar_lea.vmem %s5361_s10, %s3700_s15 }
  0x12   : > { %734 = vst.msk [vmem:[#allocation2 + $0x48] sm:$0xff] %vm723_vm1, %v3780_v3 }
  0x13   : > { %735 = vst.msk [vmem:[#allocation2 + $0x50] sm:$0xff] %vm723_vm1, %v3780_v3 }
  0x14   : > { %v909_v4 = vld [vmem:[#allocation2 + $0x1] sm:$0xff]  ;;  %737 = vst.msk [vmem:[#allocation2 + $0x60] sm:$0xff] %vm723_vm1, %v3780_v3 }
  0x15   : > { %v941_v5 = vpack.c.bf16 %v909_v4, %v909_v4  ;;  %738 = vst.msk [vmem:[#allocation2 + $0x68] sm:$0xff] %vm723_vm1, %v3780_v3  ;;  %v1134_v14 = vld [vmem:[#allocation2 + $0x2] sm:$0xff] }
  0x16   : > { %740 = vst.msk [vmem:[#allocation2 + $0x78] sm:$0xff] %vm723_vm1, %v3780_v3  ;;  %v1166_v15 = vpack.c.bf16 %v1134_v14, %v1134_v14  ;;  %v3706_v4 = vld [vmem:[%s3861_s20 + $0x28] sm:$0xff] }
  0x17   : > { %1005 = vrot.lane.b32.xlu0 %v941_v5, %s3781_s21  ;;  %741 = vst.msk [vmem:[#allocation2 + $0x80] sm:$0xff] %vm723_vm1, %v3780_v3 }
  0x18   : > { %743 = vst.msk [vmem:[#allocation2 + $0x90] sm:$0xff] %vm723_vm1, %v3780_v3  ;;  %1230 = vrot.lane.b32.xlu2 %v1166_v15, %s3782_s22 }
  0x19   : > { %744 = vst.msk [vmem:[#allocation2 + $0x98] sm:$0xff] %vm723_vm1, %v3780_v3 }
  0x1a   : > { %746 = vst.msk [vmem:[#allocation2 + $0xa8] sm:$0xff] %vm723_vm1, %v3780_v3 }
  0x1b   : > { %747 = vst.msk [vmem:[#allocation2 + $0xb0] sm:$0xff] %vm723_vm1, %v3780_v3 }
  0x1c   : > { %749 = vst.msk [vmem:[#allocation2 + $0xc0] sm:$0xff] %vm723_vm1, %v3780_v3 }
  0x1d   : > { %750 = vst.msk [vmem:[#allocation2 + $0xc8] sm:$0xff] %vm723_vm1, %v3780_v3 }
  0x1e   : > { %752 = vst.msk [vmem:[#allocation2 + $0xd8] sm:$0xff] %vm723_vm1, %v3780_v3 }
  0x1f   : > { %3578 = vmatmul.msk.bf16.gmra.mxu0 %vm481_vm0, %v3702_v6  ;;  %3591 = vmatmul.msk.bf16.gmra.mxu3 %vm481_vm0, %v3715_v7  ;;  %753 = vst.msk [vmem:[#allocation2 + $0xe0] sm:$0xff] %vm723_vm1, %v3780_v3 }
  0x20   : > { %755 = vst.msk [vmem:[#allocation2 + $0xf0] sm:$0xff] %vm723_vm1, %v3780_v3 }
  0x21   : > { %756 = vst.msk [vmem:[#allocation2 + $0xf8] sm:$0xff] %vm723_vm1, %v3780_v3 }
  0x22   : > { %758 = vst.msk [vmem:[#allocation2 + $0x108] sm:$0xff] %vm723_vm1, %v3780_v3 }
  0x23   : > { %759 = vst.msk [vmem:[#allocation2 + $0x110] sm:$0xff] %vm723_vm1, %v3780_v3 }
  0x24   : > { %761 = vst.msk [vmem:[#allocation2 + $0x120] sm:$0xff] %vm723_vm1, %v3780_v3 }
  0x25   : > { %762 = vst.msk [vmem:[#allocation2 + $0x128] sm:$0xff] %vm723_vm1, %v3780_v3 }
  0x26   : > { %764 = vst.msk [vmem:[#allocation2 + $0x138] sm:$0xff] %vm723_vm1, %v3780_v3 }
  0x27   : > { %765 = vst.msk [vmem:[#allocation2 + $0x140] sm:$0xff] %vm723_vm1, %v3780_v3 }
  0x28   : > { %767 = vst.msk [vmem:[#allocation2 + $0x150] sm:$0xff] %vm723_vm1, %v3780_v3 }
  0x29   : > { %768 = vst.msk [vmem:[#allocation2 + $0x158] sm:$0xff] %vm723_vm1, %v3780_v3 }
  0x2a   : > { %770 = vst.msk [vmem:[#allocation2 + $0x168] sm:$0xff] %vm723_vm1, %v3780_v3 }
  0x2b   : > { %771 = vst.msk [vmem:[#allocation2 + $0x170] sm:$0xff] %vm723_vm1, %v3780_v3 }
  0x2c   : > { %773 = vst.msk [vmem:[#allocation2 + $0x180] sm:$0xff] %vm723_vm1, %v3780_v3 }
  0x2d   : > { %774 = vst.msk [vmem:[#allocation2 + $0x188] sm:$0xff] %vm723_vm1, %v3780_v3 }
  0x2e   : > { %776 = vst.msk [vmem:[#allocation2 + $0x198] sm:$0xff] %vm723_vm1, %v3780_v3 }
  0x2f   : > { %3579 = vmatmul.msk.bf16.gmra.mxu0 %vm481_vm0, %v3703_v8  ;;  %777 = vst.msk [vmem:[#allocation2 + $0x1a0] sm:$0xff] %vm723_vm1, %v3780_v3 }
  0x30   : > { %727 = vst.msk [vmem:[#allocation2 + $0x10] sm:$0x3] %vm726_vm2, %v3780_v3 }
  0x31   : > { %730 = vst.msk [vmem:[#allocation2 + $0x28] sm:$0x3] %vm726_vm2, %v3780_v3 }
  0x32   : > { %733 = vst.msk [vmem:[#allocation2 + $0x40] sm:$0x3] %vm726_vm2, %v3780_v3 }
  0x33   : > { %736 = vst.msk [vmem:[#allocation2 + $0x58] sm:$0x3] %vm726_vm2, %v3780_v3 }
  0x34   : > { %739 = vst.msk [vmem:[#allocation2 + $0x70] sm:$0x3] %vm726_vm2, %v3780_v3 }
  0x35   : > { %742 = vst.msk [vmem:[#allocation2 + $0x88] sm:$0x3] %vm726_vm2, %v3780_v3 }
  0x36   : > { %745 = vst.msk [vmem:[#allocation2 + $0xa0] sm:$0x3] %vm726_vm2, %v3780_v3 }
  0x37   : > { %v910_v9 = vld [vmem:[#allocation2 + $0x9] sm:$0xff]  ;;  %748 = vst.msk [vmem:[#allocation2 + $0xb8] sm:$0x3] %vm726_vm2, %v3780_v3 }
  0x38   : > { %v942_v10 = vpack.c.bf16 %v910_v9, %v910_v9  ;;  %751 = vst.msk [vmem:[#allocation2 + $0xd0] sm:$0x3] %vm726_vm2, %v3780_v3  ;;  %v1135_v12 = vld [vmem:[#allocation2 + $0xa] sm:$0xff] }
  0x39   : > { %754 = vst.msk [vmem:[#allocation2 + $0xe8] sm:$0x3] %vm726_vm2, %v3780_v3  ;;  %v1167_v13 = vpack.c.bf16 %v1135_v12, %v1135_v12 }
  0x3a   : > { %1007 = vrot.lane.b32.xlu0 %v942_v10, %s3781_s21  ;;  %757 = vst.msk [vmem:[#allocation2 + $0x100] sm:$0x3] %vm726_vm2, %v3780_v3 }
  0x3b   : > { %760 = vst.msk [vmem:[#allocation2 + $0x118] sm:$0x3] %vm726_vm2, %v3780_v3 }
  0x3c   : > { %763 = vst.msk [vmem:[#allocation2 + $0x130] sm:$0x3] %vm726_vm2, %v3780_v3 }
  0x3d   : > { %766 = vst.msk [vmem:[#allocation2 + $0x148] sm:$0x3] %vm726_vm2, %v3780_v3 }
  0x3e   : > { %769 = vst.msk [vmem:[#allocation2 + $0x160] sm:$0x3] %vm726_vm2, %v3780_v3 }
  0x3f   : > { %772 = vst.msk [vmem:[#allocation2 + $0x178] sm:$0x3] %vm726_vm2, %v3780_v3  ;;  %3580 = vmatmul.msk.bf16.gmra.mxu0 %vm481_vm0, %v3704_v11 }
  0x40   : > { %775 = vst.msk [vmem:[#allocation2 + $0x190] sm:$0x3] %vm726_vm2, %v3780_v3 }
  0x41   : > { %778 = vst.msk [vmem:[#allocation2 + $0x1a8] sm:$0x3] %vm726_vm2, %v3780_v3 }
  0x42   : > { %1232 = vrot.lane.b32.xlu0 %v1167_v13, %s3782_s22 }
  0x4f   : > { %3581 = vmatmul.msk.bf16.gmra.mxu0 %vm481_vm0, %v3705_v27 }
  0x5f   : > { %3582 = vmatmul.msk.bf16.gmra.mxu0 %vm481_vm0, %v3706_v4 }
  0x8c   : > { %v539_v18 = vpop.f32.mrf.mxu0 }
  0x8d   : > { %v623_v19 = vmul.f32 %v3990_v16, %v539_v18 }
  0x8f   : > { %v659_v20 = vadd.f32 %v3995_v17, %v623_v19 }
  0x91   : > { %v691_v21 = vmax.f32 %v659_v20, 0.0 }
  0x92   : > { %v604_v22 = vpop.f32.mrf.mxu3 }
  0x93   : > { %780 = vst.msk [vmem:[#allocation2 + $0x19] sm:$0xff] %vm723_vm1, %v691_v21  ;;  %v649_v23 = vmul.f32 %v3990_v16, %v604_v22 }
  0x94   : > { %v541_v24 = vpop.f32.mrf.mxu0 }
  0x95   : > { %v624_v25 = vmul.f32 %v3990_v16, %v541_v24  ;;  %v685_v26 = vadd.f32 %v3995_v17, %v649_v23 }
  0x97   : > { %v660_v28 = vadd.f32 %v3995_v17, %v624_v25  ;;  %v717_v29 = vmax.f32 %v685_v26, 0.0 }
  0x99   : > { %v692_v30 = vmax.f32 %v660_v28, 0.0  ;;  %806 = vst.msk [vmem:[#allocation2 + $0x151] sm:$0xff] %vm723_vm1, %v717_v29 }
  0x9a   : > { %v606_v31 = vpop.f32.mrf.mxu3  ;;  %v1584_v32 = vld [vmem:[#allocation2 + $0x19] sm:$0xff] }
  0x9b   : > { %v1359_v33 = vld [vmem:[#allocation2 + $0x18] sm:$0xff]  ;;  %781 = vst.msk [vmem:[#allocation2 + $0x21] sm:$0xff] %vm723_vm1, %v692_v30  ;;  %v650_v34 = vmul.f32 %v3990_v16, %v606_v31  ;;  %v1616_v35 = vpack.c.bf16 %v1584_v32, %v1584_v32  ;;  %v3707_v32 = vld [vmem:[%s3861_s20 + $0x30] sm:$0xff] }
  0x9c   : > { %v1391_v36 = vpack.c.bf16 %v1359_v33, %v1359_v33  ;;  %v544_v37 = vpop.f32.mrf.mxu0  ;;  %3583 = vmatmul.msk.bf16.gmra.mxu0 %vm481_vm0, %v3707_v32 }
  0x9d   : > { %v686_v38 = vadd.f32 %v3995_v17, %v650_v34  ;;  %1680 = vrot.lane.b32.xlu0 %v1616_v35, %s3783_s27  ;;  %1009 = vrot.lane.b32.xlu1 %v1616_v35, %s3781_s21  ;;  %v625_v39 = vmul.f32 %v3990_v16, %v544_v37 }
  0x9e   : > { %879 = vst.msk [vmem:[#allocation3 + $0x8] sm:$0xf] %vm876_vm3, %v1391_v36 }
  0x9f   : > { %v718_v40 = vmax.f32 %v686_v38, 0.0  ;;  %v661_v41 = vadd.f32 %v3995_v17, %v625_v39 }
  0xa0   : > { %v840_v42 = vld [vmem:[#allocation2 + $0x150] sm:$0xff] }
  0xa1   : > { %807 = vst.msk [vmem:[#allocation2 + $0x159] sm:$0xff] %vm723_vm1, %v718_v40  ;;  %v693_v43 = vmax.f32 %v661_v41, 0.0  ;;  %v872_v44 = vpack.c.bf16 %v840_v42, %v840_v42  ;;  %v937_v54 = vld [vmem:[#allocation2 + $0x151] sm:$0xff] }
  0xa2   : > { %v1810_v45 = vld [vmem:[#allocation2 + $0x22] sm:$0xff]  ;;  %v609_v47 = vpop.f32.mrf.mxu3  ;;  %v969_v58 = vpack.c.bf16 %v937_v54, %v937_v54  ;;  %v1809_v7 = vld [vmem:[#allocation2 + $0x1a] sm:$0xff] }
  0xa3   : > { %v1360_v46 = vld [vmem:[#allocation2 + $0x20] sm:$0xff]  ;;  %782 = vst.msk [vmem:[#allocation2 + $0x31] sm:$0xff] %vm723_vm1, %v693_v43  ;;  %v1842_v48 = vpack.c.bf16 %v1810_v45, %v1810_v45  ;;  %v651_v50 = vmul.f32 %v3990_v16, %v609_v47  ;;  %v1841_v10 = vpack.c.bf16 %v1809_v7, %v1809_v7  ;;  %v1006_v43 = vpop.permute.xlu0 %1005  ;;  %v3708_v45 = vld [vmem:[%s3861_s20 + $0x38] sm:$0xff]  ;;  %v1231_v47 = vpop.permute.xlu2 %1230 }
  0xa4   : > { %v1392_v49 = vpack.c.bf16 %v1360_v46, %v1360_v46  ;;  %v546_v51 = vpop.f32.mrf.mxu0  ;;  %905 = vst.msk [vmem:[#allocation3 + $0x70] sm:$0xf] %vm876_vm3, %v872_v44  ;;  %v912_v6 = vld [vmem:[#allocation2 + $0x21] sm:$0xff] }
  0xa5   : > { %1455 = vrot.lane.b32.xlu1 %v1391_v36, %s3784_s28  ;;  %1907 = vrot.lane.b32.xlu0 %v1842_v48, %s3785_s29  ;;  %v687_v52 = vadd.f32 %v3995_v17, %v651_v50  ;;  %v626_v53 = vmul.f32 %v3990_v16, %v546_v51  ;;  %v944_v8 = vpack.c.bf16 %v912_v6, %v912_v6  ;;  %v812_v44 = vld [vmem:[#allocation2] sm:$0xff]  ;;  %v813_v50 = vld [vmem:[#allocation2 + $0x8] sm:$0xff] }
  0xa6   : > { %880 = vst.msk [vmem:[#allocation3 + $0xc] sm:$0xf] %vm876_vm3, %v1392_v49  ;;  %1236 = vrot.lane.b32.xlu2 %v1842_v48, %s3782_s22  ;;  %v844_v46 = vpack.c.bf16 %v812_v44, %v812_v44 }
  0xa7   : > { %v719_v55 = vmax.f32 %v687_v52, 0.0  ;;  %v662_v56 = vadd.f32 %v3995_v17, %v626_v53  ;;  %v845_v52 = vpack.c.bf16 %v813_v50, %v813_v50 }
  0xa8   : > { %v1162_v57 = vld [vmem:[#allocation2 + $0x152] sm:$0xff]  ;;  %v1163_v33 = vld [vmem:[#allocation2 + $0x15a] sm:$0xff]  ;;  %877 = vst.msk [vmem:[#allocation3] sm:$0xf] %vm876_vm3, %v844_v46 }
  0xa9   : > { %v1194_v59 = vpack.c.bf16 %v1162_v57, %v1162_v57  ;;  %808 = vst.msk [vmem:[#allocation2 + $0x169] sm:$0xff] %vm723_vm1, %v719_v55  ;;  %v694_v60 = vmax.f32 %v662_v56, 0.0  ;;  %v841_v61 = vld [vmem:[#allocation2 + $0x158] sm:$0xff]  ;;  %v1195_v36 = vpack.c.bf16 %v1163_v33, %v1163_v33  ;;  %v3709_v57 = vld [vmem:[%s3861_s20 + $0x40] sm:$0xff] }
  0xaa   : > { %v1361_v62 = vld [vmem:[#allocation2 + $0x30] sm:$0xff]  ;;  %v611_v63 = vpop.f32.mrf.mxu3  ;;  %v873_v0 = vpack.c.bf16 %v841_v61, %v841_v61  ;;  %v938_v19 = vld [vmem:[#allocation2 + $0x159] sm:$0xff]  ;;  %1102 = vst.msk [vmem:[#allocation3] sm:$0xf] %vm1101_vm4, %v1006_v43 }
  0xab   : > { %v4027_v1 = vpack.c.bf16 %v1361_v62, %v1361_v62  ;;  %783 = vst.msk [vmem:[#allocation2 + $0x39] sm:$0xff] %vm723_vm1, %v694_v60  ;;  %v652_v2 = vmul.f32 %v3990_v16, %v611_v63  ;;  %v2260_v13 = vld [vmem:[#allocation2 + $0x31] sm:$0xff]  ;;  %v970_v25 = vpack.c.bf16 %v938_v19, %v938_v19 }
  0xac   : > { %906 = vst.msk [vmem:[#allocation3 + $0x74] sm:$0xf] %vm876_vm3, %v873_v0  ;;  %v549_v14 = vpop.f32.mrf.mxu0  ;;  %v2292_v20 = vpack.c.bf16 %v2260_v13, %v2260_v13  ;;  %3584 = vmatmul.msk.bf16.gmra.mxu0 %vm481_vm0, %v3708_v45  ;;  %v1008_v51 = vpop.permute.xlu0 %1007  ;;  %v3711_v13 = vld [vmem:[%s3861_s20 + $0x50] sm:$0xff]  ;;  %v3713_v45 = vld [vmem:[%s3861_s20 + $0x60] sm:$0xff] }
  0xad   : > { %1061 = vrot.lane.b32.xlu1 %v969_v58, %s3781_s21  ;;  %1286 = vrot.lane.b32.xlu0 %v1194_v59, %s3782_s22  ;;  %v688_v3 = vadd.f32 %v3995_v17, %v652_v2  ;;  %881 = vst.msk [vmem:[#allocation3 + $0x10] sm:$0xf] %vm876_vm3, %v4027_v1  ;;  %v627_v18 = vmul.f32 %v3990_v16, %v549_v14 }
  0xae   : > { %1457 = vrot.lane.b32.xlu2 %v1392_v49, %s3784_s28  ;;  %1327 = vst.msk [vmem:[#allocation3] sm:$0xf] %vm1326_vm5, %v1231_v47 }
  0xaf   : > { %v720_v5 = vmax.f32 %v688_v3, 0.0  ;;  %v663_v21 = vadd.f32 %v3995_v17, %v627_v18  ;;  %878 = vst.msk [vmem:[#allocation3 + $0x4] sm:$0xf] %vm876_vm3, %v845_v52  ;;  %v3710_v3 = vld [vmem:[%s3861_s20 + $0x48] sm:$0xff] }
  0xb0   : > { %v842_v12 = vld [vmem:[#allocation2 + $0x168] sm:$0xff]  ;;  %1103 = vst.msk [vmem:[#allocation3 + $0x4] sm:$0xf] %vm1101_vm4, %v1008_v51 }
  0xb1   : > { %809 = vst.msk [vmem:[#allocation2 + $0x171] sm:$0xff] %vm723_vm1, %v720_v5  ;;  %v874_v15 = vpack.c.bf16 %v842_v12, %v842_v12  ;;  %v695_v24 = vmax.f32 %v663_v21, 0.0  ;;  %v939_v26 = vld [vmem:[#allocation2 + $0x169] sm:$0xff] }
  0xb2   : > { %v2036_v9 = vld [vmem:[#allocation2 + $0x38] sm:$0xff]  ;;  %v971_v29 = vpack.c.bf16 %v939_v26, %v939_v26 }
  0xb3   : > { %v4041_v11 = vpack.c.bf16 %v2036_v9, %v2036_v9  ;;  %907 = vst.msk [vmem:[#allocation3 + $0x78] sm:$0xf] %vm876_vm3, %v874_v15  ;;  %v1138_v34 = vld [vmem:[#allocation2 + $0x32] sm:$0xff]  ;;  %v2486_v39 = vld [vmem:[#allocation2 + $0x3a] sm:$0xff] }
  0xb4   : > { %784 = vst.msk [vmem:[#allocation2 + $0x49] sm:$0xff] %vm723_vm1, %v695_v24  ;;  %v551_v27 = vpop.f32.mrf.mxu0  ;;  %v914_v35 = vld [vmem:[#allocation2 + $0x39] sm:$0xff]  ;;  %v1170_v37 = vpack.c.bf16 %v1138_v34, %v1138_v34  ;;  %v2518_v40 = vpack.c.bf16 %v2486_v39, %v2486_v39  ;;  %v1233_v56 = vpop.permute.xlu0 %1232 }
  0xb5   : > { %1011 = vrot.lane.b32.xlu1 %v944_v8, %s3781_s21  ;;  %1459 = vrot.lane.b32.xlu0 %v4027_v1, %s3784_s28  ;;  %882 = vst.msk [vmem:[#allocation3 + $0x14] sm:$0xf] %vm876_vm3, %v4041_v11  ;;  %v628_v28 = vmul.f32 %v3990_v16, %v551_v27  ;;  %v946_v38 = vpack.c.bf16 %v914_v35, %v914_v35 }
  0xb6   : > { %1905 = vrot.lane.b32.xlu2 %v1841_v10, %s3785_s29  ;;  %1328 = vst.msk [vmem:[#allocation3 + $0x4] sm:$0xf] %vm1326_vm5, %v1233_v56 }
  0xb7   : > { %v664_v30 = vadd.f32 %v3995_v17, %v628_v28  ;;  %v3712_v28 = vld [vmem:[%s3861_s20 + $0x58] sm:$0xff] }
  0xb8   : > { %v843_v22 = vld [vmem:[#allocation2 + $0x170] sm:$0xff] }
  0xb9   : > { %v875_v23 = vpack.c.bf16 %v843_v22, %v843_v22  ;;  %v696_v31 = vmax.f32 %v664_v30, 0.0  ;;  %v1165_v53 = vld [vmem:[#allocation2 + $0x172] sm:$0xff]  ;;  %v1164_v58 = vld [vmem:[#allocation2 + $0x16a] sm:$0xff] }
  0xba   : > { %v1197_v54 = vpack.c.bf16 %v1165_v53, %v1165_v53  ;;  %v1196_v60 = vpack.c.bf16 %v1164_v58, %v1164_v58 }
  0xbb   : > { %908 = vst.msk [vmem:[#allocation3 + $0x7c] sm:$0xf] %vm876_vm3, %v875_v23  ;;  %v1363_v41 = vld [vmem:[#allocation2 + $0x48] sm:$0xff] }
  0xbc   : > { %785 = vst.msk [vmem:[#allocation2 + $0x51] sm:$0xff] %vm723_vm1, %v696_v31  ;;  %v4068_v42 = vpack.c.bf16 %v1363_v41, %v1363_v41  ;;  %v915_v55 = vld [vmem:[#allocation2 + $0x49] sm:$0xff]  ;;  %3585 = vmatmul.msk.bf16.gmra.mxu0 %vm481_vm0, %v3709_v57  ;;  %v554_v61 = vpop.f32.mrf.mxu0 }
  0xbd   : > { %1234 = vrot.lane.b32.xlu1 %v1841_v10, %s3782_s22  ;;  %2356 = vrot.lane.b32.xlu0 %v2292_v20, %s3786_s30  ;;  %v947_v59 = vpack.c.bf16 %v915_v55, %v915_v55  ;;  %v629_v62 = vmul.f32 %v3990_v16, %v554_v61 }
  0xbe   : > { %1063 = vrot.lane.b32.xlu2 %v970_v25, %s3781_s21  ;;  %883 = vst.msk [vmem:[#allocation3 + $0x18] sm:$0xf] %vm876_vm3, %v4068_v42 }
  0xbf   : > { %v665_v0 = vadd.f32 %v3995_v17, %v629_v62 }
  0xc1   : > { %v697_v2 = vmax.f32 %v665_v0, 0.0 }
  0xc3   : > { %v1364_v48 = vld [vmem:[#allocation2 + $0x50] sm:$0xff]  ;;  %786 = vst.msk [vmem:[#allocation2 + $0x61] sm:$0xff] %vm723_vm1, %v697_v2 }
  0xc4   : > { %v1396_v49 = vpack.c.bf16 %v1364_v48, %v1364_v48  ;;  %v1141_v63 = vld [vmem:[#allocation2 + $0x52] sm:$0xff]  ;;  %v556_v4 = vpop.f32.mrf.mxu0  ;;  %v2487_v15 = vld [vmem:[#allocation2 + $0x4a] sm:$0xff] }
  0xc5   : > { %1682 = vrot.lane.b32.xlu1 %v944_v8, %s3783_s27  ;;  %1065 = vrot.lane.b32.xlu0 %v971_v29, %s3781_s21  ;;  %v630_v5 = vmul.f32 %v3990_v16, %v556_v4  ;;  %v2519_v18 = vpack.c.bf16 %v2487_v15, %v2487_v15  ;;  %v1589_v24 = vld [vmem:[#allocation2 + $0x51] sm:$0xff] }
  0xc6   : > { %1013 = vrot.lane.b32.xlu2 %v2292_v20, %s3781_s21  ;;  %884 = vst.msk [vmem:[#allocation3 + $0x1c] sm:$0xf] %vm876_vm3, %v1396_v49  ;;  %v1621_v25 = vpack.c.bf16 %v1589_v24, %v1589_v24 }
  0xc7   : > { %v666_v7 = vadd.f32 %v3995_v17, %v630_v5 }
  0xc9   : > { %v698_v9 = vmax.f32 %v666_v7, 0.0 }
  0xca   : > { %v2039_v6 = vld [vmem:[#allocation2 + $0x60] sm:$0xff] }
  0xcb   : > { %v4114_v8 = vpack.c.bf16 %v2039_v6, %v2039_v6  ;;  %787 = vst.msk [vmem:[#allocation2 + $0x69] sm:$0xff] %vm723_vm1, %v698_v9  ;;  %v1590_v34 = vld [vmem:[#allocation2 + $0x61] sm:$0xff] }
  0xcc   : > { %3586 = vmatmul.msk.bf16.gmra.mxu0 %vm481_vm0, %v3710_v3  ;;  %v559_v26 = vpop.f32.mrf.mxu0 }
  0xcd   : > { %1288 = vrot.lane.b32.xlu1 %v1195_v36, %s3782_s22  ;;  %1238 = vrot.lane.b32.xlu0 %v1170_v37, %s3782_s22  ;;  %885 = vst.msk [vmem:[#allocation3 + $0x20] sm:$0xf] %vm876_vm3, %v4114_v8  ;;  %v631_v27 = vmul.f32 %v3990_v16, %v559_v26 }
  0xce   : > { %1015 = vrot.lane.b32.xlu2 %v946_v38, %s3781_s21 }
  0xcf   : > { %v667_v32 = vadd.f32 %v3995_v17, %v631_v27 }
  0xd1   : > { %v699_v33 = vmax.f32 %v667_v32, 0.0 }
  0xd2   : > { %v1366_v19 = vld [vmem:[#allocation2 + $0x68] sm:$0xff] }
  0xd3   : > { %788 = vst.msk [vmem:[#allocation2 + $0x79] sm:$0xff] %vm723_vm1, %v699_v33  ;;  %v918_v44 = vld [vmem:[#allocation2 + $0x69] sm:$0xff] }
  0xd4   : > { %v561_v39 = vpop.f32.mrf.mxu0  ;;  %v4174_v50 = vpack.c.bf16 %v918_v44, %v918_v44  ;;  %v1142_v56 = vld [vmem:[#allocation2 + $0x62] sm:$0xff]  ;;  %v1143_v58 = vld [vmem:[#allocation2 + $0x6a] sm:$0xff] }
  0xd5   : > { %2131 = vrot.lane.b32.xlu1 %v4027_v1, %s3787_s11  ;;  %2583 = vrot.lane.b32.xlu0 %v2518_v40, %s3788_s12  ;;  %v4100_v1 = vpack.c.bf16 %v1141_v63, %v1141_v63  ;;  %v1175_v61 = vpack.c.bf16 %v1143_v58, %v1143_v58 }
  0xd6   : > { %2133 = vrot.lane.b32.xlu2 %v4041_v11, %s3787_s11 }
  0xdc   : > { %3587 = vmatmul.msk.bf16.gmra.mxu0 %vm481_vm0, %v3711_v13  ;;  %v564_v51 = vpop.f32.mrf.mxu0  ;;  %v2266_v13 = vld [vmem:[#allocation2 + $0x79] sm:$0xff] }
  0xdd   : > { %1684 = vrot.lane.b32.xlu1 %v2292_v20, %s3783_s27  ;;  %1909 = vrot.lane.b32.xlu0 %v1170_v37, %s3785_s29  ;;  %v4132_v20 = vpack.c.bf16 %v1366_v19, %v1366_v19  ;;  %v633_v52 = vmul.f32 %v3990_v16, %v564_v51 }
  0xde   : > { %2581 = vrot.lane.b32.xlu2 %v1170_v37, %s3788_s12 }
  0xdf   : > { %886 = vst.msk [vmem:[#allocation3 + $0x24] sm:$0xf] %vm876_vm3, %v4132_v20  ;;  %v669_v57 = vadd.f32 %v3995_v17, %v633_v52 }
  0xe4   : > { %v566_v62 = vpop.f32.mrf.mxu0 }
  0xe5   : > { %1240 = vrot.lane.b32.xlu1 %v2518_v40, %s3782_s22  ;;  %1292 = vrot.lane.b32.xlu0 %v1197_v54, %s3782_s22  ;;  %v634_v63 = vmul.f32 %v3990_v16, %v566_v62 }
  0xe6   : > { %1686 = vrot.lane.b32.xlu2 %v946_v38, %s3783_s27 }
  0xe7   : > { %v670_v4 = vadd.f32 %v3995_v17, %v634_v63 }
  0xe9   : > { %v702_v6 = vmax.f32 %v670_v4, 0.0 }
  0xeb   : > { %791 = vst.msk [vmem:[#allocation2 + $0x99] sm:$0xff] %vm723_vm1, %v702_v6 }
  0xec   : > { %3588 = vmatmul.msk.bf16.gmra.mxu0 %vm481_vm0, %v3712_v28 }
  0xed   : > { %1461 = vrot.lane.b32.xlu1 %v4041_v11, %s3784_s28  ;;  %1017 = vrot.lane.b32.xlu0 %v947_v59, %s3781_s21  ;;  %v940_v11 = vld [vmem:[#allocation2 + $0x171] sm:$0xff] }
  0xee   : > { %1290 = vrot.lane.b32.xlu2 %v1196_v60, %s3782_s22  ;;  %v972_v12 = vpack.c.bf16 %v940_v11, %v940_v11  ;;  %v1174_v60 = vpack.c.bf16 %v1142_v56, %v1142_v56 }
  0xf5   : > { %2358 = vrot.lane.b32.xlu1 %v946_v38, %s3786_s30  ;;  %1244 = vrot.lane.b32.xlu0 %v4100_v1, %s3782_s22  ;;  %v1622_v38 = vpack.c.bf16 %v1590_v34, %v1590_v34 }
  0xf6   : > { %1463 = vrot.lane.b32.xlu2 %v4068_v42, %s3784_s28 }
  0xfc   : > { %3589 = vmatmul.msk.bf16.gmra.mxu0 %vm481_vm0, %v3713_v45 }
  0xfd   : > { %1911 = vrot.lane.b32.xlu1 %v2518_v40, %s3785_s29  ;;  %1465 = vrot.lane.b32.xlu0 %v1396_v49, %s3784_s28  ;;  %v632_v40 = vmul.f32 %v3990_v16, %v561_v39 }
  0xfe   : > { %2135 = vrot.lane.b32.xlu2 %v4068_v42, %s3787_s11  ;;  %v1367_v42 = vld [vmem:[#allocation2 + $0x78] sm:$0xff] }
  0xff   : > { %v668_v41 = vadd.f32 %v3995_v17, %v632_v40  ;;  %v4164_v43 = vpack.c.bf16 %v1367_v42, %v1367_v42 }
 0x100   : > { %v4120_v10 = vpop.permute.xlu2 %1236 }
 0x101   : > { %v700_v48 = vmax.f32 %v668_v41, 0.0  ;;  %887 = vst.msk [vmem:[#allocation3 + $0x28] sm:$0xf] %vm876_vm3, %v4164_v43 }
 0x103   : > { %789 = vst.msk [vmem:[#allocation2 + $0x81] sm:$0xff] %vm723_vm1, %v700_v48 }
 0x105   : > { %1067 = vrot.lane.b32.xlu1 %v972_v12, %s3781_s21  ;;  %2137 = vrot.lane.b32.xlu0 %v1396_v49, %s3787_s11 }
 0x106   : > { %1688 = vrot.lane.b32.xlu2 %v947_v59, %s3783_s27 }
 0x108   : > { %v1458_v14 = vpop.permute.xlu2 %1457 }
 0x109   : > { %1553 = vst.msk [vmem:[#allocation3 + $0x4] sm:$0xf] %vm1551_vm6, %v1458_v14 }
 0x10a   : > { %v2042_v0 = vld [vmem:[#allocation2 + $0x80] sm:$0xff] }
 0x10b   : > { %v4197_v5 = vpack.c.bf16 %v2042_v0, %v2042_v0  ;;  %v1144_v28 = vld [vmem:[#allocation2 + $0x7a] sm:$0xff]  ;;  %v1145_v58 = vld [vmem:[#allocation2 + $0x82] sm:$0xff] }
 0x10c   : > { %v920_v33 = vld [vmem:[#allocation2 + $0x81] sm:$0xff] }
 0x10d   : > { %2360 = vrot.lane.b32.xlu1 %v947_v59, %s3786_s30  ;;  %2585 = vrot.lane.b32.xlu0 %v2519_v18, %s3788_s12  ;;  %v701_v59 = vmax.f32 %v669_v57, 0.0  ;;  %888 = vst.msk [vmem:[#allocation3 + $0x2c] sm:$0xf] %vm876_vm3, %v4197_v5  ;;  %v4254_v40 = vpack.c.bf16 %v920_v33, %v920_v33 }
 0x10e   : > { %1242 = vrot.lane.b32.xlu2 %v2519_v18, %s3782_s22 }
 0x10f   : > { %v1681_v21 = vpop.permute.xlu0 %1680  ;;  %v1010_v22 = vpop.permute.xlu1 %1009  ;;  %790 = vst.msk [vmem:[#allocation2 + $0x91] sm:$0xff] %vm723_vm1, %v701_v59 }
 0x110   : > { %1104 = vst.msk [vmem:[#allocation3 + $0x8] sm:$0xf] %vm1101_vm4, %v1010_v22  ;;  %v1906_v23 = vpop.permute.xlu2 %1905  ;;  %v4226_v22 = vpack.c.bf16 %v2266_v13, %v2266_v13 }
 0x115   : > { %1690 = vrot.lane.b32.xlu0 %v1621_v25, %s3783_s27  ;;  %1019 = vrot.lane.b32.xlu1 %v1621_v25, %s3781_s21 }
 0x116   : > { %2362 = vrot.lane.b32.xlu2 %v1621_v25, %s3786_s30  ;;  %v3735_v25 = vld [vmem:[%s5353_s2 + $0x8] sm:$0xff]  ;;  %v1369_v27 = vld [vmem:[#allocation2 + $0x90] sm:$0xff] }
 0x117   : > { %v1456_v29 = vpop.permute.xlu1 %1455  ;;  %v4142_v30 = vpop.permute.xlu0 %1907  ;;  %v4241_v34 = vpack.c.bf16 %v1369_v27, %v1369_v27  ;;  %v921_v44 = vld [vmem:[#allocation2 + $0x91] sm:$0xff] }
 0x118   : > { %1552 = vst.msk [vmem:[#allocation3] sm:$0xf] %vm1551_vm6, %v1456_v29  ;;  %v1064_v31 = vpop.permute.xlu2 %1063 }
 0x119   : > { %1777 = vst.msk [vmem:[#allocation3] sm:$0xf] %vm1776_vm7, %v1681_v21  ;;  %v569_v11 = vpop.f32.mrf.mxu0 }
 0x11a   : > { %1131 = vst.msk [vmem:[#allocation3 + $0x74] sm:$0xf] %vm1101_vm4, %v1064_v31  ;;  %v635_v14 = vmul.f32 %v3990_v16, %v569_v11 }
 0x11b   : > { %2002 = vst.msk [vmem:[#allocation3] sm:$0xf] %vm2001_vm8, %v1906_v23 }
 0x11c   : > { %v671_v21 = vadd.f32 %v3995_v17, %v635_v14  ;;  %889 = vst.msk [vmem:[#allocation3 + $0x30] sm:$0xf] %vm876_vm3, %v4241_v34 }
 0x11d   : > { %2587 = vrot.lane.b32.xlu1 %v4100_v1, %s3788_s12  ;;  %2139 = vrot.lane.b32.xlu0 %v4114_v8, %s3787_s11 }
 0x11e   : > { %1915 = vrot.lane.b32.xlu2 %v4100_v1, %s3785_s29  ;;  %v703_v24 = vmax.f32 %v671_v21, 0.0 }
 0x11f   : > { %v1062_v35 = vpop.permute.xlu1 %1061  ;;  %v1287_v36 = vpop.permute.xlu0 %1286 }
 0x120   : > { %1130 = vst.msk [vmem:[#allocation3 + $0x70] sm:$0xf] %vm1101_vm4, %v1062_v35  ;;  %v1014_v37 = vpop.permute.xlu2 %1013 }
 0x121   : > { %1355 = vst.msk [vmem:[#allocation3 + $0x70] sm:$0xf] %vm1326_vm5, %v1287_v36  ;;  %v571_v26 = vpop.f32.mrf.mxu0 }
 0x122   : > { %1106 = vst.msk [vmem:[#allocation3 + $0x10] sm:$0xf] %vm1101_vm4, %v1014_v37  ;;  %v636_v29 = vmul.f32 %v3990_v16, %v571_v26  ;;  %v3734_v37 = vld [vmem:[%s5353_s2] sm:$0xff] }
 0x123   : > { %792 = vst.msk [vmem:[#allocation2 + $0xa9] sm:$0xff] %vm723_vm1, %v703_v24 }
 0x124   : > { %v672_v36 = vadd.f32 %v3995_v17, %v636_v29 }
 0x125   : > { %1913 = vrot.lane.b32.xlu1 %v2519_v18, %s3785_s29  ;;  %1692 = vrot.lane.b32.xlu0 %v1622_v38, %s3783_s27 }
 0x126   : > { %1021 = vrot.lane.b32.xlu2 %v1622_v38, %s3781_s21  ;;  %v704_v41 = vmax.f32 %v672_v36, 0.0 }
 0x127   : > { %v1012_v46 = vpop.permute.xlu1 %1011  ;;  %v1460_v47 = vpop.permute.xlu0 %1459 }
 0x128   : > { %1105 = vst.msk [vmem:[#allocation3 + $0xc] sm:$0xf] %vm1101_vm4, %v1012_v46  ;;  %v1016_v49 = vpop.permute.xlu2 %1015 }
 0x129   : > { %1330 = vst.msk [vmem:[#allocation3 + $0xc] sm:$0xf] %vm1326_vm5, %v4120_v10  ;;  %v2746_v10 = vld [vmem:[%s5353_s2 + $0x10] sm:$0x3]  ;;  %v574_v42 = vpop.f32.mrf.mxu0 }
 0x12a   : > { %1107 = vst.msk [vmem:[#allocation3 + $0x14] sm:$0xf] %vm1101_vm4, %v1016_v49  ;;  %v2836_v12 = vunpack.c.l.b16 %v2746_v10  ;;  %v637_v45 = vmul.f32 %v3990_v16, %v574_v42  ;;  %v1371_v0 = vld [vmem:[#allocation2 + $0xa8] sm:$0xff] }
 0x12b   : > { %793 = vst.msk [vmem:[#allocation2 + $0xb1] sm:$0xff] %vm723_vm1, %v704_v41  ;;  %v4303_v4 = vpack.c.bf16 %v1371_v0, %v1371_v0 }
 0x12c   : > { %v2839_v19 = vpack.c.b16 %v2836_v12, %v2836_v12  ;;  %v673_v49 = vadd.f32 %v3995_v17, %v637_v45 }
 0x12d   : > { %1467 = vrot.lane.b32.xlu1 %v4114_v8, %s3784_s28  ;;  %1023 = vrot.lane.b32.xlu0 %v4174_v50, %s3781_s21  ;;  %891 = vst.msk [vmem:[#allocation3 + $0x38] sm:$0xf] %vm876_vm3, %v4303_v4 }
 0x12e   : > { %2364 = vrot.lane.b32.xlu2 %v1622_v38, %s3786_s30  ;;  %v2893_v23 = vsel %vm2891_vm12, %v2839_v19, 0  ;;  %v4249_v38 = vpack.c.bf16 %v1144_v28, %v1144_v28  ;;  %v705_v51 = vmax.f32 %v673_v49, 0.0 }
 0x12f   : > { %v1235_v53 = vpop.permute.xlu1 %1234  ;;  %v2357_v54 = vpop.permute.xlu0 %2356  ;;  %2900 = vmatpush.bf16.msra.mxu1 %v2893_v23  ;;  %3737 = vmatpush.bf16.msrb.mxu3 %v2893_v23 }
 0x130   : > { %1329 = vst.msk [vmem:[#allocation3 + $0x8] sm:$0xf] %vm1326_vm5, %v1235_v53  ;;  %v2134_v55 = vpop.permute.xlu2 %2133  ;;  %v1147_v53 = vld [vmem:[#allocation2 + $0x9a] sm:$0xff] }
 0x131   : > { %1554 = vst.msk [vmem:[#allocation3 + $0x8] sm:$0xf] %vm1551_vm6, %v1460_v47  ;;  %v576_v52 = vpop.f32.mrf.mxu0 }
 0x132   : > { %794 = vst.msk [vmem:[#allocation2 + $0xc1] sm:$0xff] %vm723_vm1, %v705_v51  ;;  %v924_v23 = vld [vmem:[#allocation2 + $0xb1] sm:$0xff] }
 0x133   : > { %2901 = vmatpush.bf16.msra.mxu1 %v3735_v25  ;;  %3738 = vmatpush.bf16.msrb.mxu3 %v3735_v25 }
 0x135   : > { %1246 = vrot.lane.b32.xlu1 %v1174_v60, %s3782_s22  ;;  %2366 = vrot.lane.b32.xlu0 %v4174_v50, %s3786_s30 }
 0x136   : > { %1248 = vrot.lane.b32.xlu2 %v1175_v61, %s3782_s22 }
 0x137   : > { %v1683_v1 = vpop.permute.xlu1 %1682  ;;  %v1066_v2 = vpop.permute.xlu0 %1065  ;;  %2902 = vmatpush.bf16.msra.mxu1 %v3734_v37  ;;  %3739 = vmatpush.bf16.msrb.mxu3 %v3734_v37 }
 0x138   : > { %1778 = vst.msk [vmem:[#allocation3 + $0x4] sm:$0xf] %vm1776_vm7, %v1683_v1  ;;  %v2582_v3 = vpop.permute.xlu2 %2581  ;;  %v1372_v1 = vld [vmem:[#allocation2 + $0xb0] sm:$0xff] }
 0x139   : > { %2003 = vst.msk [vmem:[#allocation3 + $0x4] sm:$0xf] %vm2001_vm8, %v4142_v30  ;;  %v1370_v30 = vld [vmem:[#allocation2 + $0x98] sm:$0xff]  ;;  %v579_v62 = vpop.f32.mrf.mxu0  ;;  %v828_v28 = vld [vmem:[#allocation2 + $0xc0] sm:$0xff] }
 0x13a   : > { %1132 = vst.msk [vmem:[#allocation3 + $0x78] sm:$0xf] %vm1101_vm4, %v1066_v2  ;;  %v4251_v39 = vpack.c.bf16 %v1370_v30, %v1370_v30  ;;  %v639_v63 = vmul.f32 %v3990_v16, %v579_v62  ;;  %v922_v30 = vld [vmem:[#allocation2 + $0x99] sm:$0xff]  ;;  %v4347_v36 = vpack.c.bf16 %v828_v28, %v828_v28 }
 0x13b   : > { %2229 = vst.msk [vmem:[#allocation3 + $0x4] sm:$0xf] %vm2227_vm9, %v2134_v55  ;;  %v4350_v37 = vpack.c.bf16 %v922_v30, %v922_v30 }
 0x13c   : > { %890 = vst.msk [vmem:[#allocation3 + $0x34] sm:$0xf] %vm876_vm3, %v4251_v39 }
 0x13d   : > { %2141 = vrot.lane.b32.xlu1 %v4132_v20, %s3787_s11  ;;  %1919 = vrot.lane.b32.xlu0 %v1175_v61, %s3785_s29  ;;  %893 = vst.msk [vmem:[#allocation3 + $0x40] sm:$0xf] %vm876_vm3, %v4347_v36 }
 0x13e   : > { %1469 = vrot.lane.b32.xlu2 %v4132_v20, %s3784_s28 }
 0x13f   : > { %v1289_v7 = vpop.permute.xlu1 %1288  ;;  %v1239_v8 = vpop.permute.xlu0 %1238 }
 0x140   : > { %1356 = vst.msk [vmem:[#allocation3 + $0x74] sm:$0xf] %vm1326_vm5, %v1289_v7  ;;  %v4210_v9 = vpop.permute.xlu2 %1686  ;;  %v675_v7 = vadd.f32 %v3995_v17, %v639_v63 }
 0x141   : > { %1331 = vst.msk [vmem:[#allocation3 + $0x10] sm:$0xf] %vm1326_vm5, %v1239_v8  ;;  %v4309_v8 = vpack.c.bf16 %v1372_v1, %v1372_v1  ;;  %v581_v10 = vpop.f32.mrf.mxu0  ;;  %v4404_v1 = vld [vmem:[%s5355_s4] ss:$0 sm:$0xff] }
 0x142   : > { %v640_v11 = vmul.f32 %v3990_v16, %v581_v10  ;;  %v4413_v10 = vld [vmem:[%s5356_s5] ss:$0 sm:$0xff] }
 0x143   : > { %892 = vst.msk [vmem:[#allocation3 + $0x3c] sm:$0xf] %vm876_vm3, %v4309_v8 }
 0x145   : > { %2589 = vrot.lane.b32.xlu1 %v1174_v60, %s3788_s12  ;;  %1471 = vrot.lane.b32.xlu0 %v4164_v43, %s3784_s28 }
 0x146   : > { %2591 = vrot.lane.b32.xlu2 %v1175_v61, %s3788_s12  ;;  %v4291_v61 = vpack.c.bf16 %v1145_v58, %v1145_v58 }
 0x147   : > { %v2132_v15 = vpop.permute.xlu1 %2131  ;;  %v4221_v18 = vpop.permute.xlu0 %2583 }
 0x148   : > { %2228 = vst.msk [vmem:[#allocation3] sm:$0xf] %vm2227_vm9, %v2132_v15  ;;  %v1291_v20 = vpop.permute.xlu2 %1290 }
 0x149   : > { %2453 = vst.msk [vmem:[#allocation3] sm:$0xf] %vm2452_vm10, %v2357_v54  ;;  %v638_v54 = vmul.f32 %v3990_v16, %v576_v52  ;;  %v584_v21 = vpop.f32.mrf.mxu0 }
 0x14a   : > { %2678 = vst.msk [vmem:[#allocation3] sm:$0xf] %vm2677_vm11, %v2582_v3  ;;  %v641_v24 = vmul.f32 %v3990_v16, %v584_v21 }
 0x14b   : > { %1357 = vst.msk [vmem:[#allocation3 + $0x78] sm:$0xf] %vm1326_vm5, %v1291_v20  ;;  %v674_v59 = vadd.f32 %v3995_v17, %v638_v54 }
 0x14d   : > { %1694 = vrot.lane.b32.xlu1 %v4174_v50, %s3783_s27  ;;  %2368 = vrot.lane.b32.xlu0 %v4226_v22, %s3786_s30  ;;  %v4273_v50 = vpack.c.bf16 %v921_v44, %v921_v44 }
 0x14e   : > { %1917 = vrot.lane.b32.xlu2 %v1174_v60, %s3785_s29  ;;  %v706_v60 = vmax.f32 %v674_v59, 0.0 }
 0x14f   : > { %v1685_v31 = vpop.permute.xlu1 %1684  ;;  %v1910_v32 = vpop.permute.xlu0 %1909 }
 0x150   : > { %1779 = vst.msk [vmem:[#allocation3 + $0x8] sm:$0xf] %vm1776_vm7, %v1685_v31  ;;  %v1464_v35 = vpop.permute.xlu2 %1463  ;;  %v677_v31 = vadd.f32 %v3995_v17, %v641_v24 }
 0x151   : > { %2004 = vst.msk [vmem:[#allocation3 + $0x8] sm:$0xf] %vm2001_vm8, %v1910_v32  ;;  %v4342_v32 = vpack.c.bf16 %v924_v23, %v924_v23  ;;  %v586_v41 = vpop.f32.mrf.mxu0 }
 0x152   : > { %1556 = vst.msk [vmem:[#allocation3 + $0x10] sm:$0xf] %vm1551_vm6, %v1464_v35  ;;  %v709_v35 = vmax.f32 %v677_v31, 0.0  ;;  %v642_v42 = vmul.f32 %v3990_v16, %v586_v41 }
 0x153   : > { %795 = vst.msk [vmem:[#allocation2 + $0xc9] sm:$0xff] %vm723_vm1, %v706_v60 }
 0x154   : > { %798 = vst.msk [vmem:[#allocation2 + $0xf1] sm:$0xff] %vm723_vm1, %v709_v35 }
 0x155   : > { %1025 = vrot.lane.b32.xlu1 %v4226_v22, %s3781_s21  ;;  %1250 = vrot.lane.b32.xlu0 %v4249_v38, %s3782_s22 }
 0x156   : > { %1027 = vrot.lane.b32.xlu2 %v4254_v40, %s3781_s21 }
 0x157   : > { %v1241_v46 = vpop.permute.xlu1 %1240  ;;  %v4268_v47 = vpop.permute.xlu0 %1292 }
 0x158   : > { %1332 = vst.msk [vmem:[#allocation3 + $0x14] sm:$0xf] %vm1326_vm5, %v1241_v46  ;;  %v2136_v48 = vpop.permute.xlu2 %2135  ;;  %v923_v46 = vld [vmem:[#allocation2 + $0xa9] sm:$0xff] }
 0x159   : > { %2230 = vst.msk [vmem:[#allocation3 + $0x8] sm:$0xf] %vm2227_vm9, %v2136_v48  ;;  %v678_v48 = vadd.f32 %v3995_v17, %v642_v42  ;;  %v4368_v49 = vpack.c.bf16 %v923_v46, %v923_v46  ;;  %v589_v51 = vpop.f32.mrf.mxu0 }
 0x15a   : > { %v829_v27 = vld [vmem:[#allocation2 + $0xc8] sm:$0xff] }
 0x15b   : > { %v4344_v33 = vpack.c.bf16 %v829_v27, %v829_v27  ;;  %v1150_v52 = vld [vmem:[#allocation2 + $0xc2] sm:$0xff]  ;;  %v832_v24 = vld [vmem:[#allocation2 + $0xf0] sm:$0xff] }
 0x15c   : > { %v925_v27 = vld [vmem:[#allocation2 + $0xc1] sm:$0xff]  ;;  %v4434_v31 = vpack.c.bf16 %v832_v24, %v832_v24 }
 0x15d   : > { %2143 = vrot.lane.b32.xlu1 %v4164_v43, %s3787_s11  ;;  %1029 = vrot.lane.b32.xlu0 %v4273_v50, %s3781_s21  ;;  %v4287_v43 = vpack.c.bf16 %v1147_v53, %v1147_v53  ;;  %894 = vst.msk [vmem:[#allocation3 + $0x44] sm:$0xf] %vm876_vm3, %v4344_v33  ;;  %v643_v53 = vmul.f32 %v3990_v16, %v589_v51  ;;  %v1151_v51 = vld [vmem:[#allocation2 + $0xca] sm:$0xff] }
 0x15e   : > { %2145 = vrot.lane.b32.xlu2 %v4197_v5, %s3787_s11  ;;  %v4440_v42 = vpack.c.bf16 %v925_v27, %v925_v27  ;;  %897 = vst.msk [vmem:[#allocation3 + $0x50] sm:$0xf] %vm876_vm3, %v4434_v31 }
 0x15f   : > { %v1462_v55 = vpop.permute.xlu1 %1461  ;;  %v1018_v56 = vpop.permute.xlu0 %1017  ;;  %v679_v59 = vadd.f32 %v3995_v17, %v643_v53 }
 0x160   : > { %1555 = vst.msk [vmem:[#allocation3 + $0xc] sm:$0xf] %vm1551_vm6, %v1462_v55  ;;  %v1689_v57 = vpop.permute.xlu2 %1688 }
 0x161   : > { %1780 = vst.msk [vmem:[#allocation3 + $0xc] sm:$0xf] %vm1776_vm7, %v4210_v9  ;;  %v707_v9 = vmax.f32 %v675_v7, 0.0  ;;  %v711_v62 = vmax.f32 %v679_v59, 0.0 }
 0x162   : > { %1781 = vst.msk [vmem:[#allocation3 + $0x10] sm:$0xf] %vm1776_vm7, %v1689_v57 }
 0x163   : > { %1108 = vst.msk [vmem:[#allocation3 + $0x18] sm:$0xf] %vm1101_vm4, %v1018_v56 }
 0x164   : > { %796 = vst.msk [vmem:[#allocation2 + $0xd9] sm:$0xff] %vm723_vm1, %v707_v9  ;;  %v1148_v9 = vld [vmem:[#allocation2 + $0xaa] sm:$0xff] }
 0x165   : > { %1252 = vrot.lane.b32.xlu1 %v4291_v61, %s3782_s22  ;;  %1256 = vrot.lane.b32.xlu0 %v4287_v43, %s3782_s22  ;;  %800 = vst.msk [vmem:[#allocation2 + $0x109] sm:$0xff] %vm723_vm1, %v711_v62 }
 0x166   : > { %2593 = vrot.lane.b32.xlu2 %v4249_v38, %s3788_s12 }
 0x167   : > { %v2359_v2 = vpop.permute.xlu1 %2358  ;;  %v4301_v3 = vpop.permute.xlu0 %1244 }
 0x168   : > { %2454 = vst.msk [vmem:[#allocation3 + $0x4] sm:$0xf] %vm2452_vm10, %v2359_v2  ;;  %v1243_v6 = vpop.permute.xlu2 %1242 }
 0x169   : > { %2679 = vst.msk [vmem:[#allocation3 + $0x4] sm:$0xf] %vm2677_vm11, %v4221_v18  ;;  %v1146_v18 = vld [vmem:[#allocation2 + $0x92] sm:$0xff] }
 0x16a   : > { %1333 = vst.msk [vmem:[#allocation3 + $0x18] sm:$0xf] %vm1326_vm5, %v1243_v6  ;;  %v4328_v20 = vpack.c.bf16 %v1146_v18, %v1146_v18 }
 0x16b   : > { %v830_v54 = vld [vmem:[#allocation2 + $0xd8] sm:$0xff] }
 0x16c   : > { %v4383_v60 = vpack.c.bf16 %v830_v54, %v830_v54  ;;  %v927_v0 = vld [vmem:[#allocation2 + $0xd9] sm:$0xff]  ;;  %v4461_v54 = vpack.c.bf16 %v1151_v51, %v1151_v51  ;;  %v834_v62 = vld [vmem:[#allocation2 + $0x108] sm:$0xff] }
 0x16d   : > { %1473 = vrot.lane.b32.xlu1 %v4197_v5, %s3784_s28  ;;  %1477 = vrot.lane.b32.xlu0 %v4251_v39, %s3784_s28  ;;  %v676_v5 = vadd.f32 %v3995_v17, %v640_v11  ;;  %v591_v17 = vpop.f32.mrf.mxu0 }
 0x16e   : > { %1475 = vrot.lane.b32.xlu2 %v4241_v34, %s3784_s28  ;;  %895 = vst.msk [vmem:[#allocation3 + $0x48] sm:$0xf] %vm876_vm3, %v4383_v60  ;;  %v644_v2 = vmul.f32 %v4404_v1, %v591_v17 }
 0x16f   : > { %v1912_v12 = vpop.permute.xlu1 %1911  ;;  %v1466_v13 = vpop.permute.xlu0 %1465  ;;  %v708_v19 = vmax.f32 %v676_v5, 0.0 }
 0x170   : > { %2005 = vst.msk [vmem:[#allocation3 + $0xc] sm:$0xf] %vm2001_vm8, %v1912_v12  ;;  %v2363_v14 = vpop.permute.xlu2 %2362  ;;  %v3718_v15 = vld [vmem:[#allocation3] sm:$0xff]  ;;  %v680_v11 = vadd.f32 %v4413_v10, %v644_v2  ;;  %v4416_v12 = vpack.c.bf16 %v927_v0, %v927_v0 }
 0x171   : > { %1557 = vst.msk [vmem:[#allocation3 + $0x14] sm:$0xf] %vm1551_vm6, %v1466_v13  ;;  %3665 = vmatmul.msk.bf16.vlgmr.msra.gmra.mxu1 %vm2842_vm13, %v3718_v15 }
 0x172   : > { %797 = vst.msk [vmem:[#allocation2 + $0xe1] sm:$0xff] %vm723_vm1, %v708_v19  ;;  %v712_v13 = vmax.f32 %v680_v11, 0.0 }
 0x174   : > { %801 = vst.msk [vmem:[#allocation2 + $0x111] sm:$0xff] %vm723_vm1, %v712_v13 }
 0x175   : > { %2370 = vrot.lane.b32.xlu1 %v4254_v40, %s3786_s30  ;;  %2595 = vrot.lane.b32.xlu0 %v4291_v61, %s3788_s12  ;;  %v594_v15 = vpop.f32.mrf.mxu0 }
 0x176   : > { %1254 = vrot.lane.b32.xlu2 %v4328_v20, %s3782_s22  ;;  %v645_v18 = vmul.f32 %v4404_v1, %v594_v15 }
 0x177   : > { %v1068_v25 = vpop.permute.xlu1 %1067  ;;  %v2138_v26 = vpop.permute.xlu0 %2137 }
 0x178   : > { %1133 = vst.msk [vmem:[#allocation3 + $0x7c] sm:$0xf] %vm1101_vm4, %v1068_v25  ;;  %v1916_v29 = vpop.permute.xlu2 %1915  ;;  %v681_v28 = vadd.f32 %v4413_v10, %v645_v18 }
 0x179   : > { %1358 = vst.msk [vmem:[#allocation3 + $0x7c] sm:$0xf] %vm1326_vm5, %v4268_v47  ;;  %v831_v57 = vld [vmem:[#allocation2 + $0xe0] sm:$0xff] }
 0x17a   : > { %2231 = vst.msk [vmem:[#allocation3 + $0xc] sm:$0xf] %vm2227_vm9, %v2138_v26  ;;  %v4386_v16 = vpack.c.bf16 %v831_v57, %v831_v57  ;;  %v1153_v5 = vld [vmem:[#allocation2 + $0xe2] sm:$0xff]  ;;  %v713_v35 = vmax.f32 %v681_v28, 0.0 }
 0x17b   : > { %2456 = vst.msk [vmem:[#allocation3 + $0xc] sm:$0xf] %vm2452_vm10, %v2363_v14  ;;  %v4418_v14 = vpack.c.bf16 %v1148_v9, %v1148_v9  ;;  %v4432_v30 = vpack.c.bf16 %v1153_v5, %v1153_v5  ;;  %v928_v18 = vld [vmem:[#allocation2 + $0xe1] sm:$0xff] }
 0x17c   : > { %896 = vst.msk [vmem:[#allocation3 + $0x4c] sm:$0xf] %vm876_vm3, %v4386_v16 }
 0x17d   : > { %1031 = vrot.lane.b32.xlu1 %v4350_v37, %s3781_s21  ;;  %1035 = vrot.lane.b32.xlu0 %v4342_v32, %s3781_s21  ;;  %802 = vst.msk [vmem:[#allocation2 + $0x121] sm:$0xff] %vm723_vm1, %v713_v35 }
 0x17e   : > { %1698 = vrot.lane.b32.xlu2 %v4254_v40, %s3783_s27  ;;  %v710_v40 = vmax.f32 %v678_v48, 0.0 }
 0x17f   : > { %v2361_v44 = vpop.permute.xlu1 %2360  ;;  %v2586_v45 = vpop.permute.xlu0 %2585 }
 0x180   : > { %2455 = vst.msk [vmem:[#allocation3 + $0x8] sm:$0xf] %vm2452_vm10, %v2361_v44  ;;  %v1022_v47 = vpop.permute.xlu2 %1021 }
 0x181   : > { %2680 = vst.msk [vmem:[#allocation3 + $0x8] sm:$0xf] %vm2677_vm11, %v2586_v45  ;;  %v596_v45 = vpop.f32.mrf.mxu0 }
 0x182   : > { %1110 = vst.msk [vmem:[#allocation3 + $0x20] sm:$0xf] %vm1101_vm4, %v1022_v47  ;;  %v646_v46 = vmul.f32 %v4404_v1, %v596_v45 }
 0x183   : > { %799 = vst.msk [vmem:[#allocation2 + $0xf9] sm:$0xff] %vm723_vm1, %v710_v40 }
 0x185   : > { %1696 = vrot.lane.b32.xlu1 %v4226_v22, %s3783_s27  ;;  %1921 = vrot.lane.b32.xlu0 %v4249_v38, %s3785_s29  ;;  %v1149_v22 = vld [vmem:[#allocation2 + $0xb2] sm:$0xff]  ;;  %v4381_v38 = vpack.c.bf16 %v1150_v52, %v1150_v52  ;;  %v682_v52 = vadd.f32 %v4413_v10, %v646_v46  ;;  %v933_v46 = vld [vmem:[#allocation2 + $0x121] sm:$0xff] }
 0x186   : > { %1033 = vrot.lane.b32.xlu2 %v4368_v49, %s3781_s21  ;;  %v4390_v63 = vpack.c.bf16 %v1149_v22, %v1149_v22  ;;  %v835_v22 = vld [vmem:[#allocation2 + $0x110] sm:$0xff] }
 0x187   : > { %v1691_v55 = vpop.permute.xlu0 %1690  ;;  %v1020_v56 = vpop.permute.xlu1 %1019  ;;  %v714_v53 = vmax.f32 %v682_v52, 0.0  ;;  %v4473_v2 = vpack.c.bf16 %v835_v22, %v835_v22 }
 0x188   : > { %1782 = vst.msk [vmem:[#allocation3 + $0x14] sm:$0xf] %vm1776_vm7, %v1691_v55  ;;  %v2365_v58 = vpop.permute.xlu2 %2364 }
 0x189   : > { %2007 = vst.msk [vmem:[#allocation3 + $0x14] sm:$0xf] %vm2001_vm8, %v1916_v29  ;;  %v926_v29 = vld [vmem:[#allocation2 + $0xc9] sm:$0xff]  ;;  %v599_v55 = vpop.f32.mrf.mxu0 }
 0x18a   : > { %1109 = vst.msk [vmem:[#allocation3 + $0x1c] sm:$0xf] %vm1101_vm4, %v1020_v56  ;;  %v833_v25 = vld [vmem:[#allocation2 + $0xf8] sm:$0xff]  ;;  %v4442_v44 = vpack.c.bf16 %v926_v29, %v926_v29  ;;  %v647_v57 = vmul.f32 %v4404_v1, %v599_v55  ;;  %v965_v55 = vpack.c.bf16 %v933_v46, %v933_v46 }
 0x18b   : > { %1334 = vst.msk [vmem:[#allocation3 + $0x1c] sm:$0xf] %vm1326_vm5, %v4301_v3  ;;  %v4437_v41 = vpack.c.bf16 %v833_v25, %v833_v25  ;;  %v930_v56 = vld [vmem:[#allocation2 + $0xf9] sm:$0xff]  ;;  %v929_v29 = vld [vmem:[#allocation2 + $0xf1] sm:$0xff] }
 0x18c   : > { %803 = vst.msk [vmem:[#allocation2 + $0x129] sm:$0xff] %vm723_vm1, %v714_v53  ;;  %v683_v0 = vadd.f32 %v4413_v10, %v647_v57  ;;  %v4518_v45 = vpack.c.bf16 %v929_v29, %v929_v29  ;;  %v1154_v52 = vld [vmem:[#allocation2 + $0xf2] sm:$0xff]  ;;  %v1155_v53 = vld [vmem:[#allocation2 + $0xfa] sm:$0xff] }
 0x18d   : > { %1479 = vrot.lane.b32.xlu1 %v4303_v4, %s3784_s28  ;;  %1262 = vrot.lane.b32.xlu0 %v4381_v38, %s3782_s22  ;;  %898 = vst.msk [vmem:[#allocation3 + $0x54] sm:$0xf] %vm876_vm3, %v4437_v41  ;;  %v4531_v57 = vpack.c.bf16 %v1155_v53, %v1155_v53 }
 0x18e   : > { %1260 = vrot.lane.b32.xlu2 %v4390_v63, %s3782_s22  ;;  %900 = vst.msk [vmem:[#allocation3 + $0x5c] sm:$0xf] %vm876_vm3, %v4473_v2 }
 0x18f   : > { %v2588_v3 = vpop.permute.xlu1 %2587  ;;  %v2140_v6 = vpop.permute.xlu0 %2139 }
 0x190   : > { %2681 = vst.msk [vmem:[#allocation3 + $0xc] sm:$0xf] %vm2677_vm11, %v2588_v3  ;;  %v1249_v7 = vpop.permute.xlu2 %1248  ;;  %v4475_v3 = vpack.c.bf16 %v834_v62, %v834_v62 }
 0x191   : > { %v601_v9 = vpop.f32.mrf.mxu0 }
 0x192   : > { %899 = vst.msk [vmem:[#allocation3 + $0x58] sm:$0xf] %vm876_vm3, %v4475_v3  ;;  %v648_v11 = vmul.f32 %v4404_v1, %v601_v9  ;;  %v1156_v1 = vld [vmem:[#allocation2 + $0x10a] sm:$0xff] }
 0x193   : > { %v1188_v35 = vpack.c.bf16 %v1156_v1, %v1156_v1  ;;  %v1157_v1 = vld [vmem:[#allocation2 + $0x112] sm:$0xff]  ;;  %v1158_v29 = vld [vmem:[#allocation2 + $0x122] sm:$0xff] }
 0x194   : > { %v1190_v46 = vpack.c.bf16 %v1158_v29, %v1158_v29 }
 0x195   : > { %1258 = vrot.lane.b32.xlu1 %v4418_v14, %s3782_s22  ;;  %1041 = vrot.lane.b32.xlu0 %v4416_v12, %s3781_s21 }
 0x196   : > { %1481 = vrot.lane.b32.xlu2 %v4309_v8, %s3784_s28 }
 0x197   : > { %v1914_v19 = vpop.permute.xlu1 %1913  ;;  %v1693_v21 = vpop.permute.xlu0 %1692  ;;  %v3719_v23 = vld [vmem:[#allocation3 + $0x8] sm:$0xff] }
 0x198   : > { %2006 = vst.msk [vmem:[#allocation3 + $0x10] sm:$0xf] %vm2001_vm8, %v1914_v19  ;;  %v1470_v26 = vpop.permute.xlu2 %1469  ;;  %3666 = vmatmul.msk.bf16.gmra.mxu1 %vm2842_vm13, %v3719_v23  ;;  %v684_v19 = vadd.f32 %v4413_v10, %v648_v11  ;;  %v836_v10 = vld [vmem:[#allocation2 + $0x120] sm:$0xff]  ;;  %v932_v11 = vld [vmem:[#allocation2 + $0x111] sm:$0xff] }
 0x199   : > { %2232 = vst.msk [vmem:[#allocation3 + $0x10] sm:$0xf] %vm2227_vm9, %v2140_v6  ;;  %v715_v6 = vmax.f32 %v683_v0, 0.0  ;;  %v4508_v25 = vpack.c.bf16 %v836_v10, %v836_v10  ;;  %v4559_v10 = vpack.c.bf16 %v1157_v1, %v1157_v1 }
 0x19a   : > { %2457 = vst.msk [vmem:[#allocation3 + $0x10] sm:$0xf] %vm2452_vm10, %v2365_v58 }
 0x19b   : > { %1559 = vst.msk [vmem:[#allocation3 + $0x1c] sm:$0xf] %vm1551_vm6, %v1470_v26  ;;  %v837_v26 = vld [vmem:[#allocation2 + $0x128] sm:$0xff] }
 0x19c   : > { %804 = vst.msk [vmem:[#allocation2 + $0x139] sm:$0xff] %vm723_vm1, %v715_v6  ;;  %v4511_v28 = vpack.c.bf16 %v837_v26, %v837_v26 }
 0x19d   : > { %1037 = vrot.lane.b32.xlu1 %v4440_v42, %s3781_s21  ;;  %1268 = vrot.lane.b32.xlu0 %v4432_v30, %s3782_s22  ;;  %901 = vst.msk [vmem:[#allocation3 + $0x60] sm:$0xf] %vm876_vm3, %v4508_v25 }
 0x19e   : > { %1039 = vrot.lane.b32.xlu2 %v4442_v44, %s3781_s21  ;;  %902 = vst.msk [vmem:[#allocation3 + $0x64] sm:$0xf] %vm876_vm3, %v4511_v28 }
 0x19f   : > { %v1468_v47 = vpop.permute.xlu1 %1467  ;;  %v1024_v48 = vpop.permute.xlu0 %1023 }
 0x1a0   : > { %1558 = vst.msk [vmem:[#allocation3 + $0x18] sm:$0xf] %vm1551_vm6, %v1468_v47  ;;  %v2592_v40 = vpop.permute.xlu2 %2591 }
 0x1a1   : > { %1783 = vst.msk [vmem:[#allocation3 + $0x18] sm:$0xf] %vm1776_vm7, %v1693_v21  ;;  %v4499_v21 = vpack.c.bf16 %v928_v18, %v928_v18 }
 0x1a2   : > { %1111 = vst.msk [vmem:[#allocation3 + $0x24] sm:$0xf] %vm1101_vm4, %v1024_v48 }
 0x1a3   : > { %1336 = vst.msk [vmem:[#allocation3 + $0x24] sm:$0xf] %vm1326_vm5, %v1249_v7  ;;  %v838_v62 = vld [vmem:[#allocation2 + $0x138] sm:$0xff] }
 0x1a4   : > { %v4539_v6 = vpack.c.bf16 %v838_v62, %v838_v62 }
 0x1a5   : > { %1264 = vrot.lane.b32.xlu1 %v4461_v54, %s3782_s22  ;;  %2149 = vrot.lane.b32.xlu0 %v4251_v39, %s3787_s11  ;;  %v1152_v39 = vld [vmem:[#allocation2 + $0xda] sm:$0xff] }
 0x1a6   : > { %2147 = vrot.lane.b32.xlu2 %v4241_v34, %s3787_s11  ;;  %v4478_v34 = vpack.c.bf16 %v930_v56, %v930_v56  ;;  %v4484_v7 = vpack.c.bf16 %v1152_v39, %v1152_v39  ;;  %v4529_v56 = vpack.c.bf16 %v1154_v52, %v1154_v52  ;;  %v931_v39 = vld [vmem:[#allocation2 + $0x109] sm:$0xff]  ;;  %903 = vst.msk [vmem:[#allocation3 + $0x68] sm:$0xf] %vm876_vm3, %v4539_v6 }
 0x1a7   : > { %v1247_v58 = vpop.permute.xlu1 %1246  ;;  %v2367_v59 = vpop.permute.xlu0 %2366 }
 0x1a8   : > { %v1918_v17 = vpop.permute.xlu2 %1917  ;;  %1335 = vst.msk [vmem:[#allocation3 + $0x20] sm:$0xf] %vm1326_vm5, %v1247_v58  ;;  %v1159_v58 = vld [vmem:[#allocation2 + $0x12a] sm:$0xff] }
 0x1a9   : > { %2008 = vst.msk [vmem:[#allocation3 + $0x18] sm:$0xf] %vm2001_vm8, %v1918_v17 }
 0x1ad   : > { %1923 = vrot.lane.b32.xlu1 %v4291_v61, %s3785_s29  ;;  %1047 = vrot.lane.b32.xlu0 %v4478_v34, %s3781_s21  ;;  %v716_v61 = vmax.f32 %v684_v19, 0.0 }
 0x1ae   : > { %1266 = vrot.lane.b32.xlu2 %v4484_v7, %s3782_s22 }
 0x1af   : > { %v2142_v13 = vpop.permute.xlu1 %2141  ;;  %v1920_v15 = vpop.permute.xlu0 %1919  ;;  %805 = vst.msk [vmem:[#allocation2 + $0x141] sm:$0xff] %vm723_vm1, %v716_v61 }
 0x1b0   : > { %2233 = vst.msk [vmem:[#allocation3 + $0x14] sm:$0xf] %vm2227_vm9, %v2142_v13  ;;  %v1028_v5 = vpop.permute.xlu2 %1027  ;;  %v1191_v13 = vpack.c.bf16 %v1159_v58, %v1159_v58 }
 0x1b1   : > { %2458 = vst.msk [vmem:[#allocation3 + $0x14] sm:$0xf] %vm2452_vm10, %v2367_v59 }
 0x1b2   : > { %2683 = vst.msk [vmem:[#allocation3 + $0x14] sm:$0xf] %vm2677_vm11, %v2592_v40 }
 0x1b3   : > { %1113 = vst.msk [vmem:[#allocation3 + $0x2c] sm:$0xf] %vm1101_vm4, %v1028_v5  ;;  %v964_v5 = vpack.c.bf16 %v932_v11, %v932_v11 }
 0x1b5   : > { %1043 = vrot.lane.b32.xlu1 %v4499_v21, %s3781_s21  ;;  %2597 = vrot.lane.b32.xlu0 %v4328_v20, %s3788_s12 }
 0x1b6   : > { %2374 = vrot.lane.b32.xlu2 %v4350_v37, %s3786_s30  ;;  %v839_v17 = vld [vmem:[#allocation2 + $0x140] sm:$0xff] }
 0x1b7   : > { %v2590_v23 = vpop.permute.xlu1 %2589  ;;  %v1472_v24 = vpop.permute.xlu0 %1471  ;;  %v4541_v9 = vpack.c.bf16 %v839_v17, %v839_v17  ;;  %v1161_v11 = vld [vmem:[#allocation2 + $0x142] sm:$0xff] }
 0x1b8   : > { %2682 = vst.msk [vmem:[#allocation3 + $0x10] sm:$0xf] %vm2677_vm11, %v2590_v23  ;;  %v2146_v27 = vpop.permute.xlu2 %2145  ;;  %v936_v23 = vld [vmem:[#allocation2 + $0x141] sm:$0xff] }
 0x1b9   : > { %1560 = vst.msk [vmem:[#allocation3 + $0x20] sm:$0xf] %vm1551_vm6, %v1472_v24 }
 0x1ba   : > { %904 = vst.msk [vmem:[#allocation3 + $0x6c] sm:$0xf] %vm876_vm3, %v4541_v9 }
 0x1bd   : > { %2372 = vrot.lane.b32.xlu1 %v4273_v50, %s3786_s30  ;;  %1274 = vrot.lane.b32.xlu0 %v1188_v35, %s3782_s22  ;;  %v4569_v35 = vpack.c.bf16 %v936_v23, %v936_v23 }
 0x1be   : > { %1045 = vrot.lane.b32.xlu2 %v4518_v45, %s3781_s21 }
 0x1bf   : > { %v1695_v47 = vpop.permute.xlu1 %1694  ;;  %v2369_v48 = vpop.permute.xlu0 %2368  ;;  %v3720_v40 = vld [vmem:[#allocation3 + $0x10] sm:$0xff] }
 0x1c0   : > { %1784 = vst.msk [vmem:[#allocation3 + $0x1c] sm:$0xf] %vm1776_vm7, %v1695_v47  ;;  %v2594_v51 = vpop.permute.xlu2 %2593  ;;  %3667 = vmatmul.msk.bf16.gmra.mxu1 %vm2842_vm13, %v3720_v40 }
 0x1c1   : > { %2009 = vst.msk [vmem:[#allocation3 + $0x1c] sm:$0xf] %vm2001_vm8, %v1920_v15  ;;  %v4545_v15 = vpack.c.bf16 %v931_v39, %v931_v39  ;;  %v1160_v39 = vld [vmem:[#allocation2 + $0x13a] sm:$0xff] }
 0x1c2   : > { %2235 = vst.msk [vmem:[#allocation3 + $0x1c] sm:$0xf] %vm2227_vm9, %v2146_v27 }
 0x1c5   : > { %1270 = vrot.lane.b32.xlu1 %v4529_v56, %s3782_s22  ;;  %1053 = vrot.lane.b32.xlu0 %v965_v55, %s3781_s21 }
 0x1c6   : > { %1272 = vrot.lane.b32.xlu2 %v4531_v57, %s3782_s22 }
 0x1c7   : > { %v1026_v59 = vpop.permute.xlu1 %1025  ;;  %v1251_v22 = vpop.permute.xlu0 %1250 }
 0x1c8   : > { %1112 = vst.msk [vmem:[#allocation3 + $0x28] sm:$0xf] %vm1101_vm4, %v1026_v59  ;;  %v1476_v0 = vpop.permute.xlu2 %1475  ;;  %v935_v59 = vld [vmem:[#allocation2 + $0x139] sm:$0xff] }
 0x1c9   : > { %1337 = vst.msk [vmem:[#allocation3 + $0x28] sm:$0xf] %vm1326_vm5, %v1251_v22  ;;  %v4591_v22 = vpack.c.bf16 %v935_v59, %v935_v59 }
 0x1ca   : > { %1562 = vst.msk [vmem:[#allocation3 + $0x28] sm:$0xf] %vm1551_vm6, %v1476_v0 }
 0x1cd   : > { %1049 = vrot.lane.b32.xlu1 %v4545_v15, %s3781_s21  ;;  %1280 = vrot.lane.b32.xlu0 %v1191_v13, %s3782_s22  ;;  %v4609_v13 = vpack.c.bf16 %v1160_v39, %v1160_v39 }
 0x1ce   : > { %1051 = vrot.lane.b32.xlu2 %v964_v5, %s3781_s21  ;;  %v4612_v5 = vpack.c.bf16 %v1161_v11, %v1161_v11 }
 0x1cf   : > { %v2144_v18 = vpop.permute.xlu1 %2143  ;;  %v1030_v19 = vpop.permute.xlu0 %1029 }
 0x1d0   : > { %2234 = vst.msk [vmem:[#allocation3 + $0x18] sm:$0xf] %vm2227_vm9, %v2144_v18  ;;  %v1255_v61 = vpop.permute.xlu2 %1254 }
 0x1d1   : > { %2459 = vst.msk [vmem:[#allocation3 + $0x18] sm:$0xf] %vm2452_vm10, %v2369_v48 }
 0x1d2   : > { %2684 = vst.msk [vmem:[#allocation3 + $0x18] sm:$0xf] %vm2677_vm11, %v2594_v51  ;;  %v934_v51 = vld [vmem:[#allocation2 + $0x129] sm:$0xff] }
 0x1d3   : > { %1114 = vst.msk [vmem:[#allocation3 + $0x30] sm:$0xf] %vm1101_vm4, %v1030_v19  ;;  %v966_v52 = vpack.c.bf16 %v934_v51, %v934_v51  ;;  %v4618_v19 = vld [vmem:[%s5358_s7] ss:$0 sm:$0xff] }
 0x1d4   : > { %1339 = vst.msk [vmem:[#allocation3 + $0x30] sm:$0xf] %vm1326_vm5, %v1255_v61 }
 0x1d5   : > { %1276 = vrot.lane.b32.xlu1 %v4559_v10, %s3782_s22  ;;  %1702 = vrot.lane.b32.xlu0 %v4350_v37, %s3783_s27 }
 0x1d6   : > { %1700 = vrot.lane.b32.xlu2 %v4273_v50, %s3783_s27  ;;  %v3104_v50 = vld [vmem:[%s5354_s3] sm:$0x3] }
 0x1d7   : > { %v1253_v24 = vpop.permute.xlu1 %1252  ;;  %v1257_v26 = vpop.permute.xlu0 %1256  ;;  %v3154_v48 = vsel %vm2891_vm12, %v3104_v50, 0 }
 0x1d8   : > { %1338 = vst.msk [vmem:[#allocation3 + $0x2c] sm:$0xf] %vm1326_vm5, %v1253_v24  ;;  %v1699_v27 = vpop.permute.xlu2 %1698  ;;  %3163 = vmatpush.bf16.msra.mxu2 %v3154_v48  ;;  %3740 = vmatpush.bf16.msra.mxu3 %v3154_v48 }
 0x1dd   : > { %2599 = vrot.lane.b32.xlu1 %v4287_v43, %s3788_s12  ;;  %1059 = vrot.lane.b32.xlu0 %v4569_v35, %s3781_s21 }
 0x1de   : > { %1278 = vrot.lane.b32.xlu2 %v1190_v46, %s3782_s22 }
 0x1df   : > { %v1474_v37 = vpop.permute.xlu1 %1473  ;;  %v1478_v47 = vpop.permute.xlu0 %1477 }
 0x1e0   : > { %1561 = vst.msk [vmem:[#allocation3 + $0x24] sm:$0xf] %vm1551_vm6, %v1474_v37  ;;  %v1034_v40 = vpop.permute.xlu2 %1033 }
 0x1e1   : > { %1786 = vst.msk [vmem:[#allocation3 + $0x24] sm:$0xf] %vm1776_vm7, %v1699_v27 }
 0x1e2   : > { %1563 = vst.msk [vmem:[#allocation3 + $0x2c] sm:$0xf] %vm1551_vm6, %v1478_v47 }
 0x1e3   : > { %1116 = vst.msk [vmem:[#allocation3 + $0x38] sm:$0xf] %vm1101_vm4, %v1034_v40 }
 0x1e5   : > { %1055 = vrot.lane.b32.xlu1 %v966_v52, %s3781_s21  ;;  %2151 = vrot.lane.b32.xlu0 %v4303_v4, %s3787_s11 }
 0x1e6   : > { %1927 = vrot.lane.b32.xlu2 %v4287_v43, %s3785_s29 }
 0x1e7   : > { %v2371_v53 = vpop.permute.xlu1 %2370  ;;  %v2596_v55 = vpop.permute.xlu0 %2595 }
 0x1e8   : > { %2460 = vst.msk [vmem:[#allocation3 + $0x1c] sm:$0xf] %vm2452_vm10, %v2371_v53  ;;  %v1261_v58 = vpop.permute.xlu2 %1260 }
 0x1e9   : > { %2685 = vst.msk [vmem:[#allocation3 + $0x1c] sm:$0xf] %vm2677_vm11, %v2596_v55 }
 0x1ed   : > { %1925 = vrot.lane.b32.xlu1 %v4328_v20, %s3785_s29  ;;  %2378 = vrot.lane.b32.xlu0 %v4342_v32, %s3786_s30  ;;  %v4604_v20 = vld [vmem:[%s5357_s6] ss:$0 sm:$0xff] }
 0x1ee   : > { %1057 = vrot.lane.b32.xlu2 %v4591_v22, %s3781_s21  ;;  %v2904_v17 = vpop.f32.mrf.mxu1 }
 0x1ef   : > { %v1032_v43 = vpop.permute.xlu1 %1031  ;;  %v1036_v4 = vpop.permute.xlu0 %1035  ;;  %v2988_v18 = vmul.f32 %v4604_v20, %v2904_v17 }
 0x1f0   : > { %1115 = vst.msk [vmem:[#allocation3 + $0x34] sm:$0xf] %vm1101_vm4, %v1032_v43  ;;  %v1482_v62 = vpop.permute.xlu2 %1481  ;;  %v3721_v0 = vld [vmem:[#allocation3 + $0x18] sm:$0xff] }
 0x1f1   : > { %1340 = vst.msk [vmem:[#allocation3 + $0x34] sm:$0xf] %vm1326_vm5, %v1257_v26  ;;  %3668 = vmatmul.msk.bf16.gmra.mxu1 %vm2842_vm13, %v3721_v0  ;;  %v3024_v26 = vadd.f32 %v4618_v19, %v2988_v18 }
 0x1f2   : > { %1565 = vst.msk [vmem:[#allocation3 + $0x34] sm:$0xf] %vm1551_vm6, %v1482_v62 }
 0x1f3   : > { %1117 = vst.msk [vmem:[#allocation3 + $0x3c] sm:$0xf] %vm1101_vm4, %v1036_v4  ;;  %v3056_v46 = vmax.f32 %v3024_v26, 0.0  ;;  %v3716_v26 = vld [vmem:[%s3861_s20 + $0x78] sm:$0xff] }
 0x1f4   : > { %1342 = vst.msk [vmem:[#allocation3 + $0x3c] sm:$0xf] %vm1326_vm5, %v1261_v58  ;;  %3592 = vmatmul.msk.bf16.gmra.mxu3 %vm481_vm0, %v3716_v26 }
 0x1f5   : > { %1282 = vrot.lane.b32.xlu1 %v4609_v13, %s3782_s22  ;;  %1704 = vrot.lane.b32.xlu0 %v4368_v49, %s3783_s27 }
 0x1f6   : > { %1284 = vrot.lane.b32.xlu2 %v4612_v5, %s3782_s22  ;;  %v2906_v24 = vpop.f32.mrf.mxu1 }
 0x1f7   : > { %v1697_v61 = vpop.permute.xlu1 %1696  ;;  %v1922_v1 = vpop.permute.xlu0 %1921  ;;  %v2989_v27 = vmul.f32 %v4604_v20, %v2906_v24 }
 0x1f8   : > { %1785 = vst.msk [vmem:[#allocation3 + $0x20] sm:$0xf] %vm1776_vm7, %v1697_v61  ;;  %v1040_v23 = vpop.permute.xlu2 %1039 }
 0x1f9   : > { %2010 = vst.msk [vmem:[#allocation3 + $0x20] sm:$0xf] %vm2001_vm8, %v1922_v1  ;;  %v3025_v29 = vadd.f32 %v4618_v19, %v2989_v27 }
 0x1fa   : > { %1119 = vst.msk [vmem:[#allocation3 + $0x44] sm:$0xf] %vm1101_vm4, %v1040_v23 }
 0x1fb   : > { %v3057_v50 = vmax.f32 %v3025_v29, 0.0 }
 0x1fd   : > { %2153 = vrot.lane.b32.xlu1 %v4309_v8, %s3787_s11  ;;  %1931 = vrot.lane.b32.xlu0 %v4390_v63, %s3785_s29  ;;  %v3088_v48 = vpack.c.bf16 %v3057_v50, %v3056_v46 }
 0x1fe   : > { %2376 = vrot.lane.b32.xlu2 %v4368_v49, %s3786_s30 }
 0x1ff   : > { %v1480_v37 = vpop.permute.xlu1 %1479  ;;  %v1263_v47 = vpop.permute.xlu0 %1262  ;;  %3681 = vmatmul.msk.bf16.vlgmr.msra.gmra.mxu2 %vm723_vm1, %v3088_v48 }
 0x200   : > { %1564 = vst.msk [vmem:[#allocation3 + $0x30] sm:$0xf] %vm1551_vm6, %v1480_v37  ;;  %v2148_v40 = vpop.permute.xlu2 %2147 }
 0x201   : > { %2236 = vst.msk [vmem:[#allocation3 + $0x20] sm:$0xf] %vm2227_vm9, %v2148_v40 }
 0x205   : > { %2601 = vrot.lane.b32.xlu1 %v4418_v14, %s3788_s12  ;;  %2380 = vrot.lane.b32.xlu0 %v4440_v42, %s3786_s30 }
 0x206   : > { %2603 = vrot.lane.b32.xlu2 %v4390_v63, %s3788_s12 }
 0x207   : > { %v1259_v8 = vpop.permute.xlu1 %1258  ;;  %v1042_v49 = vpop.permute.xlu0 %1041 }
 0x208   : > { %1341 = vst.msk [vmem:[#allocation3 + $0x38] sm:$0xf] %vm1326_vm5, %v1259_v8  ;;  %v1267_v51 = vpop.permute.xlu2 %1266 }
 0x209   : > { %1120 = vst.msk [vmem:[#allocation3 + $0x48] sm:$0xf] %vm1101_vm4, %v1042_v49 }
 0x20a   : > { %1345 = vst.msk [vmem:[#allocation3 + $0x48] sm:$0xf] %vm1326_vm5, %v1267_v51 }
 0x20d   : > { %1706 = vrot.lane.b32.xlu1 %v4342_v32, %s3783_s27  ;;  %2607 = vrot.lane.b32.xlu0 %v4461_v54, %s3788_s12 }
 0x20e   : > { %1929 = vrot.lane.b32.xlu2 %v4418_v14, %s3785_s29 }
 0x20f   : > { %v1038_v52 = vpop.permute.xlu1 %1037  ;;  %v1269_v63 = vpop.permute.xlu0 %1268 }
 0x210   : > { %1118 = vst.msk [vmem:[#allocation3 + $0x40] sm:$0xf] %vm1101_vm4, %v1038_v52  ;;  %v2375_v53 = vpop.permute.xlu2 %2374 }
 0x211   : > { %1343 = vst.msk [vmem:[#allocation3 + $0x40] sm:$0xf] %vm1326_vm5, %v1263_v47 }
 0x215   : > { %2155 = vrot.lane.b32.xlu1 %v4347_v36, %s3787_s11  ;;  %1708 = vrot.lane.b32.xlu0 %v4440_v42, %s3783_s27  ;;  %v2909_v32 = vpop.f32.mrf.mxu1 }
 0x216   : > { %2157 = vrot.lane.b32.xlu2 %v4344_v33, %s3787_s11  ;;  %v2990_v59 = vmul.f32 %v4604_v20, %v2909_v32 }
 0x217   : > { %v1265_v55 = vpop.permute.xlu1 %1264  ;;  %v2150_v58 = vpop.permute.xlu0 %2149 }
 0x218   : > { %1344 = vst.msk [vmem:[#allocation3 + $0x44] sm:$0xf] %vm1326_vm5, %v1265_v55  ;;  %v1046_v14 = vpop.permute.xlu2 %1045  ;;  %v3026_v43 = vadd.f32 %v4618_v19, %v2990_v59 }
 0x219   : > { %1122 = vst.msk [vmem:[#allocation3 + $0x50] sm:$0xf] %vm1101_vm4, %v1046_v14 }
 0x21d   : > { %2382 = vrot.lane.b32.xlu1 %v4442_v44, %s3786_s30  ;;  %1935 = vrot.lane.b32.xlu0 %v4461_v54, %s3785_s29  ;;  %v2911_v42 = vpop.f32.mrf.mxu1  ;;  %v3058_v54 = vmax.f32 %v3026_v43, 0.0 }
 0x21e   : > { %2605 = vrot.lane.b32.xlu2 %v4381_v38, %s3788_s12  ;;  %v2991_v4 = vmul.f32 %v4604_v20, %v2911_v42  ;;  %v2284_v42 = vld [vmem:[#allocation2 + $0x151] sm:$0xff] }
 0x21f   : > { %v1924_v62 = vpop.permute.xlu1 %1923  ;;  %v1048_v17 = vpop.permute.xlu0 %1047  ;;  %v4761_v43 = vpack.c.bf16 %v2284_v42, %v2284_v42 }
 0x220   : > { %2011 = vst.msk [vmem:[#allocation3 + $0x24] sm:$0xf] %vm2001_vm8, %v1924_v62  ;;  %v1273_v0 = vpop.permute.xlu2 %1272  ;;  %v3027_v39 = vadd.f32 %v4618_v19, %v2991_v4  ;;  %v2510_v62 = vld [vmem:[#allocation2 + $0x15a] sm:$0xff] }
 0x221   : > { %2237 = vst.msk [vmem:[#allocation3 + $0x24] sm:$0xf] %vm2227_vm9, %v2150_v58 }
 0x222   : > { %2462 = vst.msk [vmem:[#allocation3 + $0x24] sm:$0xf] %vm2452_vm10, %v2375_v53  ;;  %v3059_v11 = vmax.f32 %v3027_v39, 0.0 }
 0x223   : > { %1123 = vst.msk [vmem:[#allocation3 + $0x54] sm:$0xf] %vm1101_vm4, %v1048_v17  ;;  %v4772_v17 = vpack.c.bf16 %v2510_v62, %v2510_v62  ;;  %v2279_v62 = vld [vmem:[#allocation2 + $0x111] sm:$0xff] }
 0x224   : > { %1348 = vst.msk [vmem:[#allocation3 + $0x54] sm:$0xf] %vm1326_vm5, %v1273_v0  ;;  %v3089_v18 = vpack.c.bf16 %v3059_v11, %v3058_v54  ;;  %v2059_v11 = vld [vmem:[#allocation2 + $0x150] sm:$0xff] }
 0x225   : > { %1483 = vrot.lane.b32.xlu1 %v4347_v36, %s3784_s28  ;;  %2384 = vrot.lane.b32.xlu0 %v4416_v12, %s3786_s30 }
 0x226   : > { %1485 = vrot.lane.b32.xlu2 %v4344_v33, %s3784_s28  ;;  %3682 = vmatmul.msk.bf16.gmra.mxu2 %vm723_vm1, %v3089_v18  ;;  %v2060_v18 = vld [vmem:[#allocation2 + $0x158] sm:$0xff] }
 0x227   : > { %v1044_v61 = vpop.permute.xlu1 %1043  ;;  %v2598_v1 = vpop.permute.xlu0 %2597 }
 0x228   : > { %1121 = vst.msk [vmem:[#allocation3 + $0x4c] sm:$0xf] %vm1101_vm4, %v1044_v61  ;;  %v1052_v23 = vpop.permute.xlu2 %1051  ;;  %v4783_v61 = vpack.c.bf16 %v2059_v11, %v2059_v11 }
 0x229   : > { %1346 = vst.msk [vmem:[#allocation3 + $0x4c] sm:$0xf] %vm1326_vm5, %v1269_v63 }
 0x22a   : > { %1125 = vst.msk [vmem:[#allocation3 + $0x5c] sm:$0xf] %vm1101_vm4, %v1052_v23 }
 0x22d   : > { %1710 = vrot.lane.b32.xlu1 %v4442_v44, %s3783_s27  ;;  %2611 = vrot.lane.b32.xlu0 %v4432_v30, %s3788_s12 }
 0x22e   : > { %1933 = vrot.lane.b32.xlu2 %v4381_v38, %s3785_s29 }
 0x22f   : > { %v2373_v33 = vpop.permute.xlu1 %2372  ;;  %v1275_v36 = vpop.permute.xlu0 %1274 }
 0x230   : > { %2461 = vst.msk [vmem:[#allocation3 + $0x20] sm:$0xf] %vm2452_vm10, %v2373_v33  ;;  %v1701_v24 = vpop.permute.xlu2 %1700 }
 0x231   : > { %2686 = vst.msk [vmem:[#allocation3 + $0x20] sm:$0xf] %vm2677_vm11, %v2598_v1 }
 0x232   : > { %1787 = vst.msk [vmem:[#allocation3 + $0x28] sm:$0xf] %vm1776_vm7, %v1701_v24  ;;  %v2285_v24 = vld [vmem:[#allocation2 + $0x159] sm:$0xff] }
 0x235   : > { %2159 = vrot.lane.b32.xlu1 %v4383_v60, %s3787_s11  ;;  %1712 = vrot.lane.b32.xlu0 %v4416_v12, %s3783_s27 }
 0x236   : > { %2161 = vrot.lane.b32.xlu2 %v4386_v16, %s3787_s11 }
 0x237   : > { %v1271_v38 = vpop.permute.xlu1 %1270  ;;  %v1054_v44 = vpop.permute.xlu0 %1053 }
 0x238   : > { %1347 = vst.msk [vmem:[#allocation3 + $0x50] sm:$0xf] %vm1326_vm5, %v1271_v38  ;;  %v1279_v27 = vpop.permute.xlu2 %1278 }
 0x239   : > { %1126 = vst.msk [vmem:[#allocation3 + $0x60] sm:$0xf] %vm1101_vm4, %v1054_v44  ;;  %v2509_v44 = vld [vmem:[#allocation2 + $0x152] sm:$0xff] }
 0x23a   : > { %1351 = vst.msk [vmem:[#allocation3 + $0x60] sm:$0xf] %vm1326_vm5, %v1279_v27 }
 0x23d   : > { %2386 = vrot.lane.b32.xlu1 %v4499_v21, %s3786_s30  ;;  %1939 = vrot.lane.b32.xlu0 %v4432_v30, %s3785_s29  ;;  %v2914_v12 = vpop.f32.mrf.mxu1 }
 0x23e   : > { %2609 = vrot.lane.b32.xlu2 %v4484_v7, %s3788_s12  ;;  %v2992_v37 = vmul.f32 %v4604_v20, %v2914_v12  ;;  %v4798_v12 = vpack.c.bf16 %v2285_v24, %v2285_v24 }
 0x23f   : > { %v1050_v29 = vpop.permute.xlu1 %1049  ;;  %v1281_v46 = vpop.permute.xlu0 %1280 }
 0x240   : > { %1124 = vst.msk [vmem:[#allocation3 + $0x58] sm:$0xf] %vm1101_vm4, %v1050_v29  ;;  %v1928_v50 = vpop.permute.xlu2 %1927  ;;  %v3028_v47 = vadd.f32 %v4618_v19, %v2992_v37 }
 0x241   : > { %1349 = vst.msk [vmem:[#allocation3 + $0x58] sm:$0xf] %vm1326_vm5, %v1275_v36 }
 0x245   : > { %1487 = vrot.lane.b32.xlu1 %v4383_v60, %s3784_s28  ;;  %2388 = vrot.lane.b32.xlu0 %v4518_v45, %s3786_s30  ;;  %v2916_v30 = vpop.f32.mrf.mxu1  ;;  %v3060_v60 = vmax.f32 %v3028_v47, 0.0 }
 0x246   : > { %1489 = vrot.lane.b32.xlu2 %v4386_v16, %s3784_s28  ;;  %v2993_v48 = vmul.f32 %v4604_v20, %v2916_v30 }
 0x247   : > { %v1277_v40 = vpop.permute.xlu1 %1276  ;;  %v1703_v8 = vpop.permute.xlu0 %1702 }
 0x248   : > { %1350 = vst.msk [vmem:[#allocation3 + $0x5c] sm:$0xf] %vm1326_vm5, %v1277_v40  ;;  %v1058_v49 = vpop.permute.xlu2 %1057  ;;  %v3029_v51 = vadd.f32 %v4618_v19, %v2993_v48  ;;  %v361_v40 = vld [vmem:[%s3861_s20] sm:$0xff]  }
 0x249   : > { %1788 = vst.msk [vmem:[#allocation3 + $0x2c] sm:$0xf] %vm1776_vm7, %v1703_v8  ;;  %v4823_v8 = vld [vmem:[%s5360_s9] ss:$0 sm:$0xff] }
 0x24a   : > { %2013 = vst.msk [vmem:[#allocation3 + $0x2c] sm:$0xf] %vm2001_vm8, %v1928_v50  ;;  %v3061_v52 = vmax.f32 %v3029_v51, 0.0 }
 0x24b   : > { %1128 = vst.msk [vmem:[#allocation3 + $0x68] sm:$0xf] %vm1101_vm4, %v1058_v49 }
 0x24c   : > { %v3090_v16 = vpack.c.bf16 %v3061_v52, %v3060_v60  ;;  %v3317_v60 = vunpack.c.l.bf16 %v361_v40 }
 0x24d   : > { %1714 = vrot.lane.b32.xlu1 %v4499_v21, %s3783_s27  ;;  %2615 = vrot.lane.b32.xlu0 %v4531_v57, %s3788_s12 }
 0x24e   : > { %1937 = vrot.lane.b32.xlu2 %v4484_v7, %s3785_s29  ;;  %3683 = vmatmul.msk.bf16.gmra.mxu2 %vm723_vm1, %v3090_v16 }
 0x24f   : > { %v2600_v63 = vpop.permute.xlu1 %2599  ;;  %v1060_v53 = vpop.permute.xlu0 %1059 }
 0x250   : > { %2687 = vst.msk [vmem:[#allocation3 + $0x24] sm:$0xf] %vm2677_vm11, %v2600_v63  ;;  %v1285_v32 = vpop.permute.xlu2 %1284 }
 0x251   : > { %1129 = vst.msk [vmem:[#allocation3 + $0x6c] sm:$0xf] %vm1101_vm4, %v1060_v53 }
 0x252   : > { %1354 = vst.msk [vmem:[#allocation3 + $0x6c] sm:$0xf] %vm1326_vm5, %v1285_v32  ;;  %v1603_v32 = vld [vmem:[#allocation2 + $0xf9] sm:$0xff] }
 0x255   : > { %2163 = vrot.lane.b32.xlu1 %v4434_v31, %s3787_s11  ;;  %1728 = vrot.lane.b32.xlu0 %v4591_v22, %s3783_s27 }
 0x256   : > { %2165 = vrot.lane.b32.xlu2 %v4437_v41, %s3787_s11 }
 0x257   : > { %v1056_v7 = vpop.permute.xlu1 %1055  ;;  %v2152_v21 = vpop.permute.xlu0 %2151  ;;  %v3722_v55 = vld [vmem:[#allocation3 + $0x20] sm:$0xff] }
 0x258   : > { %1127 = vst.msk [vmem:[#allocation3 + $0x64] sm:$0xf] %vm1101_vm4, %v1056_v7  ;;  %v2377_v58 = vpop.permute.xlu2 %2376  ;;  %3669 = vmatmul.msk.bf16.gmra.mxu1 %vm2842_vm13, %v3722_v55  ;;  %v3318_v55 = vunpack.c.h.bf16 %v361_v40 }
 0x259   : > { %1352 = vst.msk [vmem:[#allocation3 + $0x64] sm:$0xf] %vm1326_vm5, %v1281_v46 }
 0x25d   : > { %2390 = vrot.lane.b32.xlu1 %v4478_v34, %s3786_s30  ;;  %1955 = vrot.lane.b32.xlu0 %v4612_v5, %s3785_s29 }
 0x25e   : > { %2613 = vrot.lane.b32.xlu2 %v4529_v56, %s3788_s12 }
 0x25f   : > { %v1926_v22 = vpop.permute.xlu1 %1925  ;;  %v2379_v14 = vpop.permute.xlu0 %2378 }
 0x260   : > { %2012 = vst.msk [vmem:[#allocation3 + $0x28] sm:$0xf] %vm2001_vm8, %v1926_v22  ;;  %v2604_v59 = vpop.permute.xlu2 %2603 }
 0x261   : > { %2238 = vst.msk [vmem:[#allocation3 + $0x28] sm:$0xf] %vm2227_vm9, %v2152_v21 }
 0x262   : > { %2463 = vst.msk [vmem:[#allocation3 + $0x28] sm:$0xf] %vm2452_vm10, %v2377_v58 }
 0x265   : > { %1503 = vrot.lane.b32.xlu1 %v4539_v6, %s3784_s28  ;;  %2404 = vrot.lane.b32.xlu0 %v4761_v43, %s3786_s30 }
 0x266   : > { %1505 = vrot.lane.b32.xlu2 %v4541_v9, %s3784_s28 }
 0x267   : > { %v1283_v34 = vpop.permute.xlu1 %1282  ;;  %v1705_v5 = vpop.permute.xlu0 %1704 }
 0x268   : > { %v1930_v4 = vpop.permute.xlu2 %1929  ;;  %1353 = vst.msk [vmem:[#allocation3 + $0x68] sm:$0xf] %vm1326_vm5, %v1283_v34 }
 0x269   : > { %1789 = vst.msk [vmem:[#allocation3 + $0x30] sm:$0xf] %vm1776_vm7, %v1705_v5 }
 0x26a   : > { %2014 = vst.msk [vmem:[#allocation3 + $0x30] sm:$0xf] %vm2001_vm8, %v1930_v4 }
 0x26d   : > { %1730 = vrot.lane.b32.xlu1 %v4569_v35, %s3783_s27  ;;  %2631 = vrot.lane.b32.xlu0 %v4772_v17, %s3788_s12  ;;  %v4785_v35 = vpack.c.bf16 %v2060_v18, %v2060_v18  ;;  %v2286_v18 = vld [vmem:[#allocation2 + $0x169] sm:$0xff] }
 0x26e   : > { %1953 = vrot.lane.b32.xlu2 %v4609_v13, %s3785_s29  ;;  %v2919_v54 = vpop.f32.mrf.mxu1 }
 0x26f   : > { %v2154_v6 = vpop.permute.xlu1 %2153  ;;  %v1932_v0 = vpop.permute.xlu0 %1931  ;;  %v2994_v1 = vmul.f32 %v4604_v20, %v2919_v54 }
 0x270   : > { %v2158_v39 = vpop.permute.xlu2 %2157  ;;  %2239 = vst.msk [vmem:[#allocation3 + $0x2c] sm:$0xf] %vm2227_vm9, %v2154_v6  ;;  %v2503_v6 = vld [vmem:[#allocation2 + $0x10a] sm:$0xff] }
 0x271   : > { %2464 = vst.msk [vmem:[#allocation3 + $0x2c] sm:$0xf] %vm2452_vm10, %v2379_v14  ;;  %v3030_v26 = vadd.f32 %v4618_v19, %v2994_v1  ;;  %v4879_v1 = vpack.c.bf16 %v2286_v18, %v2286_v18 }
 0x272   : > { %2689 = vst.msk [vmem:[#allocation3 + $0x2c] sm:$0xf] %vm2677_vm11, %v2604_v59 }
 0x273   : > { %v3062_v29 = vmax.f32 %v3030_v26, 0.0 }
 0x275   : > { %2179 = vrot.lane.b32.xlu1 %v4783_v61, %s3787_s11  ;;  %1716 = vrot.lane.b32.xlu0 %v4518_v45, %s3783_s27  ;;  %v4800_v45 = vpack.c.bf16 %v2509_v44, %v2509_v44 }
 0x276   : > { %2181 = vrot.lane.b32.xlu2 %v4785_v35, %s3787_s11  ;;  %v2921_v36 = vpop.f32.mrf.mxu1 }
 0x277   : > { %v2602_v13 = vpop.permute.xlu1 %2601  ;;  %v2381_v23 = vpop.permute.xlu0 %2380  ;;  %v2995_v38 = vmul.f32 %v4604_v20, %v2921_v36  ;;  %v2512_v36 = vld [vmem:[#allocation2 + $0x172] sm:$0xff] }
 0x278   : > { %v2606_v33 = vpop.permute.xlu2 %2605  ;;  %2688 = vst.msk [vmem:[#allocation3 + $0x28] sm:$0xf] %vm2677_vm11, %v2602_v13 }
 0x279   : > { %v3031_v27 = vadd.f32 %v4618_v19, %v2995_v38  ;;  %v4892_v38 = vpack.c.bf16 %v2512_v36, %v2512_v36 }
 0x27b   : > { %v3063_v46 = vmax.f32 %v3031_v27, 0.0 }
 0x27d   : > { %2406 = vrot.lane.b32.xlu1 %v4798_v12, %s3786_s30  ;;  %1943 = vrot.lane.b32.xlu0 %v4531_v57, %s3785_s29  ;;  %v3091_v30 = vpack.c.bf16 %v3063_v46, %v3062_v29  ;;  %v4815_v57 = vld [vmem:[%s5359_s8] ss:$0 sm:$0xff] }
 0x27e   : > { %2629 = vrot.lane.b32.xlu2 %v4800_v45, %s3788_s12 }
 0x27f   : > { %v1707_v50 = vpop.permute.xlu1 %1706  ;;  %v2608_v37 = vpop.permute.xlu0 %2607  ;;  %v3723_v47 = vld [vmem:[#allocation3 + $0x28] sm:$0xff]  ;;  %3684 = vmatmul.msk.bf16.gmra.mxu2 %vm723_vm1, %v3091_v30 }
 0x280   : > { %v1486_v48 = vpop.permute.xlu2 %1485  ;;  %1790 = vst.msk [vmem:[#allocation3 + $0x34] sm:$0xf] %vm1776_vm7, %v1707_v50  ;;  %3670 = vmatmul.msk.bf16.gmra.mxu1 %vm2842_vm13, %v3723_v47  ;;  %v2061_v50 = vld [vmem:[#allocation2 + $0x168] sm:$0xff]  ;;  %v2062_v47 = vld [vmem:[#allocation2 + $0x170] sm:$0xff] }
 0x281   : > { %1567 = vst.msk [vmem:[#allocation3 + $0x3c] sm:$0xf] %vm1551_vm6, %v1486_v48 }
 0x282   : > { %2015 = vst.msk [vmem:[#allocation3 + $0x34] sm:$0xf] %vm2001_vm8, %v1932_v0  ;;  %v3165_v49 = vpop.f32.mrf.mxu2  ;;  %v4865_v0 = vpack.c.bf16 %v2279_v62, %v2279_v62  ;;  %v2280_v62 = vld [vmem:[#allocation2 + $0x121] sm:$0xff] }
 0x283   : > { %2241 = vst.msk [vmem:[#allocation3 + $0x34] sm:$0xf] %vm2227_vm9, %v2158_v39  ;;  %v3249_v51 = vmul.f32 %v4815_v57, %v3165_v49  ;;  %v4906_v49 = vpack.c.bf16 %v2061_v50, %v2061_v50 }
 0x285   : > { %1491 = vrot.lane.b32.xlu1 %v4434_v31, %s3784_s28  ;;  %2392 = vrot.lane.b32.xlu0 %v4545_v15, %s3786_s30  ;;  %v3285_v52 = vadd.f32 %v4823_v8, %v3249_v51  ;;  %v4908_v51 = vpack.c.bf16 %v2062_v47, %v2062_v47 }
 0x286   : > { %1493 = vrot.lane.b32.xlu2 %v4437_v41, %s3784_s28  ;;  %v1635_v41 = vpack.c.bf16 %v1603_v32, %v1603_v32 }
 0x287   : > { %v2156_v16 = vpop.permute.xlu1 %2155  ;;  %v1709_v63 = vpop.permute.xlu0 %1708  ;;  %v3349_v7 = vadd.f32 %v3317_v60, %v3285_v52 }
 0x288   : > { %v1934_v53 = vpop.permute.xlu2 %1933  ;;  %2240 = vst.msk [vmem:[#allocation3 + $0x30] sm:$0xf] %vm2227_vm9, %v2156_v16 }
 0x289   : > { %2465 = vst.msk [vmem:[#allocation3 + $0x30] sm:$0xf] %vm2452_vm10, %v2381_v23  ;;  %v3381_v31 = vmax.f32 %v3349_v7, 0.0  ;;  %v2287_v7 = vld [vmem:[#allocation2 + $0x171] sm:$0xff] }
 0x28a   : > { %2690 = vst.msk [vmem:[#allocation3 + $0x30] sm:$0xf] %vm2677_vm11, %v2606_v33  ;;  %v3167_v15 = vpop.f32.mrf.mxu2  ;;  %v363_v33 = vld [vmem:[%s3861_s20 + $0x8] sm:$0xff]  }
 0x28b   : > { %3413 = vst.msk [vmem:[%s4839_s18] sm:$0xff] %vm481_vm0, %v3381_v31  ;;  %v3250_v21 = vmul.f32 %v4815_v57, %v3167_v15  ;;  %v3319_v26 = vunpack.c.l.bf16 %v363_v33  ;;  %v3320_v40 = vunpack.c.h.bf16 %v363_v33  ;;  %v1830_v31 = vld [vmem:[#allocation2 + $0x112] sm:$0xff]  ;;  %v2506_v33 = vld [vmem:[#allocation2 + $0x12a] sm:$0xff] }
 0x28d   : > { %1718 = vrot.lane.b32.xlu1 %v1635_v41, %s3783_s27  ;;  %2619 = vrot.lane.b32.xlu0 %v4559_v10, %s3788_s12  ;;  %v3286_v58 = vadd.f32 %v4823_v8, %v3250_v21  ;;  %v614_v41 = vpop.f32.mrf.mxu3  ;;  %v2511_v21 = vld [vmem:[#allocation2 + $0x16a] sm:$0xff] }
 0x28e   : > { %1941 = vrot.lane.b32.xlu2 %v4529_v56, %s3785_s29 }
 0x28f   : > { %v2383_v22 = vpop.permute.xlu1 %2382  ;;  %v1936_v14 = vpop.permute.xlu0 %1935  ;;  %v3350_v42 = vadd.f32 %v3318_v55, %v3286_v58  ;;  %v3766_v55 = vld [vmem:[%s5355_s4] ss:$0 sm:$0xff] }
 0x290   : > { %v2162_v59 = vpop.permute.xlu2 %2161  ;;  %2466 = vst.msk [vmem:[#allocation3 + $0x34] sm:$0xf] %vm2452_vm10, %v2383_v22  ;;  %v653_v58 = vmul.f32 %v3766_v55, %v614_v41  ;;  %v4925_v22 = vpack.c.bf16 %v2287_v7, %v2287_v7 }
 0x291   : > { %2691 = vst.msk [vmem:[#allocation3 + $0x34] sm:$0xf] %vm2677_vm11, %v2608_v37  ;;  %v3382_v34 = vmax.f32 %v3350_v42, 0.0  ;;  %v1604_v37 = vld [vmem:[#allocation2 + $0x109] sm:$0xff] }
 0x293   : > { %3414 = vst.msk [vmem:[%s4839_s18 + $0x8] sm:$0xff] %vm481_vm0, %v3382_v34  ;;  %v4930_v34 = vpack.c.bf16 %v2511_v21, %v2511_v21 }
 0x295   : > { %2167 = vrot.lane.b32.xlu1 %v4475_v3, %s3787_s11  ;;  %1732 = vrot.lane.b32.xlu0 %v4761_v43, %s3783_s27  ;;  %v4867_v43 = vpack.c.bf16 %v2503_v6, %v2503_v6  ;;  %v616_v6 = vpop.f32.mrf.mxu3 }
 0x296   : > { %2169 = vrot.lane.b32.xlu2 %v4473_v2, %s3787_s11 }
 0x297   : > { %v1484_v56 = vpop.permute.xlu1 %1483  ;;  %v2385_v10 = vpop.permute.xlu0 %2384 }
 0x298   : > { %v2610_v5 = vpop.permute.xlu2 %2609  ;;  %1566 = vst.msk [vmem:[#allocation3 + $0x38] sm:$0xf] %vm1551_vm6, %v1484_v56  ;;  %v3724_v4 = vld [vmem:[#allocation3 + $0x30] sm:$0xff] }
 0x299   : > { %1791 = vst.msk [vmem:[#allocation3 + $0x38] sm:$0xf] %vm1776_vm7, %v1709_v63  ;;  %3671 = vmatmul.msk.bf16.gmra.mxu1 %vm2842_vm13, %v3724_v4 }
 0x29a   : > { %2016 = vst.msk [vmem:[#allocation3 + $0x38] sm:$0xf] %vm2001_vm8, %v1934_v53 }
 0x29d   : > { %2394 = vrot.lane.b32.xlu1 %v4865_v0, %s3786_s30  ;;  %1959 = vrot.lane.b32.xlu0 %v4772_v17, %s3785_s29 }
 0x29e   : > { %2617 = vrot.lane.b32.xlu2 %v4867_v43, %s3788_s12 }
 0x29f   : > { %v1711_v39 = vpop.permute.xlu1 %1710  ;;  %v2612_v54 = vpop.permute.xlu0 %2611 }
 0x2a0   : > { %v1490_v11 = vpop.permute.xlu2 %1489  ;;  %1792 = vst.msk [vmem:[#allocation3 + $0x3c] sm:$0xf] %vm1776_vm7, %v1711_v39  ;;  %v654_v39 = vmul.f32 %v3766_v55, %v616_v6 }
 0x2a1   : > { %1569 = vst.msk [vmem:[#allocation3 + $0x44] sm:$0xf] %vm1551_vm6, %v1490_v11 }
 0x2a2   : > { %2017 = vst.msk [vmem:[#allocation3 + $0x3c] sm:$0xf] %vm2001_vm8, %v1936_v14  ;;  %v1862_v14 = vpack.c.bf16 %v1830_v31, %v1830_v31 }
 0x2a3   : > { %2243 = vst.msk [vmem:[#allocation3 + $0x3c] sm:$0xf] %vm2227_vm9, %v2162_v59  ;;  %v3767_v59 = vld [vmem:[%s5356_s5] ss:$0 sm:$0xff] }
 0x2a4   : > { %v689_v42 = vadd.f32 %v3767_v59, %v653_v58  ;;  %v690_v11 = vadd.f32 %v3767_v59, %v654_v39 }
 0x2a5   : > { %1507 = vrot.lane.b32.xlu1 %v4783_v61, %s3784_s28  ;;  %2408 = vrot.lane.b32.xlu0 %v4879_v1, %s3786_s30 }
 0x2a6   : > { %1509 = vrot.lane.b32.xlu2 %v4785_v35, %s3784_s28  ;;  %v721_v56 = vmax.f32 %v689_v42, 0.0  ;;  %v722_v18 = vmax.f32 %v690_v11, 0.0 }
 0x2a7   : > { %v2160_v17 = vpop.permute.xlu1 %2159  ;;  %v1713_v13 = vpop.permute.xlu0 %1712 }
 0x2a8   : > { %v1938_v23 = vpop.permute.xlu2 %1937  ;;  %2242 = vst.msk [vmem:[#allocation3 + $0x38] sm:$0xf] %vm2227_vm9, %v2160_v17 }
 0x2a9   : > { %2467 = vst.msk [vmem:[#allocation3 + $0x38] sm:$0xf] %vm2452_vm10, %v2385_v10  ;;  %v3170_v24 = vpop.f32.mrf.mxu2 }
 0x2aa   : > { %2692 = vst.msk [vmem:[#allocation3 + $0x38] sm:$0xf] %vm2677_vm11, %v2610_v5  ;;  %v3251_v61 = vmul.f32 %v4815_v57, %v3170_v24 }
 0x2ab   : > { %810 = vst.msk [vmem:[#allocation2 + $0x181] sm:$0xff] %vm723_vm1, %v721_v56 }
 0x2ac   : > { %v3287_v35 = vadd.f32 %v4823_v8, %v3251_v61  ;;  %811 = vst.msk [vmem:[#allocation2 + $0x189] sm:$0xff] %vm723_vm1, %v722_v18  ;;  %v365_v61 = vld [vmem:[%s3861_s20 + $0x10] sm:$0xff]  }
 0x2ad   : > { %1734 = vrot.lane.b32.xlu1 %v4798_v12, %s3783_s27  ;;  %2635 = vrot.lane.b32.xlu0 %v4892_v38, %s3788_s12 }
 0x2ae   : > { %1957 = vrot.lane.b32.xlu2 %v4800_v45, %s3785_s29  ;;  %v3351_v44 = vadd.f32 %v3319_v26, %v3287_v35  ;;  %v1636_v45 = vpack.c.bf16 %v1604_v37, %v1604_v37 }
 0x2af   : > { %v2387_v27 = vpop.permute.xlu1 %2386  ;;  %v1940_v29 = vpop.permute.xlu0 %1939 }
 0x2b0   : > { %v2166_v46 = vpop.permute.xlu2 %2165  ;;  %2468 = vst.msk [vmem:[#allocation3 + $0x3c] sm:$0xf] %vm2452_vm10, %v2387_v27  ;;  %v3383_v30 = vmax.f32 %v3351_v44, 0.0  ;;  %v3321_v44 = vunpack.c.l.bf16 %v365_v61 }
 0x2b1   : > { %2693 = vst.msk [vmem:[#allocation3 + $0x3c] sm:$0xf] %vm2677_vm11, %v2612_v54  ;;  %v3172_v48 = vpop.f32.mrf.mxu2  ;;  %v4942_v54 = vpack.c.bf16 %v2280_v62, %v2280_v62 }
 0x2b2   : > { %3415 = vst.msk [vmem:[%s4839_s18 + $0x10] sm:$0xff] %vm481_vm0, %v3383_v30  ;;  %v3252_v12 = vmul.f32 %v4815_v57, %v3172_v48  ;;  %v2281_v30 = vld [vmem:[#allocation2 + $0x129] sm:$0xff] }
 0x2b3   : > { %v2514_v42 = vld [vmem:[#allocation2 + $0x18a] sm:$0xff] }
 0x2b4   : > { %v3288_v60 = vadd.f32 %v4823_v8, %v3252_v12  ;;  %v2064_v6 = vld [vmem:[#allocation2 + $0x188] sm:$0xff] }
 0x2b5   : > { %2183 = vrot.lane.b32.xlu1 %v4906_v49, %s3787_s11  ;;  %1720 = vrot.lane.b32.xlu0 %v1636_v45, %s3783_s27  ;;  %v4981_v45 = vpack.c.bf16 %v2281_v30, %v2281_v30  ;;  %v5025_v18 = vpack.c.bf16 %v2064_v6, %v2064_v6 }
 0x2b6   : > { %2185 = vrot.lane.b32.xlu2 %v4908_v51, %s3787_s11  ;;  %v3352_v52 = vadd.f32 %v3320_v40, %v3288_v60  ;;  %v3322_v40 = vunpack.c.h.bf16 %v365_v61 }
 0x2b7   : > { %v1488_v16 = vpop.permute.xlu1 %1487  ;;  %v2389_v63 = vpop.permute.xlu0 %2388 }
 0x2b8   : > { %v2614_v53 = vpop.permute.xlu2 %2613  ;;  %1568 = vst.msk [vmem:[#allocation3 + $0x40] sm:$0xf] %vm1551_vm6, %v1488_v16  ;;  %v3725_v32 = vld [vmem:[#allocation3 + $0x38] sm:$0xff]  ;;  %v3384_v15 = vmax.f32 %v3352_v52, 0.0 }
 0x2b9   : > { %1793 = vst.msk [vmem:[#allocation3 + $0x40] sm:$0xf] %vm1776_vm7, %v1713_v13  ;;  %3672 = vmatmul.msk.bf16.gmra.mxu1 %vm2842_vm13, %v3725_v32 }
 0x2ba   : > { %2018 = vst.msk [vmem:[#allocation3 + $0x40] sm:$0xf] %vm2001_vm8, %v1938_v23 }
 0x2bb   : > { %3416 = vst.msk [vmem:[%s4839_s18 + $0x18] sm:$0xff] %vm481_vm0, %v3384_v15 }
 0x2bd   : > { %2410 = vrot.lane.b32.xlu1 %v4925_v22, %s3786_s30  ;;  %1947 = vrot.lane.b32.xlu0 %v1862_v14, %s3785_s29 }
 0x2be   : > { %2633 = vrot.lane.b32.xlu2 %v4930_v34, %s3788_s12 }
 0x2bf   : > { %v1715_v10 = vpop.permute.xlu1 %1714  ;;  %v2616_v5 = vpop.permute.xlu0 %2615 }
 0x2c0   : > { %v1506_v4 = vpop.permute.xlu2 %1505  ;;  %1794 = vst.msk [vmem:[#allocation3 + $0x44] sm:$0xf] %vm1776_vm7, %v1715_v10 }
 0x2c1   : > { %1577 = vst.msk [vmem:[#allocation3 + $0x64] sm:$0xf] %vm1551_vm6, %v1506_v4  ;;  %v5012_v4 = vpack.c.bf16 %v2514_v42, %v2514_v42 }
 0x2c2   : > { %2019 = vst.msk [vmem:[#allocation3 + $0x44] sm:$0xf] %vm2001_vm8, %v1940_v29 }
 0x2c3   : > { %2245 = vst.msk [vmem:[#allocation3 + $0x44] sm:$0xf] %vm2227_vm9, %v2166_v46 }
 0x2c5   : > { %1495 = vrot.lane.b32.xlu1 %v4475_v3, %s3784_s28  ;;  %2396 = vrot.lane.b32.xlu0 %v4942_v54, %s3786_s30  ;;  %v4954_v3 = vpack.c.bf16 %v2506_v33, %v2506_v33  ;;  %v2513_v33 = vld [vmem:[#allocation2 + $0x182] sm:$0xff] }
 0x2c6   : > { %1497 = vrot.lane.b32.xlu2 %v4473_v2, %s3784_s28 }
 0x2c7   : > { %v2164_v17 = vpop.permute.xlu1 %2163  ;;  %v1729_v13 = vpop.permute.xlu0 %1728 }
 0x2c8   : > { %v1954_v23 = vpop.permute.xlu2 %1953  ;;  %2244 = vst.msk [vmem:[#allocation3 + $0x40] sm:$0xf] %vm2227_vm9, %v2164_v17 }
 0x2c9   : > { %2469 = vst.msk [vmem:[#allocation3 + $0x40] sm:$0xf] %vm2452_vm10, %v2389_v63  ;;  %v2288_v63 = vld [vmem:[#allocation2 + $0x181] sm:$0xff] }
 0x2ca   : > { %2694 = vst.msk [vmem:[#allocation3 + $0x40] sm:$0xf] %vm2677_vm11, %v2614_v53 }
 0x2cd   : > { %1722 = vrot.lane.b32.xlu1 %v4865_v0, %s3783_s27  ;;  %2623 = vrot.lane.b32.xlu0 %v4954_v3, %s3788_s12 }
 0x2ce   : > { %1945 = vrot.lane.b32.xlu2 %v4867_v43, %s3785_s29 }
 0x2cf   : > { %v2391_v2 = vpop.permute.xlu1 %2390  ;;  %v1956_v36 = vpop.permute.xlu0 %1955 }
 0x2d0   : > { %v2182_v24 = vpop.permute.xlu2 %2181  ;;  %2470 = vst.msk [vmem:[#allocation3 + $0x44] sm:$0xf] %vm2452_vm10, %v2391_v2 }
 0x2d1   : > { %2695 = vst.msk [vmem:[#allocation3 + $0x44] sm:$0xf] %vm2677_vm11, %v2616_v5  ;;  %v3175_v26 = vpop.f32.mrf.mxu2 }
 0x2d2   : > { %v3253_v35 = vmul.f32 %v4815_v57, %v3175_v26 }
 0x2d4   : > { %v3289_v0 = vadd.f32 %v4823_v8, %v3253_v35  ;;  %v1381_v35 = vld [vmem:[#allocation2 + $0x120] sm:$0xff] }
 0x2d5   : > { %2171 = vrot.lane.b32.xlu1 %v4508_v25, %s3787_s11  ;;  %1736 = vrot.lane.b32.xlu0 %v4879_v1, %s3783_s27  ;;  %v2924_v43 = vpop.f32.mrf.mxu1  ;;  %v2505_v25 = vld [vmem:[#allocation2 + $0x122] sm:$0xff] }
 0x2d6   : > { %2173 = vrot.lane.b32.xlu2 %v4511_v28, %s3787_s11  ;;  %v3353_v27 = vadd.f32 %v3321_v44, %v3289_v0  ;;  %v2996_v48 = vmul.f32 %v4604_v20, %v2924_v43  ;;  %v4983_v60 = vpack.c.bf16 %v2505_v25, %v2505_v25  ;;  %v2282_v44 = vld [vmem:[#allocation2 + $0x139] sm:$0xff]  ;;  %v1413_v43 = vpack.c.bf16 %v1381_v35, %v1381_v35  ;;  %v2516_v35 = vld [vmem:[#allocation2 + $0x1a2] sm:$0xff] }
 0x2d7   : > { %v1504_v29 = vpop.permute.xlu1 %1503  ;;  %v2405_v46 = vpop.permute.xlu0 %2404  ;;  %v367_v0 = vld [vmem:[%s3861_s20 + $0x18] sm:$0xff]  }
 0x2d8   : > { %v2630_v50 = vpop.permute.xlu2 %2629  ;;  %1576 = vst.msk [vmem:[#allocation3 + $0x60] sm:$0xf] %vm1551_vm6, %v1504_v29  ;;  %v3726_v37 = vld [vmem:[#allocation3 + $0x40] sm:$0xff]  ;;  %v3385_v47 = vmax.f32 %v3353_v27, 0.0  ;;  %v3032_v53 = vadd.f32 %v4618_v19, %v2996_v48  ;;  %v2314_v27 = vpack.c.bf16 %v2282_v44, %v2282_v44 }
 0x2d9   : > { %1801 = vst.msk [vmem:[#allocation3 + $0x60] sm:$0xf] %vm1776_vm7, %v1729_v13  ;;  %3673 = vmatmul.msk.bf16.gmra.mxu1 %vm2842_vm13, %v3726_v37  ;;  %v3177_v1 = vpop.f32.mrf.mxu2 }
 0x2da   : > { %2026 = vst.msk [vmem:[#allocation3 + $0x60] sm:$0xf] %vm2001_vm8, %v1954_v23  ;;  %v3254_v12 = vmul.f32 %v4815_v57, %v3177_v1  ;;  %v3064_v58 = vmax.f32 %v3032_v53, 0.0  ;;  %v2289_v23 = vld [vmem:[#allocation2 + $0x189] sm:$0xff] }
 0x2db   : > { %3417 = vst.msk [vmem:[%s4839_s18 + $0x20] sm:$0xff] %vm481_vm0, %v3385_v47  ;;  %v5037_v2 = vpack.c.bf16 %v2289_v23, %v2289_v23  ;;  %v5102_v23 = vld [vmem:[%s5358_s7] ss:$0 sm:$0xff] }
 0x2dc   : > { %v3290_v52 = vadd.f32 %v4823_v8, %v3254_v12 }
 0x2dd   : > { %2398 = vrot.lane.b32.xlu1 %v4981_v45, %s3786_s30  ;;  %1963 = vrot.lane.b32.xlu0 %v4892_v38, %s3785_s29  ;;  %v2926_v16 = vpop.f32.mrf.mxu1  ;;  %v4997_v38 = vpack.c.bf16 %v2288_v63, %v2288_v63 }
 0x2de   : > { %2621 = vrot.lane.b32.xlu2 %v4983_v60, %s3788_s12  ;;  %v3354_v32 = vadd.f32 %v3322_v40, %v3290_v52  ;;  %v2997_v7 = vmul.f32 %v4604_v20, %v2926_v16  ;;  %v2508_v40 = vld [vmem:[#allocation2 + $0x142] sm:$0xff] }
 0x2df   : > { %v1731_v31 = vpop.permute.xlu1 %1730  ;;  %v2632_v41 = vpop.permute.xlu0 %2631 }
 0x2e0   : > { %v1494_v15 = vpop.permute.xlu2 %1493  ;;  %1802 = vst.msk [vmem:[#allocation3 + $0x64] sm:$0xf] %vm1776_vm7, %v1731_v31  ;;  %v3386_v21 = vmax.f32 %v3354_v32, 0.0  ;;  %v3033_v55 = vadd.f32 %v4618_v19, %v2997_v7  ;;  %v2540_v32 = vpack.c.bf16 %v2508_v40, %v2508_v40  ;;  %v3324_v31 = vunpack.c.h.bf16 %v367_v0 }
 0x2e1   : > { %1571 = vst.msk [vmem:[#allocation3 + $0x4c] sm:$0xf] %vm1551_vm6, %v1494_v15 }
 0x2e2   : > { %2027 = vst.msk [vmem:[#allocation3 + $0x64] sm:$0xf] %vm2001_vm8, %v1956_v36  ;;  %v3065_v14 = vmax.f32 %v3033_v55, 0.0 }
 0x2e3   : > { %3418 = vst.msk [vmem:[%s4839_s18 + $0x28] sm:$0xff] %vm481_vm0, %v3386_v21 }
 0x2e4   : > { %2253 = vst.msk [vmem:[#allocation3 + $0x64] sm:$0xf] %vm2227_vm9, %v2182_v24  ;;  %v3092_v59 = vpack.c.bf16 %v3065_v14, %v3064_v58  ;;  %v2057_v58 = vld [vmem:[#allocation2 + $0x138] sm:$0xff] }
 0x2e5   : > { %1511 = vrot.lane.b32.xlu1 %v4906_v49, %s3784_s28  ;;  %2412 = vrot.lane.b32.xlu0 %v4997_v38, %s3786_s30  ;;  %v2063_v49 = vld [vmem:[#allocation2 + $0x180] sm:$0xff] }
 0x2e6   : > { %1513 = vrot.lane.b32.xlu2 %v4908_v51, %s3784_s28  ;;  %3685 = vmatmul.msk.bf16.gmra.mxu2 %vm723_vm1, %v3092_v59  ;;  %v5023_v11 = vpack.c.bf16 %v2063_v49, %v2063_v49  ;;  %v2089_v59 = vpack.c.bf16 %v2057_v58, %v2057_v58  ;;  %v2283_v49 = vld [vmem:[#allocation2 + $0x141] sm:$0xff] }
 0x2e7   : > { %v2180_v56 = vpop.permute.xlu1 %2179  ;;  %v1717_v10 = vpop.permute.xlu0 %1716 }
 0x2e8   : > { %v1942_v5 = vpop.permute.xlu2 %1941  ;;  %2252 = vst.msk [vmem:[#allocation3 + $0x60] sm:$0xf] %vm2227_vm9, %v2180_v56 }
 0x2e9   : > { %2477 = vst.msk [vmem:[#allocation3 + $0x60] sm:$0xf] %vm2452_vm10, %v2405_v46 }
 0x2ea   : > { %2702 = vst.msk [vmem:[#allocation3 + $0x60] sm:$0xf] %vm2677_vm11, %v2630_v50  ;;  %v3323_v50 = vunpack.c.l.bf16 %v367_v0 }
 0x2ed   : > { %1738 = vrot.lane.b32.xlu1 %v4925_v22, %s3783_s27  ;;  %2639 = vrot.lane.b32.xlu0 %v5012_v4, %s3788_s12 }
 0x2ee   : > { %1961 = vrot.lane.b32.xlu2 %v4930_v34, %s3785_s29 }
 0x2ef   : > { %v2407_v51 = vpop.permute.xlu1 %2406  ;;  %v1944_v62 = vpop.permute.xlu0 %1943 }
 0x2f0   : > { %v2170_v39 = vpop.permute.xlu2 %2169  ;;  %2478 = vst.msk [vmem:[#allocation3 + $0x64] sm:$0xf] %vm2452_vm10, %v2407_v51  ;;  %v2507_v51 = vld [vmem:[#allocation2 + $0x13a] sm:$0xff] }
 0x2f1   : > { %2703 = vst.msk [vmem:[#allocation3 + $0x64] sm:$0xf] %vm2677_vm11, %v2632_v41 }
 0x2f5   : > { %2187 = vrot.lane.b32.xlu1 %v5023_v11, %s3787_s11  ;;  %1724 = vrot.lane.b32.xlu0 %v4942_v54, %s3783_s27  ;;  %v5039_v54 = vpack.c.bf16 %v2513_v33, %v2513_v33 }
 0x2f6   : > { %2189 = vrot.lane.b32.xlu2 %v5025_v18, %s3787_s11 }
 0x2f7   : > { %v1492_v22 = vpop.permute.xlu1 %1491  ;;  %v2393_v34 = vpop.permute.xlu0 %2392 }
 0x2f8   : > { %v2618_v17 = vpop.permute.xlu2 %2617  ;;  %1570 = vst.msk [vmem:[#allocation3 + $0x48] sm:$0xf] %vm1551_vm6, %v1492_v22  ;;  %v3730_v13 = vld [vmem:[#allocation3 + $0x60] sm:$0xff] }
 0x2f9   : > { %1795 = vst.msk [vmem:[#allocation3 + $0x48] sm:$0xf] %vm1776_vm7, %v1717_v10  ;;  %3677 = vmatmul.msk.bf16.vlgmr.msrb.gmra.mxu3 %vm2842_vm13, %v3730_v13 }
 0x2fa   : > { %2020 = vst.msk [vmem:[#allocation3 + $0x48] sm:$0xf] %vm2001_vm8, %v1942_v5 }
 0x2fd   : > { %2414 = vrot.lane.b32.xlu1 %v5037_v2, %s3786_s30  ;;  %1951 = vrot.lane.b32.xlu0 %v4954_v3, %s3785_s29  ;;  %v2929_v36 = vpop.f32.mrf.mxu1 }
 0x2fe   : > { %2637 = vrot.lane.b32.xlu2 %v5039_v54, %s3788_s12  ;;  %v2998_v3 = vmul.f32 %v4604_v20, %v2929_v36 }
 0x2ff   : > { %v1719_v24 = vpop.permute.xlu1 %1718  ;;  %v2620_v61 = vpop.permute.xlu0 %2619 }
 0x300   : > { %v1510_v26 = vpop.permute.xlu2 %1509  ;;  %1796 = vst.msk [vmem:[#allocation3 + $0x4c] sm:$0xf] %vm1776_vm7, %v1719_v24  ;;  %v3034_v30 = vadd.f32 %v4618_v19, %v2998_v3 }
 0x301   : > { %1579 = vst.msk [vmem:[#allocation3 + $0x6c] sm:$0xf] %vm1551_vm6, %v1510_v26 }
 0x302   : > { %2021 = vst.msk [vmem:[#allocation3 + $0x4c] sm:$0xf] %vm2001_vm8, %v1944_v62  ;;  %v3180_v29 = vpop.f32.mrf.mxu2  ;;  %v2315_v62 = vpack.c.bf16 %v2283_v49, %v2283_v49 }
 0x303   : > { %2247 = vst.msk [vmem:[#allocation3 + $0x4c] sm:$0xf] %vm2227_vm9, %v2170_v39  ;;  %v3255_v46 = vmul.f32 %v4815_v57, %v3180_v29  ;;  %v2290_v39 = vld [vmem:[#allocation2 + $0x199] sm:$0xff] }
 0x304   : > { %v2322_v36 = vpack.c.bf16 %v2290_v39, %v2290_v39 }
 0x305   : > { %1499 = vrot.lane.b32.xlu1 %v1413_v43, %s3784_s28  ;;  %2400 = vrot.lane.b32.xlu0 %v2314_v27, %s3786_s30  ;;  %v2931_v37 = vpop.f32.mrf.mxu1  ;;  %v3291_v47 = vadd.f32 %v4823_v8, %v3255_v46  ;;  %v2548_v27 = vpack.c.bf16 %v2516_v35, %v2516_v35  ;;  %v2066_v46 = vld [vmem:[#allocation2 + $0x1a0] sm:$0xff] }
 0x306   : > { %1501 = vrot.lane.b32.xlu2 %v4511_v28, %s3784_s28  ;;  %v2999_v1 = vmul.f32 %v4604_v20, %v2931_v37  ;;  %v3066_v28 = vmax.f32 %v3034_v30, 0.0  ;;  %v2098_v30 = vpack.c.bf16 %v2066_v46, %v2066_v46 }
 0x307   : > { %v2168_v25 = vpop.permute.xlu1 %2167  ;;  %v1733_v48 = vpop.permute.xlu0 %1732  ;;  %v3355_v52 = vadd.f32 %v3323_v50, %v3291_v47  ;;  %v2291_v47 = vld [vmem:[#allocation2 + $0x1a1] sm:$0xff] }
 0x308   : > { %v1958_v12 = vpop.permute.xlu2 %1957  ;;  %2246 = vst.msk [vmem:[#allocation3 + $0x48] sm:$0xf] %vm2227_vm9, %v2168_v25  ;;  %v3035_v16 = vadd.f32 %v4618_v19, %v2999_v1  ;;  %v2515_v1 = vld [vmem:[#allocation2 + $0x19a] sm:$0xff]  ;;  %v2323_v40 = vpack.c.bf16 %v2291_v47, %v2291_v47 }
 0x309   : > { %2471 = vst.msk [vmem:[#allocation3 + $0x48] sm:$0xf] %vm2452_vm10, %v2393_v34  ;;  %v3387_v63 = vmax.f32 %v3355_v52, 0.0  ;;  %v2547_v52 = vpack.c.bf16 %v2515_v1, %v2515_v1 }
 0x30a   : > { %2696 = vst.msk [vmem:[#allocation3 + $0x48] sm:$0xf] %vm2677_vm11, %v2618_v17  ;;  %v3067_v53 = vmax.f32 %v3035_v16, 0.0  ;;  %v3182_v7 = vpop.f32.mrf.mxu2 }
 0x30b   : > { %3419 = vst.msk [vmem:[%s4839_s18 + $0x30] sm:$0xff] %vm481_vm0, %v3387_v63  ;;  %v3256_v20 = vmul.f32 %v4815_v57, %v3182_v7 }
 0x30c   : > { %v3093_v41 = vpack.c.bf16 %v3067_v53, %v3066_v28 }
 0x30d   : > { %1726 = vrot.lane.b32.xlu1 %v4981_v45, %s3783_s27  ;;  %2627 = vrot.lane.b32.xlu0 %v2540_v32, %s3788_s12  ;;  %v3292_v19 = vadd.f32 %v4823_v8, %v3256_v20 }
 0x30e   : > { %1949 = vrot.lane.b32.xlu2 %v4983_v60, %s3785_s29  ;;  %3686 = vmatmul.msk.bf16.gmra.mxu2 %vm723_vm1, %v3093_v41 }
 0x30f   : > { %v2395_v15 = vpop.permute.xlu1 %2394  ;;  %v1960_v21 = vpop.permute.xlu0 %1959  ;;  %v3356_v14 = vadd.f32 %v3324_v31, %v3292_v19 }
 0x310   : > { %v2186_v55 = vpop.permute.xlu2 %2185  ;;  %2472 = vst.msk [vmem:[#allocation3 + $0x4c] sm:$0xf] %vm2452_vm10, %v2395_v15 }
 0x311   : > { %2697 = vst.msk [vmem:[#allocation3 + $0x4c] sm:$0xf] %vm2677_vm11, %v2620_v61  ;;  %v3388_v45 = vmax.f32 %v3356_v14, 0.0 }
 0x313   : > { %3420 = vst.msk [vmem:[%s4839_s18 + $0x38] sm:$0xff] %vm481_vm0, %v3388_v45 }
 0x315   : > { %2175 = vrot.lane.b32.xlu1 %v2089_v59, %s3787_s11  ;;  %1740 = vrot.lane.b32.xlu0 %v4997_v38, %s3783_s27  ;;  %v2539_v38 = vpack.c.bf16 %v2507_v51, %v2507_v51 }
 0x316   : > { %2177 = vrot.lane.b32.xlu2 %v4541_v9, %s3787_s11  ;;  %v2934_v10 = vpop.f32.mrf.mxu1  ;;  %v5091_v9 = vld [vmem:[%s5357_s6] ss:$0 sm:$0xff] }
 0x317   : > { %v1508_v60 = vpop.permute.xlu1 %1507  ;;  %v2409_v42 = vpop.permute.xlu0 %2408  ;;  %v3000_v6 = vmul.f32 %v5091_v9, %v2934_v10 }
 0x318   : > { %v2634_v56 = vpop.permute.xlu2 %2633  ;;  %1578 = vst.msk [vmem:[#allocation3 + $0x68] sm:$0xf] %vm1551_vm6, %v1508_v60  ;;  %v3727_v5 = vld [vmem:[#allocation3 + $0x48] sm:$0xff] }
 0x319   : > { %1803 = vst.msk [vmem:[#allocation3 + $0x68] sm:$0xf] %vm1776_vm7, %v1733_v48  ;;  %3674 = vmatmul.msk.bf16.gmra.mxu1 %vm2842_vm13, %v3727_v5  ;;  %v3036_v33 = vadd.f32 %v5102_v23, %v3000_v6 }
 0x31a   : > { %2028 = vst.msk [vmem:[#allocation3 + $0x68] sm:$0xf] %vm2001_vm8, %v1958_v12 }
 0x31b   : > { %v3068_v61 = vmax.f32 %v3036_v33, 0.0 }
 0x31d   : > { %2402 = vrot.lane.b32.xlu1 %v2315_v62, %s3786_s30  ;;  %1967 = vrot.lane.b32.xlu0 %v5012_v4, %s3785_s29 }
 0x31e   : > { %2625 = vrot.lane.b32.xlu2 %v2539_v38, %s3788_s12  ;;  %v2936_v13 = vpop.f32.mrf.mxu1 }
 0x31f   : > { %v1735_v22 = vpop.permute.xlu1 %1734  ;;  %v2636_v34 = vpop.permute.xlu0 %2635  ;;  %v3001_v4 = vmul.f32 %v5091_v9, %v2936_v13 }
 0x320   : > { %v1498_v17 = vpop.permute.xlu2 %1497  ;;  %1804 = vst.msk [vmem:[#allocation3 + $0x6c] sm:$0xf] %vm1776_vm7, %v1735_v22 }
 0x321   : > { %1573 = vst.msk [vmem:[#allocation3 + $0x54] sm:$0xf] %vm1551_vm6, %v1498_v17  ;;  %v3037_v24 = vadd.f32 %v5102_v23, %v3001_v4 }
 0x322   : > { %2029 = vst.msk [vmem:[#allocation3 + $0x6c] sm:$0xf] %vm2001_vm8, %v1960_v21 }
 0x323   : > { %2255 = vst.msk [vmem:[#allocation3 + $0x6c] sm:$0xf] %vm2227_vm9, %v2186_v55  ;;  %v3069_v26 = vmax.f32 %v3037_v24, 0.0  ;;  %v369_v24 = vld [vmem:[%s3861_s20 + $0x20] sm:$0xff]  }
 0x324   : > { %v3326_v46 = vunpack.c.h.bf16 %v369_v24 }
 0x325   : > { %1515 = vrot.lane.b32.xlu1 %v5023_v11, %s3784_s28  ;;  %2416 = vrot.lane.b32.xlu0 %v2322_v36, %s3786_s30  ;;  %v3094_v3 = vpack.c.bf16 %v3069_v26, %v3068_v61  ;;  %v2065_v11 = vld [vmem:[#allocation2 + $0x198] sm:$0xff] }
 0x326   : > { %1517 = vrot.lane.b32.xlu2 %v5025_v18, %s3784_s28  ;;  %v2097_v37 = vpack.c.bf16 %v2065_v11, %v2065_v11 }
 0x327   : > { %v2184_v44 = vpop.permute.xlu1 %2183  ;;  %v1721_v0 = vpop.permute.xlu0 %1720  ;;  %3687 = vmatmul.msk.bf16.gmra.mxu2 %vm723_vm1, %v3094_v3 }
 0x328   : > { %v1946_v43 = vpop.permute.xlu2 %1945  ;;  %2254 = vst.msk [vmem:[#allocation3 + $0x68] sm:$0xf] %vm2227_vm9, %v2184_v44  ;;  %v3325_v44 = vunpack.c.l.bf16 %v369_v24 }
 0x329   : > { %2479 = vst.msk [vmem:[#allocation3 + $0x68] sm:$0xf] %vm2452_vm10, %v2409_v42 }
 0x32a   : > { %2704 = vst.msk [vmem:[#allocation3 + $0x68] sm:$0xf] %vm2677_vm11, %v2634_v56 }
 0x32d   : > { %1742 = vrot.lane.b32.xlu1 %v5037_v2, %s3783_s27  ;;  %2643 = vrot.lane.b32.xlu0 %v2548_v27, %s3788_s12 }
 0x32e   : > { %1965 = vrot.lane.b32.xlu2 %v5039_v54, %s3785_s29 }
 0x32f   : > { %v2411_v18 = vpop.permute.xlu1 %2410  ;;  %v1948_v29 = vpop.permute.xlu0 %1947 }
 0x330   : > { %v2174_v50 = vpop.permute.xlu2 %2173  ;;  %2480 = vst.msk [vmem:[#allocation3 + $0x6c] sm:$0xf] %vm2452_vm10, %v2411_v18 }
 0x331   : > { %2705 = vst.msk [vmem:[#allocation3 + $0x6c] sm:$0xf] %vm2677_vm11, %v2636_v34 }
 0x335   : > { %2191 = vrot.lane.b32.xlu1 %v2097_v37, %s3787_s11 }
 0x336   : > { %2193 = vrot.lane.b32.xlu2 %v2098_v30, %s3787_s11  ;;  %v2939_v48 = vpop.f32.mrf.mxu1 }
 0x337   : > { %v1496_v2 = vpop.permute.xlu1 %1495  ;;  %v2397_v25 = vpop.permute.xlu0 %2396  ;;  %v3002_v16 = vmul.f32 %v5091_v9, %v2939_v48 }
 0x338   : > { %v2622_v54 = vpop.permute.xlu2 %2621  ;;  %1572 = vst.msk [vmem:[#allocation3 + $0x50] sm:$0xf] %vm1551_vm6, %v1496_v2  ;;  %v3731_v12 = vld [vmem:[#allocation3 + $0x68] sm:$0xff] }
 0x339   : > { %1797 = vst.msk [vmem:[#allocation3 + $0x50] sm:$0xf] %vm1776_vm7, %v1721_v0  ;;  %3678 = vmatmul.msk.bf16.gmra.mxu3 %vm2842_vm13, %v3731_v12  ;;  %v3038_v7 = vadd.f32 %v5102_v23, %v3002_v16 }
 0x33a   : > { %2022 = vst.msk [vmem:[#allocation3 + $0x50] sm:$0xf] %vm2001_vm8, %v1946_v43 }
 0x33b   : > { %v3070_v41 = vmax.f32 %v3038_v7, 0.0 }
 0x33d   : > { %2418 = vrot.lane.b32.xlu1 %v2323_v40, %s3786_s30 }
 0x33e   : > { %2641 = vrot.lane.b32.xlu2 %v2547_v52, %s3788_s12  ;;  %v2941_v32 = vpop.f32.mrf.mxu1 }
 0x33f   : > { %v1723_v28 = vpop.permute.xlu1 %1722  ;;  %v2624_v63 = vpop.permute.xlu0 %2623  ;;  %v3003_v20 = vmul.f32 %v5091_v9, %v2941_v32 }
 0x340   : > { %v1514_v53 = vpop.permute.xlu2 %1513  ;;  %1798 = vst.msk [vmem:[#allocation3 + $0x54] sm:$0xf] %vm1776_vm7, %v1723_v28 }
 0x341   : > { %1581 = vst.msk [vmem:[#allocation3 + $0x74] sm:$0xf] %vm1551_vm6, %v1514_v53  ;;  %v3039_v31 = vadd.f32 %v5102_v23, %v3003_v20 }
 0x342   : > { %2023 = vst.msk [vmem:[#allocation3 + $0x54] sm:$0xf] %vm2001_vm8, %v1948_v29 }
 0x343   : > { %2249 = vst.msk [vmem:[#allocation3 + $0x54] sm:$0xf] %vm2227_vm9, %v2174_v50  ;;  %v3071_v19 = vmax.f32 %v3039_v31, 0.0 }
 0x345   : > { %v3095_v55 = vpack.c.bf16 %v3071_v19, %v3070_v41 }
 0x347   : > { %v2172_v15 = vpop.permute.xlu1 %2171  ;;  %v1737_v21 = vpop.permute.xlu0 %1736  ;;  %3688 = vmatmul.msk.bf16.gmra.mxu2 %vm723_vm1, %v3095_v55 }
 0x348   : > { %v1962_v58 = vpop.permute.xlu2 %1961  ;;  %2248 = vst.msk [vmem:[#allocation3 + $0x50] sm:$0xf] %vm2227_vm9, %v2172_v15  ;;  %v371_v15 = vld [vmem:[%s3861_s20 + $0x28] sm:$0xff]  }
 0x349   : > { %2473 = vst.msk [vmem:[#allocation3 + $0x50] sm:$0xf] %vm2452_vm10, %v2397_v25 }
 0x34a   : > { %2698 = vst.msk [vmem:[#allocation3 + $0x50] sm:$0xf] %vm2677_vm11, %v2622_v54 }
 0x34f   : > { %v2399_v14 = vpop.permute.xlu1 %2398  ;;  %v1964_v45 = vpop.permute.xlu0 %1963 }
 0x350   : > { %v2190_v59 = vpop.permute.xlu2 %2189  ;;  %2474 = vst.msk [vmem:[#allocation3 + $0x54] sm:$0xf] %vm2452_vm10, %v2399_v14  ;;  %v3327_v14 = vunpack.c.l.bf16 %v371_v15 }
 0x351   : > { %2699 = vst.msk [vmem:[#allocation3 + $0x54] sm:$0xf] %vm2677_vm11, %v2624_v63 }
 0x356   : > { %v2944_v10 = vpop.f32.mrf.mxu1 }
 0x357   : > { %v1512_v60 = vpop.permute.xlu1 %1511  ;;  %v2413_v42 = vpop.permute.xlu0 %2412  ;;  %v3004_v49 = vmul.f32 %v5091_v9, %v2944_v10 }
 0x358   : > { %v2638_v56 = vpop.permute.xlu2 %2637  ;;  %1580 = vst.msk [vmem:[#allocation3 + $0x70] sm:$0xf] %vm1551_vm6, %v1512_v60  ;;  %v3728_v5 = vld [vmem:[#allocation3 + $0x50] sm:$0xff] }
 0x359   : > { %1805 = vst.msk [vmem:[#allocation3 + $0x70] sm:$0xf] %vm1776_vm7, %v1737_v21  ;;  %3675 = vmatmul.msk.bf16.gmra.mxu1 %vm2842_vm13, %v3728_v5  ;;  %v3040_v39 = vadd.f32 %v5102_v23, %v3004_v49 }
 0x35a   : > { %2030 = vst.msk [vmem:[#allocation3 + $0x70] sm:$0xf] %vm2001_vm8, %v1962_v58 }
 0x35b   : > { %v3072_v17 = vmax.f32 %v3040_v39, 0.0 }
 0x35e   : > { %v2946_v6 = vpop.f32.mrf.mxu1 }
 0x35f   : > { %v1739_v51 = vpop.permute.xlu1 %1738  ;;  %v2640_v62 = vpop.permute.xlu0 %2639  ;;  %v3005_v22 = vmul.f32 %v5091_v9, %v2946_v6  ;;  %v5213_v6 = vld [vmem:[%s5360_s9] ss:$0 sm:$0xff] }
 0x360   : > { %v1502_v38 = vpop.permute.xlu2 %1501  ;;  %1806 = vst.msk [vmem:[#allocation3 + $0x74] sm:$0xf] %vm1776_vm7, %v1739_v51  ;;  %v3328_v51 = vunpack.c.h.bf16 %v371_v15 }
 0x361   : > { %1575 = vst.msk [vmem:[#allocation3 + $0x5c] sm:$0xf] %vm1551_vm6, %v1502_v38  ;;  %v3041_v34 = vadd.f32 %v5102_v23, %v3005_v22 }
 0x362   : > { %2031 = vst.msk [vmem:[#allocation3 + $0x74] sm:$0xf] %vm2001_vm8, %v1964_v45 }
 0x363   : > { %2257 = vst.msk [vmem:[#allocation3 + $0x74] sm:$0xf] %vm2227_vm9, %v2190_v59  ;;  %v3073_v13 = vmax.f32 %v3041_v34, 0.0 }
 0x365   : > { %v3096_v4 = vpack.c.bf16 %v3073_v13, %v3072_v17 }
 0x367   : > { %v2188_v33 = vpop.permute.xlu1 %2187  ;;  %3689 = vmatmul.msk.bf16.gmra.mxu2 %vm723_vm1, %v3096_v4  ;;  %v1725_v61 = vpop.permute.xlu0 %1724 }
 0x368   : > { %v1950_v36 = vpop.permute.xlu2 %1949  ;;  %2256 = vst.msk [vmem:[#allocation3 + $0x70] sm:$0xf] %vm2227_vm9, %v2188_v33 }
 0x369   : > { %2481 = vst.msk [vmem:[#allocation3 + $0x70] sm:$0xf] %vm2452_vm10, %v2413_v42  ;;  %v3185_v26 = vpop.f32.mrf.mxu2 }
 0x36a   : > { %2706 = vst.msk [vmem:[#allocation3 + $0x70] sm:$0xf] %vm2677_vm11, %v2638_v56  ;;  %v3257_v35 = vmul.f32 %v4815_v57, %v3185_v26 }
 0x36c   : > { %v3293_v0 = vadd.f32 %v4823_v8, %v3257_v35 }
 0x36e   : > { %v3357_v3 = vadd.f32 %v3325_v44, %v3293_v0 }
 0x36f   : > { %v2415_v43 = vpop.permute.xlu1 %2414  ;;  %v1952_v50 = vpop.permute.xlu0 %1951 }
 0x370   : > { %v2178_v27 = vpop.permute.xlu2 %2177  ;;  %2482 = vst.msk [vmem:[#allocation3 + $0x74] sm:$0xf] %vm2452_vm10, %v2415_v43  ;;  %v3389_v11 = vmax.f32 %v3357_v3, 0.0  ;;  %v373_v43 = vld [vmem:[%s3861_s20 + $0x30] sm:$0xff]  }
 0x371   : > { %2707 = vst.msk [vmem:[#allocation3 + $0x74] sm:$0xf] %vm2677_vm11, %v2640_v62  ;;  %v3187_v18 = vpop.f32.mrf.mxu2 }
 0x372   : > { %3421 = vst.msk [vmem:[%s4839_s18 + $0x40] sm:$0xff] %vm481_vm0, %v3389_v11  ;;  %v3258_v29 = vmul.f32 %v4815_v57, %v3187_v18  ;;  %v3329_v18 = vunpack.c.l.bf16 %v373_v43 }
 0x374   : > { %v3294_v37 = vadd.f32 %v4823_v8, %v3258_v29 }
 0x376   : > { %v3358_v30 = vadd.f32 %v3326_v46, %v3294_v37 }
 0x377   : > { %v1500_v47 = vpop.permute.xlu1 %1499  ;;  %v2401_v48 = vpop.permute.xlu0 %2400 }
 0x378   : > { %v2626_v2 = vpop.permute.xlu2 %2625  ;;  %1574 = vst.msk [vmem:[#allocation3 + $0x58] sm:$0xf] %vm1551_vm6, %v1500_v47  ;;  %v3732_v25 = vld [vmem:[#allocation3 + $0x70] sm:$0xff]  ;;  %v3390_v1 = vmax.f32 %v3358_v30, 0.0 }
 0x379   : > { %1799 = vst.msk [vmem:[#allocation3 + $0x58] sm:$0xf] %vm1776_vm7, %v1725_v61  ;;  %3679 = vmatmul.msk.bf16.gmra.mxu3 %vm2842_vm13, %v3732_v25  ;;  %v3330_v25 = vunpack.c.h.bf16 %v373_v43 }
 0x37a   : > { %2024 = vst.msk [vmem:[#allocation3 + $0x58] sm:$0xf] %vm2001_vm8, %v1950_v36 }
 0x37b   : > { %3422 = vst.msk [vmem:[%s4839_s18 + $0x48] sm:$0xff] %vm481_vm0, %v3390_v1 }
 0x37c   : > { %v2964_v54 = vpop.f32.mrf.mxu3 }
 0x37d   : > { %v3012_v52 = vmul.f32 %v5091_v9, %v2964_v54 }
 0x37f   : > { %v1727_v12 = vpop.permute.xlu1 %1726  ;;  %v3048_v28 = vadd.f32 %v5102_v23, %v3012_v52  ;;  %v2628_v32 = vpop.permute.xlu0 %2627 }
 0x380   : > { %v1518_v40 = vpop.permute.xlu2 %1517  ;;  %1800 = vst.msk [vmem:[#allocation3 + $0x5c] sm:$0xf] %vm1776_vm7, %v1727_v12 }
 0x381   : > { %1583 = vst.msk [vmem:[#allocation3 + $0x7c] sm:$0xf] %vm1551_vm6, %v1518_v40  ;;  %v3080_v20 = vmax.f32 %v3048_v28, 0.0 }
 0x382   : > { %2025 = vst.msk [vmem:[#allocation3 + $0x5c] sm:$0xf] %vm2001_vm8, %v1952_v50 }
 0x383   : > { %2251 = vst.msk [vmem:[#allocation3 + $0x5c] sm:$0xf] %vm2227_vm9, %v2178_v27 }
 0x384   : > { %v2966_v16 = vpop.f32.mrf.mxu3 }
 0x385   : > { %v3013_v63 = vmul.f32 %v5091_v9, %v2966_v16 }
 0x387   : > { %v2176_v53 = vpop.permute.xlu1 %2175  ;;  %v3049_v7 = vadd.f32 %v5102_v23, %v3013_v63  ;;  %v1741_v21 = vpop.permute.xlu0 %1740 }
 0x388   : > { %2250 = vst.msk [vmem:[#allocation3 + $0x58] sm:$0xf] %vm2227_vm9, %v2176_v53  ;;  %v1966_v45 = vpop.permute.xlu2 %1965 }
 0x389   : > { %2475 = vst.msk [vmem:[#allocation3 + $0x58] sm:$0xf] %vm2452_vm10, %v2401_v48  ;;  %v3081_v31 = vmax.f32 %v3049_v7, 0.0 }
 0x38a   : > { %2700 = vst.msk [vmem:[#allocation3 + $0x58] sm:$0xf] %vm2677_vm11, %v2626_v2 }
 0x38b   : > { %v5190_v41 = vpack.c.bf16 %v3081_v31, %v3080_v20  ;;  %v375_v20 = vld [vmem:[%s3861_s20 + $0x38] sm:$0xff]  }
 0x38f   : > { %v2403_v19 = vpop.permute.xlu1 %2402  ;;  %v1968_v62 = vpop.permute.xlu0 %1967 }
 0x390   : > { %2476 = vst.msk [vmem:[#allocation3 + $0x5c] sm:$0xf] %vm2452_vm10, %v2403_v19  ;;  %v2194_v22 = vpop.permute.xlu2 %2193 }
 0x391   : > { %2701 = vst.msk [vmem:[#allocation3 + $0x5c] sm:$0xf] %vm2677_vm11, %v2628_v32  ;;  %v3190_v55 = vpop.f32.mrf.mxu2 }
 0x392   : > { %v3259_v58 = vmul.f32 %v4815_v57, %v3190_v55  ;;  %v5206_v57 = vld [vmem:[%s5359_s8] ss:$0 sm:$0xff] }
 0x394   : > { %v3295_v59 = vadd.f32 %v4823_v8, %v3259_v58 }
 0x396   : > { %v3359_v60 = vadd.f32 %v3327_v14, %v3295_v59  ;;  %v2949_v56 = vpop.f32.mrf.mxu1 }
 0x397   : > { %v1516_v42 = vpop.permute.xlu1 %1515  ;;  %v3006_v38 = vmul.f32 %v5091_v9, %v2949_v56  ;;  %v2417_v35 = vpop.permute.xlu0 %2416 }
 0x398   : > { %1582 = vst.msk [vmem:[#allocation3 + $0x78] sm:$0xf] %vm1551_vm6, %v1516_v42  ;;  %v3729_v10 = vld [vmem:[#allocation3 + $0x58] sm:$0xff]  ;;  %v3391_v5 = vmax.f32 %v3359_v60, 0.0  ;;  %v2642_v3 = vpop.permute.xlu2 %2641  ;;  %v3332_v60 = vunpack.c.h.bf16 %v375_v20 }
 0x399   : > { %1807 = vst.msk [vmem:[#allocation3 + $0x78] sm:$0xf] %vm1776_vm7, %v1741_v21  ;;  %3676 = vmatmul.msk.bf16.gmra.mxu1 %vm2842_vm13, %v3729_v10  ;;  %v3192_v49 = vpop.f32.mrf.mxu2  ;;  %v3042_v33 = vadd.f32 %v5102_v23, %v3006_v38  ;;  %v3331_v21 = vunpack.c.l.bf16 %v375_v20 }
 0x39a   : > { %2032 = vst.msk [vmem:[#allocation3 + $0x78] sm:$0xf] %vm2001_vm8, %v1966_v45  ;;  %v3260_v8 = vmul.f32 %v5206_v57, %v3192_v49 }
 0x39b   : > { %3423 = vst.msk [vmem:[%s4839_s18 + $0x50] sm:$0xff] %vm481_vm0, %v3391_v5  ;;  %v3074_v61 = vmax.f32 %v3042_v33, 0.0 }
 0x39c   : > { %v3296_v39 = vadd.f32 %v5213_v6, %v3260_v8 }
 0x39e   : > { %v3360_v34 = vadd.f32 %v3328_v51, %v3296_v39  ;;  %v2951_v13 = vpop.f32.mrf.mxu1 }
 0x39f   : > { %v1743_v17 = vpop.permute.xlu1 %1742  ;;  %v3007_v4 = vmul.f32 %v5091_v9, %v2951_v13  ;;  %v2644_v29 = vpop.permute.xlu0 %2643 }
 0x3a0   : > { %1808 = vst.msk [vmem:[#allocation3 + $0x7c] sm:$0xf] %vm1776_vm7, %v1743_v17  ;;  %v3392_v36 = vmax.f32 %v3360_v34, 0.0  ;;  %v377_v17 = vld [vmem:[%s3861_s20 + $0x40] sm:$0xff]  }
 0x3a1   : > { %2033 = vst.msk [vmem:[#allocation3 + $0x7c] sm:$0xf] %vm2001_vm8, %v1968_v62  ;;  %v3043_v24 = vadd.f32 %v5102_v23, %v3007_v4  ;;  %v3333_v4 = vunpack.c.l.bf16 %v377_v17 }
 0x3a2   : > { %2259 = vst.msk [vmem:[#allocation3 + $0x7c] sm:$0xf] %vm2227_vm9, %v2194_v22 }
 0x3a3   : > { %3424 = vst.msk [vmem:[%s4839_s18 + $0x58] sm:$0xff] %vm481_vm0, %v3392_v36  ;;  %v3075_v26 = vmax.f32 %v3043_v24, 0.0 }
 0x3a5   : > { %v3097_v44 = vpack.c.bf16 %v3075_v26, %v3074_v61 }
 0x3a7   : > { %v2192_v0 = vpop.permute.xlu1 %2191  ;;  %3690 = vmatmul.msk.bf16.gmra.mxu2 %vm723_vm1, %v3097_v44  ;;  %v3334_v44 = vunpack.c.h.bf16 %v377_v17 }
 0x3a8   : > { %2258 = vst.msk [vmem:[#allocation3 + $0x78] sm:$0xf] %vm2227_vm9, %v2192_v0 }
 0x3a9   : > { %2483 = vst.msk [vmem:[#allocation3 + $0x78] sm:$0xf] %vm2452_vm10, %v2417_v35 }
 0x3aa   : > { %2708 = vst.msk [vmem:[#allocation3 + $0x78] sm:$0xf] %vm2677_vm11, %v2642_v3  ;;  %v3195_v27 = vpop.f32.mrf.mxu2 }
 0x3ab   : > { %v3261_v11 = vmul.f32 %v5206_v57, %v3195_v27 }
 0x3ad   : > { %v3297_v46 = vadd.f32 %v5213_v6, %v3261_v11 }
 0x3af   : > { %v2419_v50 = vpop.permute.xlu1 %2418  ;;  %v3361_v37 = vadd.f32 %v3329_v18, %v3297_v46 }
 0x3b0   : > { %2484 = vst.msk [vmem:[#allocation3 + $0x7c] sm:$0xf] %vm2452_vm10, %v2419_v50 }
 0x3b1   : > { %2709 = vst.msk [vmem:[#allocation3 + $0x7c] sm:$0xf] %vm2677_vm11, %v2644_v29  ;;  %v3393_v30 = vmax.f32 %v3361_v37, 0.0 }
 0x3b2   : > { %v3197_v47 = vpop.f32.mrf.mxu2 }
 0x3b3   : > { %3425 = vst.msk [vmem:[%s4839_s18 + $0x60] sm:$0xff] %vm481_vm0, %v3393_v30  ;;  %v3262_v2 = vmul.f32 %v5206_v57, %v3197_v47 }
 0x3b5   : > { %v3298_v1 = vadd.f32 %v5213_v6, %v3262_v2 }
 0x3b7   : > { %v3362_v48 = vadd.f32 %v3330_v25, %v3298_v1 }
 0x3b8   : > { %v3733_v54 = vld [vmem:[#allocation3 + $0x78] sm:$0xff] }
 0x3b9   : > { %3680 = vmatmul.msk.bf16.gmra.mxu3 %vm2842_vm13, %v3733_v54  ;;  %v3394_v12 = vmax.f32 %v3362_v48, 0.0 }
 0x3bb   : > { %3426 = vst.msk [vmem:[%s4839_s18 + $0x68] sm:$0xff] %vm481_vm0, %v3394_v12 }
 0x3bc   : > { %v2969_v40 = vpop.f32.mrf.mxu3 }
 0x3bd   : > { %v3014_v52 = vmul.f32 %v5091_v9, %v2969_v40 }
 0x3bf   : > { %v3050_v28 = vadd.f32 %v5102_v23, %v3014_v52 }
 0x3c1   : > { %v3082_v32 = vmax.f32 %v3050_v28, 0.0  ;;  %v379_v28 = vld [vmem:[%s3861_s20 + $0x48] sm:$0xff]  }
 0x3c4   : > { %v2971_v16 = vpop.f32.mrf.mxu3 }
 0x3c5   : > { %v3015_v63 = vmul.f32 %v5091_v9, %v2971_v16 }
 0x3c7   : > { %v3051_v53 = vadd.f32 %v5102_v23, %v3015_v63 }
 0x3c9   : > { %v3083_v7 = vmax.f32 %v3051_v53, 0.0 }
 0x3ca   : > { %v3200_v19 = vpop.f32.mrf.mxu2 }
 0x3cb   : > { %v3101_v31 = vpack.c.bf16 %v3083_v7, %v3082_v32  ;;  %v3263_v15 = vmul.f32 %v5206_v57, %v3200_v19  ;;  %v3335_v32 = vunpack.c.l.bf16 %v379_v28 }
 0x3cd   : > { %3694 = vmatmul.msk.bf16.vlgmr.msra.gmra.mxu3 %vm723_vm1, %v3101_v31  ;;  %v3299_v55 = vadd.f32 %v5213_v6, %v3263_v15 }
 0x3cf   : > { %v3363_v58 = vadd.f32 %v3331_v21, %v3299_v55  ;;  %v3336_v21 = vunpack.c.h.bf16 %v379_v28 }
 0x3d1   : > { %v3395_v14 = vmax.f32 %v3363_v58, 0.0 }
 0x3d2   : > { %v3202_v45 = vpop.f32.mrf.mxu2 }
 0x3d3   : > { %3427 = vst.msk [vmem:[%s4839_s18 + $0x70] sm:$0xff] %vm481_vm0, %v3395_v14  ;;  %v3264_v59 = vmul.f32 %v5206_v57, %v3202_v45 }
 0x3d5   : > { %v3300_v42 = vadd.f32 %v5213_v6, %v3264_v59 }
 0x3d6   : > { %v2954_v56 = vpop.f32.mrf.mxu1 }
 0x3d7   : > { %v3364_v10 = vadd.f32 %v3332_v60, %v3300_v42  ;;  %v3008_v49 = vmul.f32 %v5091_v9, %v2954_v56 }
 0x3d9   : > { %v3396_v5 = vmax.f32 %v3364_v10, 0.0  ;;  %v3044_v51 = vadd.f32 %v5102_v23, %v3008_v49 }
 0x3db   : > { %3428 = vst.msk [vmem:[%s4839_s18 + $0x78] sm:$0xff] %vm481_vm0, %v3396_v5  ;;  %v3076_v39 = vmax.f32 %v3044_v51, 0.0 }
 0x3de   : > { %v2956_v8 = vpop.f32.mrf.mxu1 }
 0x3df   : > { %v3009_v62 = vmul.f32 %v5091_v9, %v2956_v8 }
 0x3e1   : > { %v3045_v38 = vadd.f32 %v5102_v23, %v3009_v62 }
 0x3e3   : > { %v3077_v22 = vmax.f32 %v3045_v38, 0.0 }
 0x3e5   : > { %v3098_v34 = vpack.c.bf16 %v3077_v22, %v3076_v39 }
 0x3e7   : > { %3691 = vmatmul.msk.bf16.gmra.mxu2 %vm723_vm1, %v3098_v34 }
 0x3ea   : > { %v3205_v13 = vpop.f32.mrf.mxu2 }
 0x3eb   : > { %v3265_v33 = vmul.f32 %v5206_v57, %v3205_v13 }
 0x3ed   : > { %v3301_v36 = vadd.f32 %v5213_v6, %v3265_v33 }
 0x3ef   : > { %v3365_v24 = vadd.f32 %v3333_v4, %v3301_v36  ;;  %v381_v36 = vld [vmem:[%s3861_s20 + $0x50] sm:$0xff]  }
 0x3f1   : > { %v3397_v61 = vmax.f32 %v3365_v24, 0.0 }
 0x3f2   : > { %v3207_v26 = vpop.f32.mrf.mxu2 }
 0x3f3   : > { %3429 = vst.msk [vmem:[%s4839_s18 + $0x80] sm:$0xff] %vm481_vm0, %v3397_v61  ;;  %v3266_v35 = vmul.f32 %v5206_v57, %v3207_v26  ;;  %v3337_v26 = vunpack.c.l.bf16 %v381_v36 }
 0x3f5   : > { %v3302_v0 = vadd.f32 %v5213_v6, %v3266_v35 }
 0x3f7   : > { %v3366_v3 = vadd.f32 %v3334_v44, %v3302_v0 }
 0x3f9   : > { %v3398_v43 = vmax.f32 %v3366_v3, 0.0 }
 0x3fb   : > { %3430 = vst.msk [vmem:[%s4839_s18 + $0x88] sm:$0xff] %vm481_vm0, %v3398_v43 }
 0x3fc   : > { %v2974_v27 = vpop.f32.mrf.mxu3 }
 0x3fd   : > { %v3016_v11 = vmul.f32 %v5091_v9, %v2974_v27  ;;  %v3338_v27 = vunpack.c.h.bf16 %v381_v36 }
 0x3ff   : > { %v3052_v29 = vadd.f32 %v5102_v23, %v3016_v11 }
 0x401   : > { %v3084_v37 = vmax.f32 %v3052_v29, 0.0 }
 0x404   : > { %v2976_v18 = vpop.f32.mrf.mxu3 }
 0x405   : > { %v3017_v46 = vmul.f32 %v5091_v9, %v2976_v18 }
 0x407   : > { %v3053_v50 = vadd.f32 %v5102_v23, %v3017_v46  ;;  %v389_v46 = vld [vmem:[%s3861_s20 + $0x70] sm:$0xff]  }
 0x409   : > { %v3085_v30 = vmax.f32 %v3053_v50, 0.0 }
 0x40b   : > { %v3102_v47 = vpack.c.bf16 %v3085_v30, %v3084_v37  ;;  %v3345_v30 = vunpack.c.l.bf16 %v389_v46 }
 0x40d   : > { %3695 = vmatmul.msk.bf16.gmra.mxu3 %vm723_vm1, %v3102_v47 }
 0x416   : > { %v2959_v2 = vpop.f32.mrf.mxu1 }
 0x417   : > { %v3010_v25 = vmul.f32 %v5091_v9, %v2959_v2 }
 0x419   : > { %v3046_v54 = vadd.f32 %v5102_v23, %v3010_v25 }
 0x41b   : > { %v3078_v40 = vmax.f32 %v3046_v54, 0.0 }
 0x41e   : > { %v2961_v1 = vpop.f32.mrf.mxu1 }
 0x41f   : > { %v3011_v48 = vmul.f32 %v5091_v9, %v2961_v1 }
 0x421   : > { %v3047_v12 = vadd.f32 %v5102_v23, %v3011_v48  ;;  %v3346_v48 = vunpack.c.h.bf16 %v389_v46 }
 0x423   : > { %v3079_v52 = vmax.f32 %v3047_v12, 0.0 }
 0x425   : > { %v3099_v16 = vpack.c.bf16 %v3079_v52, %v3078_v40 }
 0x427   : > { %3692 = vmatmul.msk.bf16.gmra.mxu2 %vm723_vm1, %v3099_v16  ;;  %v383_v16 = vld [vmem:[%s3861_s20 + $0x58] sm:$0xff]  }
 0x42a   : > { %v3210_v63 = vpop.f32.mrf.mxu2 }
 0x42b   : > { %v3267_v53 = vmul.f32 %v5206_v57, %v3210_v63 }
 0x42d   : > { %v3303_v7 = vadd.f32 %v5213_v6, %v3267_v53  ;;  %v3339_v53 = vunpack.c.l.bf16 %v383_v16 }
 0x42f   : > { %v3367_v20 = vadd.f32 %v3335_v32, %v3303_v7 }
 0x431   : > { %v3399_v31 = vmax.f32 %v3367_v20, 0.0 }
 0x432   : > { %v3212_v19 = vpop.f32.mrf.mxu2 }
 0x433   : > { %3431 = vst.msk [vmem:[%s4839_s18 + $0x90] sm:$0xff] %vm481_vm0, %v3399_v31  ;;  %v3268_v15 = vmul.f32 %v5206_v57, %v3212_v19 }
 0x435   : > { %v3304_v55 = vadd.f32 %v5213_v6, %v3268_v15  ;;  %v3340_v15 = vunpack.c.h.bf16 %v383_v16 }
 0x437   : > { %v3368_v58 = vadd.f32 %v3336_v21, %v3304_v55  ;;  %3693 = vmatmul.msk.bf16.gmra.mxu2 %vm723_vm1, %v5190_v41  ;;  %v387_v41 = vld [vmem:[%s3861_s20 + $0x68] sm:$0xff]  }
 0x438   : > { %v3343_v38 = vunpack.c.l.bf16 %v387_v41 }
 0x439   : > { %v3400_v14 = vmax.f32 %v3368_v58, 0.0  ;;  %v385_v58 = vld [vmem:[%s3861_s20 + $0x60] sm:$0xff]  }
 0x43b   : > { %3432 = vst.msk [vmem:[%s4839_s18 + $0x98] sm:$0xff] %vm481_vm0, %v3400_v14 }
 0x43c   : > { %v2979_v45 = vpop.f32.mrf.mxu3 }
 0x43d   : > { %v3018_v59 = vmul.f32 %v5091_v9, %v2979_v45 }
 0x43f   : > { %v3054_v42 = vadd.f32 %v5102_v23, %v3018_v59 }
 0x441   : > { %v3086_v5 = vmax.f32 %v3054_v42, 0.0 }
 0x444   : > { %v2981_v60 = vpop.f32.mrf.mxu3 }
 0x445   : > { %v3019_v56 = vmul.f32 %v5091_v9, %v2981_v60  ;;  %v3341_v60 = vunpack.c.l.bf16 %v385_v58 }
 0x447   : > { %v3055_v10 = vadd.f32 %v5102_v23, %v3019_v56  ;;  %v3344_v23 = vunpack.c.h.bf16 %v387_v41 }
 0x449   : > { %v3087_v49 = vmax.f32 %v3055_v10, 0.0 }
 0x44b   : > { %v3103_v8 = vpack.c.bf16 %v3087_v49, %v3086_v5 }
 0x44d   : > { %3696 = vmatmul.msk.bf16.gmra.mxu3 %vm723_vm1, %v3103_v8  ;;  %v3342_v8 = vunpack.c.h.bf16 %v385_v58 }
 0x450   : > { %v3230_v51 = vpop.f32.mrf.mxu3 }
 0x451   : > { %v3275_v62 = vmul.f32 %v5206_v57, %v3230_v51 }
 0x453   : > { %v3311_v39 = vadd.f32 %v5213_v6, %v3275_v62 }
 0x455   : > { %v3375_v22 = vadd.f32 %v3343_v38, %v3311_v39  ;;  %v391_v38 = vld [vmem:[%s3861_s20 + $0x78] sm:$0xff]  }
 0x457   : > { %v3407_v34 = vmax.f32 %v3375_v22, 0.0 }
 0x458   : > { %v3232_v17 = vpop.f32.mrf.mxu3 }
 0x459   : > { %3439 = vst.msk [vmem:[%s4839_s18 + $0xd0] sm:$0xff] %vm481_vm0, %v3407_v34  ;;  %v3276_v9 = vmul.f32 %v5206_v57, %v3232_v17  ;;  %v3347_v34 = vunpack.c.l.bf16 %v391_v38 }
 0x45b   : > { %v3312_v13 = vadd.f32 %v5213_v6, %v3276_v9 }
 0x45d   : > { %v3376_v33 = vadd.f32 %v3344_v23, %v3312_v13 }
 0x45f   : > { %v3408_v4 = vmax.f32 %v3376_v33, 0.0 }
 0x461   : > { %3440 = vst.msk [vmem:[%s4839_s18 + $0xd8] sm:$0xff] %vm481_vm0, %v3408_v4  ;;  %v3348_v4 = vunpack.c.h.bf16 %v391_v38 }
 0x46a   : > { %v3215_v24 = vpop.f32.mrf.mxu2 }
 0x46b   : > { %v3269_v61 = vmul.f32 %v5206_v57, %v3215_v24 }
 0x46d   : > { %v3305_v35 = vadd.f32 %v5213_v6, %v3269_v61 }
 0x46f   : > { %v3369_v44 = vadd.f32 %v3337_v26, %v3305_v35 }
 0x471   : > { %v3401_v0 = vmax.f32 %v3369_v44, 0.0 }
 0x472   : > { %v3217_v3 = vpop.f32.mrf.mxu2 }
 0x473   : > { %3433 = vst.msk [vmem:[%s4839_s18 + $0xa0] sm:$0xff] %vm481_vm0, %v3401_v0  ;;  %v3270_v43 = vmul.f32 %v5206_v57, %v3217_v3 }
 0x475   : > { %v3306_v11 = vadd.f32 %v5213_v6, %v3270_v43 }
 0x477   : > { %v3370_v18 = vadd.f32 %v3338_v27, %v3306_v11 }
 0x479   : > { %v3402_v29 = vmax.f32 %v3370_v18, 0.0 }
 0x47b   : > { %3434 = vst.msk [vmem:[%s4839_s18 + $0xa8] sm:$0xff] %vm481_vm0, %v3402_v29 }
 0x490   : > { %v3235_v50 = vpop.f32.mrf.mxu3 }
 0x491   : > { %v3277_v37 = vmul.f32 %v5206_v57, %v3235_v50 }
 0x493   : > { %v3313_v47 = vadd.f32 %v5213_v6, %v3277_v37 }
 0x495   : > { %v3377_v2 = vadd.f32 %v3345_v30, %v3313_v47 }
 0x497   : > { %v3409_v25 = vmax.f32 %v3377_v2, 0.0 }
 0x498   : > { %v3237_v1 = vpop.f32.mrf.mxu3 }
 0x499   : > { %3441 = vst.msk [vmem:[%s4839_s18 + $0xe0] sm:$0xff] %vm481_vm0, %v3409_v25  ;;  %v3278_v54 = vmul.f32 %v5206_v57, %v3237_v1 }
 0x49b   : > { %v3314_v12 = vadd.f32 %v5213_v6, %v3278_v54 }
 0x49d   : > { %v3378_v40 = vadd.f32 %v3346_v48, %v3314_v12 }
 0x49f   : > { %v3410_v52 = vmax.f32 %v3378_v40, 0.0 }
 0x4a1   : > { %3442 = vst.msk [vmem:[%s4839_s18 + $0xe8] sm:$0xff] %vm481_vm0, %v3410_v52 }
 0x4aa   : > { %v3220_v28 = vpop.f32.mrf.mxu2 }
 0x4ab   : > { %v3271_v63 = vmul.f32 %v5206_v57, %v3220_v28 }
 0x4ad   : > { %v3307_v32 = vadd.f32 %v5213_v6, %v3271_v63 }
 0x4af   : > { %v3371_v7 = vadd.f32 %v3339_v53, %v3307_v32 }
 0x4b1   : > { %v3403_v20 = vmax.f32 %v3371_v7, 0.0 }
 0x4b2   : > { %v3222_v31 = vpop.f32.mrf.mxu2 }
 0x4b3   : > { %3435 = vst.msk [vmem:[%s4839_s18 + $0xb0] sm:$0xff] %vm481_vm0, %v3403_v20  ;;  %v3272_v19 = vmul.f32 %v5206_v57, %v3222_v31 }
 0x4b5   : > { %v3308_v21 = vadd.f32 %v5213_v6, %v3272_v19 }
 0x4b7   : > { %v3372_v55 = vadd.f32 %v3340_v15, %v3308_v21 }
 0x4b9   : > { %v3404_v14 = vmax.f32 %v3372_v55, 0.0 }
 0x4ba   : > { %v3225_v45 = vpop.f32.mrf.mxu2 }
 0x4bb   : > { %3436 = vst.msk [vmem:[%s4839_s18 + $0xb8] sm:$0xff] %vm481_vm0, %v3404_v14  ;;  %v3273_v59 = vmul.f32 %v5206_v57, %v3225_v45 }
 0x4bd   : > { %v3309_v42 = vadd.f32 %v5213_v6, %v3273_v59 }
 0x4bf   : > { %v3373_v56 = vadd.f32 %v3341_v60, %v3309_v42 }
 0x4c1   : > { %v3405_v10 = vmax.f32 %v3373_v56, 0.0 }
 0x4c2   : > { %v3227_v5 = vpop.f32.mrf.mxu2 }
 0x4c3   : > { %3437 = vst.msk [vmem:[%s4839_s18 + $0xc0] sm:$0xff] %vm481_vm0, %v3405_v10  ;;  %v3274_v49 = vmul.f32 %v5206_v57, %v3227_v5 }
 0x4c5   : > { %v3310_v41 = vadd.f32 %v5213_v6, %v3274_v49 }
 0x4c7   : > { %v3374_v51 = vadd.f32 %v3342_v8, %v3310_v41 }
 0x4c9   : > { %v3406_v62 = vmax.f32 %v3374_v51, 0.0 }
 0x4cb   : > { %3438 = vst.msk [vmem:[%s4839_s18 + $0xc8] sm:$0xff] %vm481_vm0, %v3406_v62 }
 0x4d0   : > { %v3240_v39 = vpop.f32.mrf.mxu3 }
 0x4d1   : > { %v3279_v22 = vmul.f32 %v5206_v57, %v3240_v39 }
 0x4d3   : > { %v3315_v17 = vadd.f32 %v5213_v6, %v3279_v22 }
 0x4d5   : > { %v3379_v9 = vadd.f32 %v3347_v34, %v3315_v17 }
 0x4d7   : > { %v3411_v23 = vmax.f32 %v3379_v9, 0.0 }
 0x4d8   : > { %v3242_v13 = vpop.f32.mrf.mxu3 }
 0x4d9   : > { %3443 = vst.msk [vmem:[%s4839_s18 + $0xf0] sm:$0xff] %vm481_vm0, %v3411_v23  ;;  %v3280_v33 = vmul.f32 %v5206_v57, %v3242_v13 }
 0x4db   : > { %v3316_v36 = vadd.f32 %v5213_v6, %v3280_v33 }
 0x4dd   : > { %v3380_v24 = vadd.f32 %v3348_v4, %v3316_v36 }
 0x4df   : > { %v3412_v61 = vmax.f32 %v3380_v24, 0.0 }
 0x4e1   : > { %3444 = vst.msk [vmem:[%s4839_s18 + $0xf8] sm:$0xff] %vm481_vm0, %v3412_v61 }
 0x4e2 PF: > { %s20_s13 = sadd.s32 1, %s3778_s13  }
 0x4e3   : > { %p17_p4 = scmp.ge.s32.totalorder %s20_s13, 4  }
 0x4e5   :  { %19 = sbr.rel (!%p17_p4) target bundleno = 1 (0x1), region = 92 }

</bundles_post_ra>
